<compile_context>
chip_gen: v7x
topology: tpu7x:2x2x1
jax: 0.10.0
libtpu: 0.0.40
codegen_flags: <defaults>
</compile_context>

<pallas_src>
import jax
import jax.numpy as jnp
from jax.experimental import pallas as pl
from jax.experimental.pallas import tpu as pltpu  # noqa: F401  (TPU backend)

# Logical (PyTorch) dims.
C_IN = 512      # resnet18 channels entering avgpool
D_LAST = 1000   # resnet.last_linear output
D_BTL1 = 32     # lin0 output
D_BTL2 = 256    # lin1 output
D_VA = 7        # va_regressor output

# Lane-padded dim used for the big hidden layer (and the packed bias rows).
P_LAST = 1024


# ---------------------------------------------------------------------------
# Fused Pallas kernel: avgpool + 4 linears + 2 ReLUs in a single invocation.
# ---------------------------------------------------------------------------
def _regressor_kernel(x_ref, wl_ref, b_ref, w0_ref, w1_ref, wv_ref,
                      va_ref, btl1_ref):
    # Global average pool fused in-kernel: (N, C, HW) -> (N, C), f32 reduce.
    pooled = jnp.mean(x_ref[...], axis=-1)

    # resnet.last_linear: 512 -> 1000 (padded to 1024 lanes). bf16 MXU inputs,
    # f32 accumulation; padded columns stay exactly 0 (zero W cols / zero bias).
    h = jnp.dot(pooled.astype(jnp.bfloat16), wl_ref[...],
                preferred_element_type=jnp.float32) + b_ref[0:1, :]

    # TODO(synk): F.dropout2d in the reference module is stochastic train-mode
    # dropout (p=0.5); implemented as identity (eval semantics) here.

    # lin0 + ReLU: 1000(->1024 padded K) -> 32.  Padded K rows of w0 are zero.
    h1 = jnp.maximum(
        jnp.dot(h.astype(jnp.bfloat16), w0_ref[...],
                preferred_element_type=jnp.float32) + b_ref[1:2, :D_BTL1],
        0.0)

    # lin1 + ReLU: 32 -> 256.
    h2 = jnp.maximum(
        jnp.dot(h1.astype(jnp.bfloat16), w1_ref[...],
                preferred_element_type=jnp.float32) + b_ref[2:3, :D_BTL2],
        0.0)

    # va_regressor: 256 -> 7.
    va = jnp.dot(h2.astype(jnp.bfloat16), wv_ref[...],
                 preferred_element_type=jnp.float32) + b_ref[3:4, :D_VA]

    va_ref[...] = va.astype(va_ref.dtype)
    btl1_ref[...] = h1.astype(btl1_ref.dtype)


def _full_spec(shape):
    """Single-block BlockSpec covering the whole (small) array. Grid-safe."""
    nd = len(shape)
    return pl.BlockSpec(shape, lambda *_: (0,) * nd)


# ---------------------------------------------------------------------------
# One jit for the whole forward path (zero-copy reshape + single pallas_call).
# ---------------------------------------------------------------------------
@jax.jit
def regressor_forward(x, wl, biases, w0, w1, wv):
    n, c, hh, ww = x.shape
    hw = hh * ww
    x3d = x.reshape(n, c, hw)  # contiguous reshape: no data movement, no launch

    # Advisory cost hint so XLA can overlap this tiny call with neighbors.
    flops = 2 * n * (c * P_LAST + P_LAST * D_BTL1 + D_BTL1 * D_BTL2
                     + D_BTL2 * D_VA)
    bytes_accessed = (x3d.size * 4            # f32 activations in
                      + (wl.size + w0.size + w1.size + wv.size) * 2  # bf16 W
                      + biases.size * 4       # packed f32 biases
                      + n * (D_VA + D_BTL1) * 4)                     # outputs

    va, btl1 = pl.pallas_call(
        _regressor_kernel,
        out_shape=(
            jax.ShapeDtypeStruct((n, D_VA), jnp.float32),
            jax.ShapeDtypeStruct((n, D_BTL1), jnp.float32),
        ),
        in_specs=[
            _full_spec((n, c, hw)),          # features (N, C, HW), f32
            _full_spec((C_IN, P_LAST)),      # last_linear W^T, bf16 (padded N)
            _full_spec((4, P_LAST)),         # packed biases, f32
            _full_spec((P_LAST, D_BTL1)),    # lin0 W^T, bf16 (padded K only)
            _full_spec((D_BTL1, D_BTL2)),    # lin1 W^T, bf16
            _full_spec((D_BTL2, D_VA)),      # va_regressor W^T, bf16
        ],
        out_specs=(
            _full_spec((n, D_VA)),
            _full_spec((n, D_BTL1)),
        ),
        cost_estimate=pl.CostEstimate(flops=flops, transcendentals=0,
                                      bytes_accessed=bytes_accessed),
    )(x3d, wl, biases, w0, w1, wv)

    return va, btl1


# ---------------------------------------------------------------------------
# Parameter container / padding helpers.
# ---------------------------------------------------------------------------
def _pad_weight_bf16(w, din_pad, dout_pad):
    """torch weight (Dout, Din) -> zero-padded, transposed bf16 (Din_pad, Dout_pad)."""
    dout, din = w.shape
    wt = jnp.zeros((din_pad, dout_pad), jnp.bfloat16)
    return wt.at[:din, :dout].set(w.T.astype(jnp.bfloat16))


def _pack_biases(bl, b0, b1, bv):
    """Pack the 4 bias vectors into one (4, P_LAST) f32 array (single DMA)."""
    packed = jnp.zeros((4, P_LAST), jnp.float32)
    packed = packed.at[0, :bl.shape[0]].set(bl)
    packed = packed.at[1, :b0.shape[0]].set(b0)
    packed = packed.at[2, :b1.shape[0]].set(b1)
    packed = packed.at[3, :bv.shape[0]].set(bv)
    return packed


class RegressorR18Category:
    """Pallas/JAX port of Regressor_R18_Category (head from avgpool onward)."""

    def __init__(self, key):
        def linear_init(k, dout, din):
            kw, kb = jax.random.split(k)
            bound = 1.0 / (din ** 0.5)
            w = jax.random.uniform(kw, (dout, din), jnp.float32, -bound, bound)
            b = jax.random.uniform(kb, (dout,), jnp.float32, -bound, bound)
            return w, b

        kl, k0, k1, kv = jax.random.split(key, 4)
        self.wl, self.bl = linear_init(kl, D_LAST, C_IN)     # resnet.last_linear
        self.w0, self.b0 = linear_init(k0, D_BTL1, D_LAST)   # lin0
        self.w1, self.b1 = linear_init(k1, D_BTL2, D_BTL1)   # lin1
        self.wv, self.bv = linear_init(kv, D_VA, D_BTL2)     # va_regressor

        # Padded, transposed bf16 weights for lane-dense MXU matmuls.
        self.wl_p = _pad_weight_bf16(self.wl, C_IN, P_LAST)      # (512, 1024)
        self.w0_p = _pad_weight_bf16(self.w0, P_LAST, D_BTL1)    # (1024, 32)
        self.w1_p = _pad_weight_bf16(self.w1, D_BTL1, D_BTL2)    # (32, 256)
        self.wv_p = _pad_weight_bf16(self.wv, D_BTL2, D_VA)      # (256, 7)
        self.biases_p = _pack_biases(self.bl, self.b0, self.b1, self.bv)

    def __call__(self, x):
        return regressor_forward(x, self.wl_p, self.biases_p,
                                 self.w0_p, self.w1_p, self.wv_p)


# ---------------------------------------------------------------------------
# Pure-JAX reference mirroring the kernel's bf16-input / f32-accumulate math.
# ---------------------------------------------------------------------------
def _ref_forward(x, m):
    bf16 = jnp.bfloat16
    pooled = x.mean(axis=(2, 3))
    h = jnp.dot(pooled.astype(bf16), m.wl.T.astype(bf16),
                preferred_element_type=jnp.float32) + m.bl
    h1 = jnp.maximum(
        jnp.dot(h.astype(bf16), m.w0.T.astype(bf16),
                preferred_element_type=jnp.float32) + m.b0, 0.0)
    h2 = jnp.maximum(
        jnp.dot(h1.astype(bf16), m.w1.T.astype(bf16),
                preferred_element_type=jnp.float32) + m.b1, 0.0)
    va = jnp.dot(h2.astype(bf16), m.wv.T.astype(bf16),
                 preferred_element_type=jnp.float32) + m.bv
    return va, h1


if __name__ == "__main__":
    key = jax.random.PRNGKey(0)
    k_model, k_x = jax.random.split(key)

    model = RegressorR18Category(k_model)

    # ResNet-18 pre-avgpool feature map: (batch=2, channels=512, 7, 7).
    x = jax.random.normal(k_x, (2, C_IN, 7, 7), jnp.float32)

    va, btl1 = model(x)
    jax.block_until_ready((va, btl1))

    va_ref, btl1_ref = _ref_forward(x, model)
    assert va.shape == (2, D_VA) and btl1.shape == (2, D_BTL1)
    # Kernel and reference both use bf16 MXU inputs with f32 accumulation;
    # only summation-order differences remain.
    assert jnp.allclose(va, va_ref, rtol=2e-2, atol=2e-2), "x_va mismatch"
    assert jnp.allclose(btl1, btl1_ref, rtol=2e-2, atol=2e-2), "x_btl_1 mismatch"

    print("KERNEL_OK")
</pallas_src>

<mosaic_0001>
module attributes {stable_mosaic.version = 11 : i64} {
  func.func @_regressor_kernel(%arg0: memref<2x512x49xf32, #tpu.memory_space<vmem>>, %arg1: memref<512x1024xbf16, #tpu.memory_space<vmem>>, %arg2: memref<4x1024xf32, #tpu.memory_space<vmem>>, %arg3: memref<1024x32xbf16, #tpu.memory_space<vmem>>, %arg4: memref<32x256xbf16, #tpu.memory_space<vmem>>, %arg5: memref<256x7xbf16, #tpu.memory_space<vmem>>, %arg6: memref<2x7xf32, #tpu.memory_space<vmem>>, %arg7: memref<2x32xf32, #tpu.memory_space<vmem>>) attributes {dimension_semantics = [], scalar_prefetch = 0 : i64, scratch_operands = 0 : i64, tpu.core_type = #tpu.core_type<tc>} {
    %c0 = arith.constant 0 : index
    %c0_0 = arith.constant 0 : index
    %c0_1 = arith.constant 0 : index
    %0 = vector.load %arg0[%c0, %c0_0, %c0_1] : memref<2x512x49xf32, #tpu.memory_space<vmem>>, vector<2x512x49xf32>
    %cst = arith.constant dense<0.000000e+00> : vector<2x512xf32>
    %1 = vector.multi_reduction <add>, %0, %cst [2] : vector<2x512x49xf32> to vector<2x512xf32>
    %cst_2 = arith.constant 4.900000e+01 : f32
    %2 = vector.broadcast %cst_2 : f32 to vector<2x512xf32>
    %3 = arith.divf %1, %2 : vector<2x512xf32>
    %4 = arith.truncf %3 : vector<2x512xf32> to vector<2x512xbf16>
    %c0_3 = arith.constant 0 : index
    %c0_4 = arith.constant 0 : index
    %5 = vector.load %arg1[%c0_3, %c0_4] : memref<512x1024xbf16, #tpu.memory_space<vmem>>, vector<512x1024xbf16>
    %cst_5 = arith.constant dense<0.000000e+00> : vector<2x1024xf32>
    %6 = tpu.matmul %4, %5, %cst_5 {dimension_numbers = #tpu.dot_dimension_numbers<[1], [0], [0], [1], [0, 0, 1, 1], [], []>} : vector<2x512xbf16>, vector<512x1024xbf16>, vector<2x1024xf32> -> vector<2x1024xf32>
    %c0_6 = arith.constant 0 : index
    %c0_7 = arith.constant 0 : index
    %7 = vector.load %arg2[%c0_6, %c0_7] : memref<4x1024xf32, #tpu.memory_space<vmem>>, vector<1x1024xf32>
    %8 = vector.broadcast %7 : vector<1x1024xf32> to vector<2x1024xf32>
    %9 = arith.addf %6, %8 : vector<2x1024xf32>
    %10 = arith.truncf %9 : vector<2x1024xf32> to vector<2x1024xbf16>
    %c0_8 = arith.constant 0 : index
    %c0_9 = arith.constant 0 : index
    %11 = vector.load %arg3[%c0_8, %c0_9] : memref<1024x32xbf16, #tpu.memory_space<vmem>>, vector<1024x32xbf16>
    %cst_10 = arith.constant dense<0.000000e+00> : vector<2x32xf32>
    %12 = tpu.matmul %10, %11, %cst_10 {dimension_numbers = #tpu.dot_dimension_numbers<[1], [0], [0], [1], [0, 0, 1, 1], [], []>} : vector<2x1024xbf16>, vector<1024x32xbf16>, vector<2x32xf32> -> vector<2x32xf32>
    %c1 = arith.constant 1 : index
    %c0_11 = arith.constant 0 : index
    %13 = vector.load %arg2[%c1, %c0_11] : memref<4x1024xf32, #tpu.memory_space<vmem>>, vector<1x32xf32>
    %14 = vector.broadcast %13 : vector<1x32xf32> to vector<2x32xf32>
    %15 = arith.addf %12, %14 : vector<2x32xf32>
    %cst_12 = arith.constant 0.000000e+00 : f32
    %16 = vector.broadcast %cst_12 : f32 to vector<2x32xf32>
    %17 = arith.maximumf %15, %16 : vector<2x32xf32>
    %18 = arith.truncf %17 : vector<2x32xf32> to vector<2x32xbf16>
    %c0_13 = arith.constant 0 : index
    %c0_14 = arith.constant 0 : index
    %19 = vector.load %arg4[%c0_13, %c0_14] : memref<32x256xbf16, #tpu.memory_space<vmem>>, vector<32x256xbf16>
    %cst_15 = arith.constant dense<0.000000e+00> : vector<2x256xf32>
    %20 = tpu.matmul %18, %19, %cst_15 {dimension_numbers = #tpu.dot_dimension_numbers<[1], [0], [0], [1], [0, 0, 1, 1], [], []>} : vector<2x32xbf16>, vector<32x256xbf16>, vector<2x256xf32> -> vector<2x256xf32>
    %c2 = arith.constant 2 : index
    %c0_16 = arith.constant 0 : index
    %21 = vector.load %arg2[%c2, %c0_16] : memref<4x1024xf32, #tpu.memory_space<vmem>>, vector<1x256xf32>
    %22 = vector.broadcast %21 : vector<1x256xf32> to vector<2x256xf32>
    %23 = arith.addf %20, %22 : vector<2x256xf32>
    %cst_17 = arith.constant 0.000000e+00 : f32
    %24 = vector.broadcast %cst_17 : f32 to vector<2x256xf32>
    %25 = arith.maximumf %23, %24 : vector<2x256xf32>
    %26 = arith.truncf %25 : vector<2x256xf32> to vector<2x256xbf16>
    %c0_18 = arith.constant 0 : index
    %c0_19 = arith.constant 0 : index
    %27 = vector.load %arg5[%c0_18, %c0_19] : memref<256x7xbf16, #tpu.memory_space<vmem>>, vector<256x7xbf16>
    %cst_20 = arith.constant dense<0.000000e+00> : vector<2x7xf32>
    %28 = tpu.matmul %26, %27, %cst_20 {dimension_numbers = #tpu.dot_dimension_numbers<[1], [0], [0], [1], [0, 0, 1, 1], [], []>} : vector<2x256xbf16>, vector<256x7xbf16>, vector<2x7xf32> -> vector<2x7xf32>
    %c3 = arith.constant 3 : index
    %c0_21 = arith.constant 0 : index
    %29 = vector.load %arg2[%c3, %c0_21] : memref<4x1024xf32, #tpu.memory_space<vmem>>, vector<1x7xf32>
    %30 = vector.broadcast %29 : vector<1x7xf32> to vector<2x7xf32>
    %31 = arith.addf %28, %30 : vector<2x7xf32>
    %c0_22 = arith.constant 0 : index
    %c0_23 = arith.constant 0 : index
    %32 = vector.load %arg6[%c0_22, %c0_23] : memref<2x7xf32, #tpu.memory_space<vmem>>, vector<2x7xf32>
    tpu.vector_store %arg6[%c0_22, %c0_23], %31 {strides = array<i32>} : memref<2x7xf32, #tpu.memory_space<vmem>>, vector<2x7xf32>,
    %c0_24 = arith.constant 0 : index
    %c0_25 = arith.constant 0 : index
    %33 = vector.load %arg7[%c0_24, %c0_25] : memref<2x32xf32, #tpu.memory_space<vmem>>, vector<2x32xf32>
    tpu.vector_store %arg7[%c0_24, %c0_25], %17 {strides = array<i32>} : memref<2x32xf32, #tpu.memory_space<vmem>>, vector<2x32xf32>,
    return
  }
}

</mosaic_0001>

<bundles_post_ra>
// kernel: regressor_forward.1
= control target key start
LH: loop header
LB: loop body
LE: loop exit
PB: predicated region body
PF: predicated region fallthrough
CT: control target
= control target key end

     0   :  { %13 = vsyncpa [#allocation3], 0  ;;  %s7455_s0 = inlined_call_operand.vmem [shape: f32[2,512,49], index: 0, kind: input, shape index: {}]   ;;  %s7456_s1 = inlined_call_operand.vmem [shape: bf16[512,1024], index: 1, kind: input, shape index: {}]   ;;  %s7457_s2 = inlined_call_operand.hbm [shape: f32[4,1024], index: 2, kind: input, shape index: {}]   ;;  %s7458_s3 = inlined_call_operand.vmem [shape: bf16[1024,32], index: 3, kind: input, shape index: {}]   ;;  %s7459_s4 = inlined_call_operand.hbm [shape: bf16[32,256], index: 4, kind: input, shape index: {}]   ;;  %s7460_s5 = inlined_call_operand.vmem [shape: bf16[256,7], index: 5, kind: input, shape index: {}]   ;;  %s7461_s6 = inlined_call_operand.hbm [shape: f32[2,7], index: 6, kind: output, shape index: {0}]   ;;  %s7462_s7 = inlined_call_operand.hbm [shape: f32[2,32], index: 7, kind: output, shape index: {1}]  }
   0x1   :  { %14 = vsyncpa [#allocation6], 0 }
   0x2   :  { %15 = vsyncpa [#allocation4], 0 }
   0x3   :  { %16 = vsyncpa [#allocation9], 0  ;;  %s5181_s24 = smov [#allocation2]   ;;  %s5182_s26 = smov [#allocation5]  }
   0x4   :  { %s27_s25 = sshll.u32 %s5181_s24, 4  ;;  %s38_s27 = sshll.u32 %s5182_s26, 4  ;;  %s28_s25 = int_to_ptr.vmem [resolvable:$true] %s27_s25  ;;  %s5228_s27 = int_to_ptr.vmem [resolvable:$true] %s38_s27 }
   0x5   :  { %s5085_s30 = scalar_lea.hbm %s7457_s2, 512 }
   0x6   :  { %p5086_p0 = scmp.ne.s32.totalorder %s7457_s2, %s5085_s30  ;;  %p5089_p1 = scmp.lt.u32.totalorder %s5085_s30, %s7457_s2 }
   0x8   :  { %p5091_p2 = pnand %p5089_p1, %p5086_p0 }
   0xa   :  { %5094 = shalt.err (!%p5091_p2)
}
   0xb   :  { %s5095_s12 = scalar_lea.vmem %s28_s25, 512  ;;  %p5100_p4 = scmp.lt.s32.totalorder %s28_s25, %s28_s25 }
   0xc   :  { %p5096_p3 = scmp.ne.s32.totalorder %s28_s25, %s5095_s12  ;;  %p5101_p5 = scmp.lt.s32.totalorder %s5095_s12, %s5095_s12 }
   0xe   :  { %p5102_p6 = por %p5101_p5, %p5100_p4 }
  0x10   :  { %p5103_p7 = pnand %p5102_p6, %p5096_p3 }
  0x12   :  { %5106 = shalt.err (!%p5103_p7)
}
  0x13   :  { %30 = dma.hbm_to_vmem [thread:$0]  %s7457_s2, 512, %s28_s25, [#allocation3]  }
  0x14   :  { %s5107_s17 = scalar_lea.hbm %s7459_s4, 512 }
  0x15   :  { %p5108_p8 = scmp.ne.s32.totalorder %s7459_s4, %s5107_s17  ;;  %p5111_p9 = scmp.lt.u32.totalorder %s5107_s17, %s7459_s4 }
  0x17   :  { %p5113_p10 = pnand %p5111_p9, %p5108_p8 }
  0x19   :  { %5116 = shalt.err (!%p5113_p10)
}
  0x1a   :  { %s5117_s22 = scalar_lea.vmem %s5228_s27, 512  ;;  %p5122_p12 = scmp.lt.s32.totalorder %s5228_s27, %s5228_s27 }
  0x1b   :  { %p5118_p11 = scmp.ne.s32.totalorder %s5228_s27, %s5117_s22  ;;  %p5123_p13 = scmp.lt.s32.totalorder %s5117_s22, %s5117_s22 }
  0x1d   :  { %p5124_p0 = por %p5123_p13, %p5122_p12 }
  0x1f   :  { %p5125_p1 = pnand %p5124_p0, %p5118_p11 }
  0x21   :  { %5128 = shalt.err (!%p5125_p1)
}
  0x22   :  { %s5183_s2 = smov 128   ;;  %s5184_s23 = smov 8  }
  0x23   :  { %44 = dma.hbm_to_vmem [thread:$0]  %s7459_s4, 512, %s5228_s27, [#allocation6], %s5183_s2, %s5183_s2, %s5184_s23  }
  0x24   :  { %5173 = dma.done.wait [#allocation3], 512  }
  0x25   :  { %5174 = vsyncadd [#allocation3], 4294966784 }
  0x26   :  { %5175 = dma.done.wait [#allocation6], 512  }
  0x27   :  { %5176 = vsyncadd [#allocation6], 4294966784  ;;  %vm182_vm0 = vcmask 400384   ;;  %v134_v0 = vld [vmem:[%s7455_s0 + $0x280] sm:$0xff]  ;;  %v135_v2 = vld [vmem:[%s7455_s0 + $0x288] sm:$0xff]  ;;  %vm1261_vm1 = vcmask 130112  }
  0x28   :  { %v70_v1 = vld [vmem:[%s7455_s0 + $0x80] sm:$0xff]  ;;  %v423_v3 = vsel %vm182_vm0, %v134_v0, 0.0  ;;  %v71_v5 = vld [vmem:[%s7455_s0 + $0x88] sm:$0xff]  ;;  %v426_v6 = vsel %vm182_vm0, %v135_v2, 0.0  ;;  %v73_v12 = vld [vmem:[%s7455_s0 + $0x98] sm:$0xff]  ;;  %vm1268_vm2 = vcmask 195712  }
  0x29   :  { %v231_v4 = vsel %vm182_vm0, %v70_v1, 0.0  ;;  %424 = vadd.xlane.f32.xlu1 %v423_v3  ;;  %v234_v7 = vsel %vm182_vm0, %v71_v5, 0.0  ;;  %v55_v8 = vld [vmem:[%s7455_s0 + $0x8] sm:$0xff]  ;;  %v54_v9 = vld [vmem:[%s7455_s0] sm:$0xff]  ;;  %v72_v13 = vld [vmem:[%s7455_s0 + $0x90] sm:$0xff]  ;;  %v240_v14 = vsel %vm182_vm0, %v73_v12, 0.0 }
  0x2a   :  { %232 = vadd.xlane.f32.xlu0 %v231_v4  ;;  %v186_v10 = vsel %vm182_vm0, %v55_v8, 0.0  ;;  %v183_v11 = vsel %vm182_vm0, %v54_v9, 0.0  ;;  %v237_v15 = vsel %vm182_vm0, %v72_v13, 0.0  ;;  %v119_v16 = vld [vmem:[%s7455_s0 + $0x208] sm:$0xff]  ;;  %v118_v17 = vld [vmem:[%s7455_s0 + $0x200] sm:$0xff]  ;;  %v137_v20 = vld [vmem:[%s7455_s0 + $0x298] sm:$0xff] }
  0x2b   :  { %v378_v18 = vsel %vm182_vm0, %v119_v16, 0.0  ;;  %v375_v19 = vsel %vm182_vm0, %v118_v17, 0.0  ;;  %v136_v21 = vld [vmem:[%s7455_s0 + $0x290] sm:$0xff]  ;;  %v432_v22 = vsel %vm182_vm0, %v137_v20, 0.0  ;;  %v57_v24 = vld [vmem:[%s7455_s0 + $0x18] sm:$0xff]  ;;  %v75_v30 = vld [vmem:[%s7455_s0 + $0xa8] sm:$0xff] }
  0x2c   :  { %v429_v23 = vsel %vm182_vm0, %v136_v21, 0.0  ;;  %v56_v25 = vld [vmem:[%s7455_s0 + $0x10] sm:$0xff]  ;;  %v192_v26 = vsel %vm182_vm0, %v57_v24, 0.0  ;;  %v121_v28 = vld [vmem:[%s7455_s0 + $0x218] sm:$0xff]  ;;  %v74_v33 = vld [vmem:[%s7455_s0 + $0xa0] sm:$0xff]  ;;  %v246_v34 = vsel %vm182_vm0, %v75_v30, 0.0 }
  0x2d   :  { %427 = vadd.xlane.f32.xlu1 %v426_v6  ;;  %v189_v27 = vsel %vm182_vm0, %v56_v25, 0.0  ;;  %v120_v29 = vld [vmem:[%s7455_s0 + $0x210] sm:$0xff]  ;;  %v384_v31 = vsel %vm182_vm0, %v121_v28, 0.0  ;;  %v139_v35 = vld [vmem:[%s7455_s0 + $0x2a8] sm:$0xff]  ;;  %v243_v36 = vsel %vm182_vm0, %v74_v33, 0.0  ;;  %v138_v37 = vld [vmem:[%s7455_s0 + $0x2a0] sm:$0xff] }
  0x2e   :  { %235 = vadd.xlane.f32.xlu0 %v234_v7  ;;  %v381_v32 = vsel %vm182_vm0, %v120_v29, 0.0  ;;  %v438_v38 = vsel %vm182_vm0, %v139_v35, 0.0  ;;  %v59_v39 = vld [vmem:[%s7455_s0 + $0x28] sm:$0xff]  ;;  %v435_v40 = vsel %vm182_vm0, %v138_v37, 0.0  ;;  %v58_v41 = vld [vmem:[%s7455_s0 + $0x20] sm:$0xff]  ;;  %v77_v47 = vld [vmem:[%s7455_s0 + $0xb8] sm:$0xff] }
  0x2f   :  { %v198_v42 = vsel %vm182_vm0, %v59_v39, 0.0  ;;  %v123_v43 = vld [vmem:[%s7455_s0 + $0x228] sm:$0xff]  ;;  %v195_v44 = vsel %vm182_vm0, %v58_v41, 0.0  ;;  %v122_v45 = vld [vmem:[%s7455_s0 + $0x220] sm:$0xff]  ;;  %v76_v49 = vld [vmem:[%s7455_s0 + $0xb0] sm:$0xff]  ;;  %v252_v50 = vsel %vm182_vm0, %v77_v47, 0.0 }
  0x30   :  { %v390_v46 = vsel %vm182_vm0, %v123_v43, 0.0  ;;  %v387_v48 = vsel %vm182_vm0, %v122_v45, 0.0  ;;  %v141_v51 = vld [vmem:[%s7455_s0 + $0x2b8] sm:$0xff]  ;;  %v249_v52 = vsel %vm182_vm0, %v76_v49, 0.0  ;;  %v140_v53 = vld [vmem:[%s7455_s0 + $0x2b0] sm:$0xff]  ;;  %v79_v63 = vld [vmem:[%s7455_s0 + $0xc8] sm:$0xff] }
  0x31   :  { %187 = vadd.xlane.f32.xlu1 %v186_v10  ;;  %v444_v54 = vsel %vm182_vm0, %v141_v51, 0.0  ;;  %v61_v55 = vld [vmem:[%s7455_s0 + $0x38] sm:$0xff]  ;;  %v441_v56 = vsel %vm182_vm0, %v140_v53, 0.0  ;;  %v60_v57 = vld [vmem:[%s7455_s0 + $0x30] sm:$0xff]  ;;  %v78_v1 = vld [vmem:[%s7455_s0 + $0xc0] sm:$0xff]  ;;  %v258_v2 = vsel %vm182_vm0, %v79_v63, 0.0 }
  0x32   :  { %184 = vadd.xlane.f32.xlu0 %v183_v11  ;;  %v204_v58 = vsel %vm182_vm0, %v61_v55, 0.0  ;;  %v125_v59 = vld [vmem:[%s7455_s0 + $0x238] sm:$0xff]  ;;  %v201_v60 = vsel %vm182_vm0, %v60_v57, 0.0  ;;  %v124_v61 = vld [vmem:[%s7455_s0 + $0x230] sm:$0xff]  ;;  %v143_v3 = vld [vmem:[%s7455_s0 + $0x2c8] sm:$0xff]  ;;  %v255_v4 = vsel %vm182_vm0, %v78_v1, 0.0 }
  0x33   :  { %v396_v62 = vsel %vm182_vm0, %v125_v59, 0.0  ;;  %v393_v0 = vsel %vm182_vm0, %v124_v61, 0.0  ;;  %v142_v5 = vld [vmem:[%s7455_s0 + $0x2c0] sm:$0xff]  ;;  %v450_v6 = vsel %vm182_vm0, %v143_v3, 0.0  ;;  %v63_v7 = vld [vmem:[%s7455_s0 + $0x48] sm:$0xff]  ;;  %v80_v17 = vld [vmem:[%s7455_s0 + $0xd0] sm:$0xff] }
  0x34   :  { %v447_v8 = vsel %vm182_vm0, %v142_v5, 0.0  ;;  %v62_v9 = vld [vmem:[%s7455_s0 + $0x40] sm:$0xff]  ;;  %v210_v10 = vsel %vm182_vm0, %v63_v7, 0.0  ;;  %v127_v12 = vld [vmem:[%s7455_s0 + $0x248] sm:$0xff]  ;;  %v261_v20 = vsel %vm182_vm0, %v80_v17, 0.0  ;;  %v144_v21 = vld [vmem:[%s7455_s0 + $0x2d0] sm:$0xff] }
  0x35   :  { %241 = vadd.xlane.f32.xlu1 %v240_v14  ;;  %v207_v11 = vsel %vm182_vm0, %v62_v9, 0.0  ;;  %v126_v13 = vld [vmem:[%s7455_s0 + $0x240] sm:$0xff]  ;;  %v402_v14 = vsel %vm182_vm0, %v127_v12, 0.0  ;;  %v453_v24 = vsel %vm182_vm0, %v144_v21, 0.0  ;;  %v64_v25 = vld [vmem:[%s7455_s0 + $0x50] sm:$0xff]  ;;  %v131_v7 = vld [vmem:[%s7455_s0 + $0x268] sm:$0xff] }
  0x36   :  { %238 = vadd.xlane.f32.xlu0 %v237_v15  ;;  %v81_v15 = vld [vmem:[%s7455_s0 + $0xd8] sm:$0xff]  ;;  %v399_v16 = vsel %vm182_vm0, %v126_v13, 0.0  ;;  %v213_v29 = vsel %vm182_vm0, %v64_v25, 0.0  ;;  %v760_v30 = vld [vmem:[%s7456_s1] sm:$0xff]  ;;  %vm1275_vm3 = vcmask 261312   ;;  %vm1282_vm4 = vcmask 326912  }
  0x37   :  { %v82_v39 = vld [vmem:[%s7455_s0 + $0xe0] sm:$0xff]  ;;  %vm1289_vm5 = vcmask 392512   ;;  %vm1296_vm6 = vcmask 458112   ;;  %vm1303_vm7 = vcmask 523712   ;;  %vm1310_vm8 = vcmask 589312  }
  0x38   :  { %v772_v43 = vld [vmem:[%s7456_s1 + $0x60] sm:$0xff]  ;;  %v267_v53 = vsel %vm182_vm0, %v82_v39, 0.0  ;;  %vm1317_vm9 = vcmask 654912   ;;  %vm1324_vm10 = vcmask 720512   ;;  %vm1331_vm11 = vcmask 786112  }
  0x39   :  { %379 = vadd.xlane.f32.xlu1 %v378_v18  ;;  %v264_v18 = vsel %vm182_vm0, %v81_v15, 0.0  ;;  %v146_v51 = vld [vmem:[%s7455_s0 + $0x2e0] sm:$0xff]  ;;  %vm1338_vm12 = vcmask 851712   ;;  %vm1345_vm13 = vcmask 917312   ;;  %vm1352_vm14 = vcmask 982912  }
  0x3a   :  { %376 = vadd.xlane.f32.xlu0 %v375_v19  ;;  %v145_v19 = vld [vmem:[%s7455_s0 + $0x2d8] sm:$0xff]  ;;  %v780_v55 = vld [vmem:[%s7456_s1 + $0xa0] sm:$0xff]  ;;  %v459_v1 = vsel %vm182_vm0, %v146_v51, 0.0  ;;  %vm1359_vm15 = vcmask 1048512  }
  0x3b   :  { %v66_v63 = vld [vmem:[%s7455_s0 + $0x60] sm:$0xff]  ;;  %v69_v51 = vld [vmem:[%s7455_s0 + $0x78] sm:$0xff] }
  0x3c   :  { %v788_v3 = vld [vmem:[%s7456_s1 + $0xe0] sm:$0xff]  ;;  %v219_v13 = vsel %vm182_vm0, %v66_v63, 0.0  ;;  %v133_v63 = vld [vmem:[%s7455_s0 + $0x278] sm:$0xff] }
  0x3d   :  { %433 = vadd.xlane.f32.xlu1 %v432_v22  ;;  %v456_v22 = vsel %vm182_vm0, %v145_v19, 0.0  ;;  %v796_v15 = vld [vmem:[%s7456_s1 + $0x120] sm:$0xff] }
  0x3e   :  { %430 = vadd.xlane.f32.xlu0 %v429_v23  ;;  %v65_v23 = vld [vmem:[%s7455_s0 + $0x58] sm:$0xff]  ;;  %v812_v39 = vld [vmem:[%s7456_s1 + $0x1a0] sm:$0xff] }
  0x3f   :  { %v216_v28 = vsel %vm182_vm0, %v65_v23, 0.0  ;;  %v84_v23 = vld [vmem:[%s7455_s0 + $0xf0] sm:$0xff] }
  0x41   :  { %193 = vadd.xlane.f32.xlu1 %v192_v26  ;;  %v129_v26 = vld [vmem:[%s7455_s0 + $0x258] sm:$0xff] }
  0x42   :  { %190 = vadd.xlane.f32.xlu0 %v189_v27  ;;  %v128_v27 = vld [vmem:[%s7455_s0 + $0x250] sm:$0xff] }
  0x43   :  { %v405_v41 = vsel %vm182_vm0, %v128_v27, 0.0  ;;  %v804_v27 = vld [vmem:[%s7456_s1 + $0x160] sm:$0xff] }
  0x45   :  { %385 = vadd.xlane.f32.xlu1 %v384_v31  ;;  %v764_v31 = vld [vmem:[%s7456_s1 + $0x20] sm:$0xff] }
  0x46   :  { %382 = vadd.xlane.f32.xlu0 %v381_v32  ;;  %v761_v32 = vld [vmem:[%s7456_s1 + $0x8] sm:$0xff]  ;;  %v4516_v33 = vcombine.high %v760_v30, %v764_v31 }
  0x48   :  { %3207 = vmatprep.subr.bf16.mxu0 %v4516_v33 }
  0x49   :  { %247 = vadd.xlane.f32.xlu1 %v246_v34  ;;  %v765_v34 = vld [vmem:[%s7456_s1 + $0x28] sm:$0xff] }
  0x4a   :  { %244 = vadd.xlane.f32.xlu0 %v243_v36  ;;  %v4518_v35 = vcombine.high %v761_v32, %v765_v34  ;;  %v4515_v36 = vcombine.low %v760_v30, %v764_v31  ;;  %v4517_v37 = vcombine.low %v761_v32, %v765_v34  ;;  %v805_v30 = vld [vmem:[%s7456_s1 + $0x168] sm:$0xff]  ;;  %v149_v34 = vld [vmem:[%s7455_s0 + $0x2f8] sm:$0xff] }
  0x4c   :  { %3289 = vmatprep.subr.bf16.mxu1 %v4518_v35  ;;  %3208 = vmatpush1.bf16.msra.mxu0 %v4515_v36  ;;  %v148_v35 = vld [vmem:[%s7455_s0 + $0x2f0] sm:$0xff] }
  0x4d   :  { %439 = vadd.xlane.f32.xlu1 %v438_v38  ;;  %v83_v38 = vld [vmem:[%s7455_s0 + $0xe8] sm:$0xff]  ;;  %3290 = vmatpush1.bf16.msra.mxu1 %v4517_v37  ;;  %v273_v37 = vsel %vm182_vm0, %v84_v23, 0.0 }
  0x4e   :  { %436 = vadd.xlane.f32.xlu0 %v435_v40  ;;  %v408_v40 = vsel %vm182_vm0, %v129_v26, 0.0  ;;  %v800_v26 = vld [vmem:[%s7456_s1 + $0x140] sm:$0xff]  ;;  %v167_v23 = vld [vmem:[%s7455_s0 + $0x388] sm:$0xff] }
  0x4f   :  { %v4555_v32 = vcombine.low %v800_v26, %v804_v27 }
  0x51   :  { %199 = vadd.xlane.f32.xlu1 %v198_v42  ;;  %v768_v42 = vld [vmem:[%s7456_s1 + $0x40] sm:$0xff] }
  0x52   :  { %196 = vadd.xlane.f32.xlu0 %v195_v44  ;;  %v769_v44 = vld [vmem:[%s7456_s1 + $0x48] sm:$0xff]  ;;  %v4524_v45 = vcombine.high %v768_v42, %v772_v43 }
  0x54   :  { %3209 = vmatprep.subr.bf16.mxu0 %v4524_v45 }
  0x55   :  { %391 = vadd.xlane.f32.xlu1 %v390_v46  ;;  %v773_v46 = vld [vmem:[%s7456_s1 + $0x68] sm:$0xff] }
  0x56   :  { %388 = vadd.xlane.f32.xlu0 %v387_v48  ;;  %v4526_v47 = vcombine.high %v769_v44, %v773_v46  ;;  %v4523_v48 = vcombine.low %v768_v42, %v772_v43  ;;  %v4525_v49 = vcombine.low %v769_v44, %v773_v46  ;;  %v813_v42 = vld [vmem:[%s7456_s1 + $0x1a8] sm:$0xff]  ;;  %v468_v46 = vsel %vm182_vm0, %v149_v34, 0.0 }
  0x57   :  { %v849_v34 = vld [vmem:[%s7456_s1 + $0x2c8] sm:$0xff] }
  0x58   :  { %3291 = vmatprep.subr.bf16.mxu1 %v4526_v47  ;;  %3210 = vmatpush1.bf16.msra.mxu0 %v4523_v48  ;;  %v465_v47 = vsel %vm182_vm0, %v148_v35, 0.0  ;;  %v816_v48 = vld [vmem:[%s7456_s1 + $0x1c0] sm:$0xff]  ;;  %v87_v35 = vld [vmem:[%s7455_s0 + $0x108] sm:$0xff] }
  0x59   :  { %253 = vadd.xlane.f32.xlu1 %v252_v50  ;;  %v147_v50 = vld [vmem:[%s7455_s0 + $0x2e8] sm:$0xff]  ;;  %3292 = vmatpush1.bf16.msra.mxu1 %v4525_v49  ;;  %v820_v49 = vld [vmem:[%s7456_s1 + $0x1e0] sm:$0xff] }
  0x5a   :  { %250 = vadd.xlane.f32.xlu0 %v249_v52  ;;  %v270_v52 = vsel %vm182_vm0, %v83_v38, 0.0  ;;  %v808_v38 = vld [vmem:[%s7456_s1 + $0x180] sm:$0xff] }
  0x5b   :  { %v4563_v44 = vcombine.low %v808_v38, %v812_v39 }
  0x5d   :  { %445 = vadd.xlane.f32.xlu1 %v444_v54  ;;  %v776_v54 = vld [vmem:[%s7456_s1 + $0x80] sm:$0xff] }
  0x5e   :  { %442 = vadd.xlane.f32.xlu0 %v441_v56  ;;  %v777_v56 = vld [vmem:[%s7456_s1 + $0x88] sm:$0xff]  ;;  %v4532_v57 = vcombine.high %v776_v54, %v780_v55 }
  0x60   :  { %3211 = vmatprep.subr.bf16.mxu0 %v4532_v57 }
  0x61   :  { %205 = vadd.xlane.f32.xlu1 %v204_v58  ;;  %v781_v58 = vld [vmem:[%s7456_s1 + $0xa8] sm:$0xff] }
  0x62   :  { %202 = vadd.xlane.f32.xlu0 %v201_v60  ;;  %v4534_v59 = vcombine.high %v777_v56, %v781_v58  ;;  %v4531_v60 = vcombine.low %v776_v54, %v780_v55  ;;  %v4533_v61 = vcombine.low %v777_v56, %v781_v58  ;;  %v821_v54 = vld [vmem:[%s7456_s1 + $0x1e8] sm:$0xff]  ;;  %v4571_v56 = vcombine.low %v816_v48, %v820_v49 }
  0x63   :  { %v228_v58 = vsel %vm182_vm0, %v69_v51, 0.0 }
  0x64   :  { %3293 = vmatprep.subr.bf16.mxu1 %v4534_v59  ;;  %3212 = vmatpush1.bf16.msra.mxu0 %v4531_v60  ;;  %v824_v60 = vld [vmem:[%s7456_s1 + $0x200] sm:$0xff] }
  0x65   :  { %397 = vadd.xlane.f32.xlu1 %v396_v62  ;;  %v67_v62 = vld [vmem:[%s7455_s0 + $0x68] sm:$0xff]  ;;  %3294 = vmatpush1.bf16.msra.mxu1 %v4533_v61  ;;  %v828_v61 = vld [vmem:[%s7456_s1 + $0x220] sm:$0xff] }
  0x66   :  { %394 = vadd.xlane.f32.xlu0 %v393_v0  ;;  %v462_v0 = vsel %vm182_vm0, %v147_v50, 0.0  ;;  %v222_v12 = vsel %vm182_vm0, %v67_v62, 0.0  ;;  %v817_v50 = vld [vmem:[%s7456_s1 + $0x1c8] sm:$0xff] }
  0x67   :  { %v4574_v55 = vcombine.high %v817_v50, %v821_v54  ;;  %v4573_v57 = vcombine.low %v817_v50, %v821_v54  ;;  %v825_v62 = vld [vmem:[%s7456_s1 + $0x208] sm:$0xff] }
  0x68   :  { %v861_v50 = vld [vmem:[%s7456_s1 + $0x328] sm:$0xff] }
  0x69   :  { %259 = vadd.xlane.f32.xlu1 %v258_v2  ;;  %v784_v2 = vld [vmem:[%s7456_s1 + $0xc0] sm:$0xff] }
  0x6a   :  { %256 = vadd.xlane.f32.xlu0 %v255_v4  ;;  %v785_v4 = vld [vmem:[%s7456_s1 + $0xc8] sm:$0xff]  ;;  %v4540_v5 = vcombine.high %v784_v2, %v788_v3 }
  0x6c   :  { %3213 = vmatprep.subr.bf16.mxu0 %v4540_v5 }
  0x6d   :  { %451 = vadd.xlane.f32.xlu1 %v450_v6  ;;  %v789_v6 = vld [vmem:[%s7456_s1 + $0xe8] sm:$0xff] }
  0x6e   :  { %448 = vadd.xlane.f32.xlu0 %v447_v8  ;;  %v130_v8 = vld [vmem:[%s7455_s0 + $0x260] sm:$0xff]  ;;  %v4542_v9 = vcombine.high %v785_v4, %v789_v6 }
  0x6f   :  { %v411_v25 = vsel %vm182_vm0, %v130_v8, 0.0  ;;  %v832_v8 = vld [vmem:[%s7456_s1 + $0x240] sm:$0xff] }
  0x70   :  { %3295 = vmatprep.subr.bf16.mxu1 %v4542_v9  ;;  %v836_v9 = vld [vmem:[%s7456_s1 + $0x260] sm:$0xff] }
  0x71   :  { %211 = vadd.xlane.f32.xlu1 %v210_v10  ;;  %v4539_v10 = vcombine.low %v784_v2, %v788_v3  ;;  %v829_v2 = vld [vmem:[%s7456_s1 + $0x228] sm:$0xff] }
  0x72   :  { %208 = vadd.xlane.f32.xlu0 %v207_v11  ;;  %v4541_v11 = vcombine.low %v785_v4, %v789_v6  ;;  %v4582_v3 = vcombine.high %v825_v62, %v829_v2  ;;  %v4579_v4 = vcombine.low %v824_v60, %v828_v61  ;;  %v4581_v5 = vcombine.low %v825_v62, %v829_v2  ;;  %v869_v62 = vld [vmem:[%s7456_s1 + $0x368] sm:$0xff] }
  0x73   :  { %3214 = vmatpush1.bf16.msra.mxu0 %v4539_v10  ;;  %v420_v6 = vsel %vm182_vm0, %v133_v63, 0.0  ;;  %v833_v10 = vld [vmem:[%s7456_s1 + $0x248] sm:$0xff]  ;;  %v1018_v2 = vlaneseq }
  0x74   :  { %3296 = vmatpush1.bf16.msra.mxu1 %v4541_v11  ;;  %v103_v11 = vld [vmem:[%s7455_s0 + $0x188] sm:$0xff] }
  0x75   :  { %403 = vadd.xlane.f32.xlu1 %v402_v14  ;;  %v792_v14 = vld [vmem:[%s7456_s1 + $0x100] sm:$0xff] }
  0x76   :  { %400 = vadd.xlane.f32.xlu0 %v399_v16  ;;  %v793_v16 = vld [vmem:[%s7456_s1 + $0x108] sm:$0xff]  ;;  %v4548_v17 = vcombine.high %v792_v14, %v796_v15 }
  0x78   :  { %3215 = vmatprep.subr.bf16.mxu0 %v4548_v17 }
  0x79   :  { %265 = vadd.xlane.f32.xlu1 %v264_v18  ;;  %v797_v18 = vld [vmem:[%s7456_s1 + $0x128] sm:$0xff] }
  0x7a   :  { %262 = vadd.xlane.f32.xlu0 %v261_v20  ;;  %v4550_v19 = vcombine.high %v793_v16, %v797_v18  ;;  %v4547_v20 = vcombine.low %v792_v14, %v796_v15  ;;  %v4549_v21 = vcombine.low %v793_v16, %v797_v18  ;;  %v837_v14 = vld [vmem:[%s7456_s1 + $0x268] sm:$0xff]  ;;  %v4587_v16 = vcombine.low %v832_v8, %v836_v9 }
  0x7b   :  { %v4590_v15 = vcombine.high %v833_v10, %v837_v14  ;;  %v4589_v17 = vcombine.low %v833_v10, %v837_v14  ;;  %v330_v18 = vsel %vm182_vm0, %v103_v11, 0.0  ;;  %v168_v10 = vld [vmem:[%s7455_s0 + $0x390] sm:$0xff] }
  0x7c   :  { %3297 = vmatprep.subr.bf16.mxu1 %v4550_v19  ;;  %3216 = vmatpush1.bf16.msra.mxu0 %v4547_v20  ;;  %v840_v20 = vld [vmem:[%s7456_s1 + $0x280] sm:$0xff] }
  0x7d   :  { %457 = vadd.xlane.f32.xlu1 %v456_v22  ;;  %v85_v22 = vld [vmem:[%s7455_s0 + $0xf8] sm:$0xff]  ;;  %3298 = vmatpush1.bf16.msra.mxu1 %v4549_v21  ;;  %v844_v21 = vld [vmem:[%s7456_s1 + $0x2a0] sm:$0xff] }
  0x7e   :  { %454 = vadd.xlane.f32.xlu0 %v453_v24  ;;  %v414_v24 = vsel %vm182_vm0, %v131_v7, 0.0  ;;  %v276_v36 = vsel %vm182_vm0, %v85_v22, 0.0  ;;  %v841_v22 = vld [vmem:[%s7456_s1 + $0x288] sm:$0xff] }
  0x81   :  { %217 = vadd.xlane.f32.xlu1 %v216_v28  ;;  %v801_v28 = vld [vmem:[%s7456_s1 + $0x148] sm:$0xff] }
  0x82   :  { %214 = vadd.xlane.f32.xlu0 %v213_v29  ;;  %v4556_v29 = vcombine.high %v800_v26, %v804_v27  ;;  %v4558_v31 = vcombine.high %v801_v28, %v805_v30  ;;  %v4557_v33 = vcombine.low %v801_v28, %v805_v30  ;;  %v845_v26 = vld [vmem:[%s7456_s1 + $0x2a8] sm:$0xff]  ;;  %v4595_v28 = vcombine.low %v840_v20, %v844_v21 }
  0x83   :  { %v4598_v27 = vcombine.high %v841_v22, %v845_v26  ;;  %v522_v30 = vsel %vm182_vm0, %v167_v23, 0.0  ;;  %v525_v23 = vsel %vm182_vm0, %v168_v10, 0.0 }
  0x84   :  { %3217 = vmatprep.subr.bf16.mxu0 %v4556_v29  ;;  %3299 = vmatprep.subr.bf16.mxu1 %v4558_v31  ;;  %v4597_v29 = vcombine.low %v841_v22, %v845_v26 }
  0x85   :  { %409 = vadd.xlane.f32.xlu1 %v408_v40  ;;  %v809_v40 = vld [vmem:[%s7456_s1 + $0x188] sm:$0xff]  ;;  %3218 = vmatpush1.bf16.msra.mxu0 %v4555_v32  ;;  %v848_v32 = vld [vmem:[%s7456_s1 + $0x2c0] sm:$0xff] }
  0x86   :  { %406 = vadd.xlane.f32.xlu0 %v405_v41  ;;  %v4564_v41 = vcombine.high %v808_v38, %v812_v39  ;;  %3300 = vmatpush1.bf16.msra.mxu1 %v4557_v33  ;;  %v4566_v43 = vcombine.high %v809_v40, %v813_v42  ;;  %v4565_v45 = vcombine.low %v809_v40, %v813_v42  ;;  %v852_v33 = vld [vmem:[%s7456_s1 + $0x2e0] sm:$0xff]  ;;  %v853_v38 = vld [vmem:[%s7456_s1 + $0x2e8] sm:$0xff]  ;;  %v282_v42 = vsel %vm182_vm0, %v87_v35, 0.0 }
  0x87   :  { %v4606_v39 = vcombine.high %v849_v34, %v853_v38  ;;  %v4603_v40 = vcombine.low %v848_v32, %v852_v33 }
  0x88   :  { %3219 = vmatprep.subr.bf16.mxu0 %v4564_v41  ;;  %3301 = vmatprep.subr.bf16.mxu1 %v4566_v43  ;;  %v4605_v41 = vcombine.low %v849_v34, %v853_v38 }
  0x89   :  { %271 = vadd.xlane.f32.xlu1 %v270_v52  ;;  %v68_v52 = vld [vmem:[%s7455_s0 + $0x70] sm:$0xff]  ;;  %3220 = vmatpush1.bf16.msra.mxu0 %v4563_v44  ;;  %v856_v44 = vld [vmem:[%s7456_s1 + $0x300] sm:$0xff] }
  0x8a   :  { %268 = vadd.xlane.f32.xlu0 %v267_v53  ;;  %v4572_v53 = vcombine.high %v816_v48, %v820_v49  ;;  %3302 = vmatpush1.bf16.msra.mxu1 %v4565_v45  ;;  %v225_v59 = vsel %vm182_vm0, %v68_v52, 0.0  ;;  %v860_v45 = vld [vmem:[%s7456_s1 + $0x320] sm:$0xff]  ;;  %v104_v48 = vld [vmem:[%s7455_s0 + $0x190] sm:$0xff] }
  0x8b   :  { %3303 = vmatprep.subr.bf16.mxu1 %v4574_v55  ;;  %v4612_v49 = vcombine.high %v856_v44, %v860_v45  ;;  %v4611_v52 = vcombine.low %v856_v44, %v860_v45  ;;  %v333_v55 = vsel %vm182_vm0, %v104_v48, 0.0  ;;  %v152_v45 = vld [vmem:[%s7455_s0 + $0x310] sm:$0xff] }
  0x8c   :  { %3221 = vmatprep.subr.bf16.mxu0 %v4572_v53 }
  0x8d   :  { %463 = vadd.xlane.f32.xlu1 %v462_v0  ;;  %v132_v0 = vld [vmem:[%s7455_s0 + $0x270] sm:$0xff]  ;;  %3222 = vmatpush1.bf16.msra.mxu0 %v4571_v56  ;;  %v864_v56 = vld [vmem:[%s7456_s1 + $0x340] sm:$0xff] }
  0x8e   :  { %460 = vadd.xlane.f32.xlu0 %v459_v1  ;;  %v4580_v1 = vcombine.high %v824_v60, %v828_v61  ;;  %3304 = vmatpush1.bf16.msra.mxu1 %v4573_v57  ;;  %v417_v7 = vsel %vm182_vm0, %v132_v0, 0.0  ;;  %v868_v57 = vld [vmem:[%s7456_s1 + $0x360] sm:$0xff] }
  0x8f   :  { %3305 = vmatprep.subr.bf16.mxu1 %v4582_v3  ;;  %v150_v60 = vld [vmem:[%s7455_s0 + $0x300] sm:$0xff]  ;;  %v4620_v61 = vcombine.high %v864_v56, %v868_v57  ;;  %v4619_v0 = vcombine.low %v864_v56, %v868_v57 }
  0x90   :  { %3223 = vmatprep.subr.bf16.mxu0 %v4580_v1 }
  0x91   :  { %223 = vadd.xlane.f32.xlu1 %v222_v12  ;;  %v102_v12 = vld [vmem:[%s7455_s0 + $0x180] sm:$0xff]  ;;  %3224 = vmatpush1.bf16.msra.mxu0 %v4579_v4 }
  0x92   :  { %220 = vadd.xlane.f32.xlu0 %v219_v13  ;;  %v4588_v13 = vcombine.high %v832_v8, %v836_v9  ;;  %3306 = vmatpush1.bf16.msra.mxu1 %v4581_v5  ;;  %v327_v19 = vsel %vm182_vm0, %v102_v12, 0.0  ;;  %v872_v8 = vld [vmem:[%s7456_s1 + $0x380] sm:$0xff]  ;;  %v873_v12 = vld [vmem:[%s7456_s1 + $0x388] sm:$0xff] }
  0x93   :  { %3307 = vmatprep.subr.bf16.mxu1 %v4590_v15  ;;  %v876_v9 = vld [vmem:[%s7456_s1 + $0x3a0] sm:$0xff]  ;;  %v5741_v15 = vand.u32 127, %v1018_v2 }
  0x94   :  { %3225 = vmatprep.subr.bf16.mxu0 %v4588_v13  ;;  %v4628_v11 = vcombine.high %v872_v8, %v876_v9  ;;  %v877_v13 = vld [vmem:[%s7456_s1 + $0x3a8] sm:$0xff] }
  0x95   :  { %415 = vadd.xlane.f32.xlu1 %v414_v24  ;;  %v166_v24 = vld [vmem:[%s7455_s0 + $0x380] sm:$0xff]  ;;  %3226 = vmatpush1.bf16.msra.mxu0 %v4587_v16  ;;  %v4630_v14 = vcombine.high %v873_v12, %v877_v13  ;;  %v1256_v34 = vadd.s32 4294967288, %v5741_v15 }
  0x96   :  { %412 = vadd.xlane.f32.xlu0 %v411_v25  ;;  %v4596_v25 = vcombine.high %v840_v20, %v844_v21  ;;  %3308 = vmatpush1.bf16.msra.mxu1 %v4589_v17  ;;  %v519_v31 = vsel %vm182_vm0, %v166_v24, 0.0  ;;  %v4627_v17 = vcombine.low %v872_v8, %v876_v9  ;;  %v89_v24 = vld [vmem:[%s7455_s0 + $0x118] sm:$0xff] }
  0x97   :  { %3309 = vmatprep.subr.bf16.mxu1 %v4598_v27  ;;  %v880_v27 = vld [vmem:[%s7456_s1 + $0x3c0] sm:$0xff] }
  0x98   :  { %3227 = vmatprep.subr.bf16.mxu0 %v4596_v25 }
  0x99   :  { %277 = vadd.xlane.f32.xlu1 %v276_v36  ;;  %v86_v36 = vld [vmem:[%s7455_s0 + $0x100] sm:$0xff]  ;;  %3228 = vmatpush1.bf16.msra.mxu0 %v4595_v28 }
  0x9a   :  { %274 = vadd.xlane.f32.xlu0 %v273_v37  ;;  %v4604_v37 = vcombine.high %v848_v32, %v852_v33  ;;  %3310 = vmatpush1.bf16.msra.mxu1 %v4597_v29  ;;  %v279_v43 = vsel %vm182_vm0, %v86_v36, 0.0  ;;  %v884_v28 = vld [vmem:[%s7456_s1 + $0x3e0] sm:$0xff]  ;;  %v5754_v29 = vshrl.u32 %v1018_v2, 7  ;;  %v881_v32 = vld [vmem:[%s7456_s1 + $0x3c8] sm:$0xff] }
  0x9b   :  { %3311 = vmatprep.subr.bf16.mxu1 %v4606_v39  ;;  %v885_v33 = vld [vmem:[%s7456_s1 + $0x3e8] sm:$0xff] }
  0x9c   :  { %3229 = vmatprep.subr.bf16.mxu0 %v4604_v37  ;;  %v4638_v37 = vcombine.high %v881_v32, %v885_v33 }
  0x9d   :  { %469 = vadd.xlane.f32.xlu1 %v468_v46  ;;  %v857_v46 = vld [vmem:[%s7456_s1 + $0x308] sm:$0xff]  ;;  %3230 = vmatpush1.bf16.msra.mxu0 %v4603_v40  ;;  %v288_v40 = vsel %vm182_vm0, %v89_v24, 0.0 }
  0x9e   :  { %466 = vadd.xlane.f32.xlu0 %v465_v47  ;;  %v105_v47 = vld [vmem:[%s7455_s0 + $0x198] sm:$0xff]  ;;  %3312 = vmatpush1.bf16.msra.mxu1 %v4605_v41  ;;  %v4614_v51 = vcombine.high %v857_v46, %v861_v50  ;;  %v4613_v53 = vcombine.low %v857_v46, %v861_v50  ;;  %v5778_v46 = vsub.s32 %v5741_v15, %v5754_v29  ;;  %v1263_v50 = vadd.s32 4294967280, %v5741_v15 }
  0x9f   :  { %v336_v54 = vsel %vm182_vm0, %v105_v47, 0.0  ;;  %3231 = vmatprep.subr.bf16.mxu0 %v4612_v49  ;;  %v153_v41 = vld [vmem:[%s7455_s0 + $0x318] sm:$0xff]  ;;  %v5781_v49 = vsub.s32 %v1256_v34, %v5754_v29 }
  0xa0   :  { %3313 = vmatprep.subr.bf16.mxu1 %v4614_v51  ;;  %v1270_v51 = vadd.s32 4294967272, %v5741_v15 }
  0xa1   :  { %229 = vadd.xlane.f32.xlu1 %v228_v58  ;;  %v865_v58 = vld [vmem:[%s7456_s1 + $0x348] sm:$0xff]  ;;  %3232 = vmatpush1.bf16.msra.mxu0 %v4611_v52  ;;  %7473 = vst [vmem:[#allocation14_spill] sm:$0xff] %v5781_v49  ;;  %v480_v52 = vsel %vm182_vm0, %v153_v41, 0.0 }
  0xa2   :  { %226 = vadd.xlane.f32.xlu0 %v225_v59  ;;  %v151_v59 = vld [vmem:[%s7455_s0 + $0x308] sm:$0xff]  ;;  %3314 = vmatpush1.bf16.msra.mxu1 %v4613_v53  ;;  %v4622_v63 = vcombine.high %v865_v58, %v869_v62  ;;  %v4621_v1 = vcombine.low %v865_v58, %v869_v62  ;;  %v477_v58 = vsel %vm182_vm0, %v152_v45, 0.0  ;;  %v106_v62 = vld [vmem:[%s7455_s0 + $0x1a0] sm:$0xff] }
  0xa3   :  { %v474_v5 = vsel %vm182_vm0, %v151_v59, 0.0  ;;  %3233 = vmatprep.subr.bf16.mxu0 %v4620_v61  ;;  %v107_v61 = vld [vmem:[%s7455_s0 + $0x1a8] sm:$0xff] }
  0xa4   :  { %3315 = vmatprep.subr.bf16.mxu1 %v4622_v63  ;;  %v5796_v63 = vsub.s32 %v1263_v50, %v5754_v29 }
  0xa5   :  { %421 = vadd.xlane.f32.xlu1 %v420_v6  ;;  %v471_v6 = vsel %vm182_vm0, %v150_v60, 0.0  ;;  %3234 = vmatpush1.bf16.msra.mxu0 %v4619_v0  ;;  %v5799_v0 = vsub.s32 %v1270_v51, %v5754_v29 }
  0xa6   :  { %418 = vadd.xlane.f32.xlu0 %v417_v7  ;;  %v169_v7 = vld [vmem:[%s7455_s0 + $0x398] sm:$0xff]  ;;  %3316 = vmatpush1.bf16.msra.mxu1 %v4621_v1  ;;  %7474 = vst [vmem:[#allocation15_spill] sm:$0xff] %v5796_v63 }
  0xa7   :  { %v528_v16 = vsel %vm182_vm0, %v169_v7, 0.0  ;;  %3235 = vmatprep.subr.bf16.mxu0 %v4628_v11  ;;  %3317 = vmatprep.subr.bf16.mxu1 %v4630_v14  ;;  %7475 = vst [vmem:[#allocation16_spill] sm:$0xff] %v5799_v0  ;;  %v339_v7 = vsel %vm182_vm0, %v106_v62, 0.0  ;;  %v170_v14 = vld [vmem:[%s7455_s0 + $0x3a0] sm:$0xff] }
  0xa9   :  { %331 = vadd.xlane.f32.xlu1 %v330_v18  ;;  %v4629_v18 = vcombine.low %v873_v12, %v877_v13  ;;  %3236 = vmatpush1.bf16.msra.mxu0 %v4627_v17  ;;  %v171_v12 = vld [vmem:[%s7455_s0 + $0x3a8] sm:$0xff] }
  0xaa   :  { %328 = vadd.xlane.f32.xlu0 %v327_v19 }
  0xab   :  { %3318 = vmatpush1.bf16.msra.mxu1 %v4629_v18 }
  0xac   :  { %3319 = vmatprep.subr.bf16.mxu1 %v4638_v37  ;;  %v154_v37 = vld [vmem:[%s7455_s0 + $0x320] sm:$0xff] }
  0xad   :  { %523 = vadd.xlane.f32.xlu1 %v522_v30  ;;  %v88_v30 = vld [vmem:[%s7455_s0 + $0x110] sm:$0xff]  ;;  %v483_v50 = vsel %vm182_vm0, %v154_v37, 0.0 }
  0xae   :  { %520 = vadd.xlane.f32.xlu0 %v519_v31  ;;  %v4636_v31 = vcombine.high %v880_v27, %v884_v28  ;;  %v285_v44 = vsel %vm182_vm0, %v88_v30, 0.0 }
  0xb0   :  { %3237 = vmatprep.subr.bf16.mxu0 %v4636_v31  ;;  %v90_v31 = vld [vmem:[%s7455_s0 + $0x120] sm:$0xff] }
  0xb1   :  { %283 = vadd.xlane.f32.xlu1 %v282_v42  ;;  %v4635_v42 = vcombine.low %v880_v27, %v884_v28  ;;  %v91_v27 = vld [vmem:[%s7455_s0 + $0x128] sm:$0xff] }
  0xb2   :  { %280 = vadd.xlane.f32.xlu0 %v279_v43  ;;  %v4637_v43 = vcombine.low %v881_v32, %v885_v33  ;;  %v294_v41 = vsel %vm182_vm0, %v91_v27, 0.0 }
  0xb3   :  { %3238 = vmatpush1.bf16.msra.mxu0 %v4635_v42 }
  0xb4   :  { %3320 = vmatpush1.bf16.msra.mxu1 %v4637_v43 }
  0xb5   :  { %337 = vadd.xlane.f32.xlu1 %v336_v54 }
  0xb6   :  { %334 = vadd.xlane.f32.xlu0 %v333_v55  ;;  %v425_v3 = vpop.xlane.xlu1 %424 }
  0xb7   :  { %v233_v4 = vpop.xlane.xlu0 %232  ;;  %v648_v19 = vmul.f32 0.020408163, %v425_v3 }
  0xb8   :  { %v584_v20 = vmul.f32 0.020408163, %v233_v4 }
  0xb9   :  { %475 = vadd.xlane.f32.xlu1 %v474_v5 }
  0xba   :  { %472 = vadd.xlane.f32.xlu0 %v471_v6  ;;  %v428_v21 = vpop.xlane.xlu1 %427  ;;  %v342_v6 = vsel %vm182_vm0, %v107_v61, 0.0 }
  0xbb   :  { %v236_v22 = vpop.xlane.xlu0 %235  ;;  %v649_v25 = vmul.f32 0.020408163, %v428_v21 }
  0xbc   :  { %v585_v26 = vmul.f32 0.020408163, %v236_v22 }
  0xbd   :  { %v5766_v35 = vpack.c.bf16 %v649_v25, %v648_v19  ;;  %529 = vadd.xlane.f32.xlu1 %v528_v16 }
  0xbe   :  { %v704_v36 = vpack.c.bf16 %v585_v26, %v584_v20  ;;  %526 = vadd.xlane.f32.xlu0 %v525_v23  ;;  %v188_v38 = vpop.xlane.xlu1 %187  ;;  %v534_v23 = vsel %vm182_vm0, %v171_v12, 0.0  ;;  %v531_v26 = vsel %vm182_vm0, %v170_v14, 0.0 }
  0xbf   :  { %v185_v39 = vpop.xlane.xlu0 %184  ;;  %v569_v47 = vmul.f32 0.020408163, %v188_v38  ;;  %v1202_v13 = vunpack.c.l.b16 %v5766_v35  ;;  %v1203_v16 = vunpack.c.h.b16 %v5766_v35 }
  0xc0   :  { %v568_v48 = vmul.f32 0.020408163, %v185_v39  ;;  %v1138_v53 = vunpack.c.l.b16 %v704_v36  ;;  %v1139_v54 = vunpack.c.h.b16 %v704_v36  ;;  %v155_v36 = vld [vmem:[%s7455_s0 + $0x328] sm:$0xff] }
  0xc1   :  { %289 = vadd.xlane.f32.xlu1 %v288_v40  ;;  %v1680_v32 = vrot.slane %v1202_v13, %v5778_v46  ;;  %v1684_v33 = vrot.slane %v1203_v16, %v5781_v49 }
  0xc2   :  { %v5786_v55 = vpack.c.bf16 %v569_v47, %v568_v48  ;;  %286 = vadd.xlane.f32.xlu0 %v285_v44  ;;  %v242_v56 = vpop.xlane.xlu1 %241  ;;  %v1364_v2 = vrot.slane %v1138_v53, %v5778_v46  ;;  %v1368_v3 = vrot.slane %v1139_v54, %v5781_v49  ;;  %v291_v44 = vsel %vm182_vm0, %v90_v31, 0.0 }
  0xc3   :  { %v239_v57 = vpop.xlane.xlu0 %238  ;;  %v587_v59 = vmul.f32 0.020408163, %v242_v56  ;;  %v486_v48 = vsel %vm182_vm0, %v155_v36, 0.0  ;;  %v1685_v51 = vsel %vm1261_vm1, %v1684_v33, %v1680_v32 }
  0xc4   :  { %v586_v60 = vmul.f32 0.020408163, %v239_v57  ;;  %v1369_v20 = vsel %vm1261_vm1, %v1368_v3, %v1364_v2  ;;  %v1122_v34 = vunpack.c.l.b16 %v5786_v55  ;;  %v1123_v35 = vunpack.c.h.b16 %v5786_v55  ;;  %v109_v55 = vld [vmem:[%s7455_s0 + $0x1b8] sm:$0xff] }
  0xc5   :  { %481 = vadd.xlane.f32.xlu1 %v480_v52 }
  0xc6   :  { %v705_v1 = vpack.c.bf16 %v587_v59, %v586_v60  ;;  %478 = vadd.xlane.f32.xlu0 %v477_v58  ;;  %v380_v4 = vpop.xlane.xlu1 %379  ;;  %v1255_v52 = vrot.slane %v1122_v34, %v5778_v46  ;;  %v1260_v53 = vrot.slane %v1123_v35, %v5781_v49 }
  0xc7   :  { %v377_v5 = vpop.xlane.xlu0 %376  ;;  %v633_v10 = vmul.f32 0.020408163, %v380_v4  ;;  %v108_v4 = vld [vmem:[%s7455_s0 + $0x1b0] sm:$0xff] }
  0xc8   :  { %v1140_v8 = vunpack.c.l.b16 %v705_v1  ;;  %v1141_v9 = vunpack.c.h.b16 %v705_v1  ;;  %v632_v11 = vmul.f32 0.020408163, %v377_v5  ;;  %v1262_v13 = vsel %vm1261_vm1, %v1260_v53, %v1255_v52 }
  0xc9   :  { %343 = vadd.xlane.f32.xlu1 %v342_v6  ;;  %v1277_v6 = vadd.s32 4294967264, %v5741_v15 }
  0xca   :  { %v1373_v17 = vrot.slane %v1140_v8, %v5796_v63  ;;  %v1378_v18 = vrot.slane %v1141_v9, %v5799_v0  ;;  %v5815_v19 = vpack.c.bf16 %v633_v10, %v632_v11  ;;  %340 = vadd.xlane.f32.xlu0 %v339_v7  ;;  %v434_v21 = vpop.xlane.xlu1 %433  ;;  %v1284_v7 = vadd.s32 4294967256, %v5741_v15 }
  0xcb   :  { %v431_v22 = vpop.xlane.xlu0 %430  ;;  %v651_v25 = vmul.f32 0.020408163, %v434_v21  ;;  %v348_v8 = vsel %vm182_vm0, %v109_v55, 0.0  ;;  %v5883_v32 = vsub.s32 %v1277_v6, %v5754_v29 }
  0xcc   :  { %v1374_v24 = vsel %vm1268_vm2, %v1373_v17, %v1369_v20  ;;  %v650_v30 = vmul.f32 0.020408163, %v431_v22  ;;  %v1186_v56 = vunpack.c.l.b16 %v5815_v19  ;;  %v1187_v57 = vunpack.c.h.b16 %v5815_v19 }
  0xcd   :  { %v5825_v28 = vsel %vm1275_vm3, %v1378_v18, %v1374_v24  ;;  %535 = vadd.xlane.f32.xlu1 %v534_v23  ;;  %v345_v19 = vsel %vm182_vm0, %v108_v4, 0.0  ;;  %v173_v24 = vld [vmem:[%s7455_s0 + $0x3b8] sm:$0xff]  ;;  %7476 = vst [vmem:[#allocation17_spill] sm:$0xff] %v5883_v32  ;;  %v5886_v33 = vsub.s32 %v1284_v7, %v5754_v29 }
  0xce   :  { %v737_v38 = vpack.c.bf16 %v651_v25, %v650_v30  ;;  %532 = vadd.xlane.f32.xlu0 %v531_v26  ;;  %v194_v39 = vpop.xlane.xlu1 %193  ;;  %v1601_v14 = vrot.slane %v1186_v56, %v5778_v46  ;;  %v1605_v16 = vrot.slane %v1187_v57, %v5781_v49  ;;  %v172_v25 = vld [vmem:[%s7455_s0 + $0x3b0] sm:$0xff] }
  0xcf   :  { %v191_v40 = vpop.xlane.xlu0 %190  ;;  %v571_v42 = vmul.f32 0.020408163, %v194_v39  ;;  %7477 = vst [vmem:[#allocation18_spill] sm:$0xff] %v5886_v33  ;;  %v537_v39 = vsel %vm182_vm0, %v172_v25, 0.0 }
  0xd0   :  { %v570_v43 = vmul.f32 0.020408163, %v191_v40  ;;  %v1204_v45 = vunpack.c.l.b16 %v737_v38  ;;  %v1205_v47 = vunpack.c.h.b16 %v737_v38  ;;  %v1606_v34 = vsel %vm1261_vm1, %v1605_v16, %v1601_v14  ;;  %v111_v14 = vld [vmem:[%s7455_s0 + $0x1c8] sm:$0xff] }
  0xd1   :  { %295 = vadd.xlane.f32.xlu1 %v294_v41  ;;  %v540_v38 = vsel %vm182_vm0, %v173_v24, 0.0 }
  0xd2   :  { %v697_v54 = vpack.c.bf16 %v571_v42, %v570_v43  ;;  %v1689_v58 = vrot.slane %v1204_v45, %v5796_v63  ;;  %v1694_v59 = vrot.slane %v1205_v47, %v5799_v0  ;;  %292 = vadd.xlane.f32.xlu0 %v291_v44  ;;  %v386_v60 = vpop.xlane.xlu1 %385  ;;  %v93_v43 = vld [vmem:[%s7455_s0 + $0x138] sm:$0xff]  ;;  %v92_v44 = vld [vmem:[%s7455_s0 + $0x130] sm:$0xff] }
  0xd3   :  { %v383_v61 = vpop.xlane.xlu0 %382  ;;  %v635_v2 = vmul.f32 0.020408163, %v386_v60  ;;  %v300_v55 = vsel %vm182_vm0, %v93_v43, 0.0  ;;  %v297_v56 = vsel %vm182_vm0, %v92_v44, 0.0  ;;  %v94_v43 = vld [vmem:[%s7455_s0 + $0x140] sm:$0xff] }
  0xd4   :  { %v1124_v62 = vunpack.c.l.b16 %v697_v54  ;;  %v1125_v1 = vunpack.c.h.b16 %v697_v54  ;;  %v634_v3 = vmul.f32 0.020408163, %v383_v61  ;;  %v1690_v5 = vsel %vm1268_vm2, %v1689_v58, %v1685_v51  ;;  %v157_v61 = vld [vmem:[%s7455_s0 + $0x338] sm:$0xff] }
  0xd5   :  { %v5862_v9 = vsel %vm1275_vm3, %v1694_v59, %v1690_v5  ;;  %487 = vadd.xlane.f32.xlu1 %v486_v48 }
  0xd6   :  { %v1267_v10 = vrot.slane %v1124_v62, %v5796_v63  ;;  %v1274_v11 = vrot.slane %v1125_v1, %v5799_v0  ;;  %v729_v12 = vpack.c.bf16 %v635_v2, %v634_v3  ;;  %484 = vadd.xlane.f32.xlu0 %v483_v50  ;;  %v248_v17 = vpop.xlane.xlu1 %247  ;;  %v156_v62 = vld [vmem:[%s7455_s0 + $0x330] sm:$0xff] }
  0xd7   :  { %v245_v18 = vpop.xlane.xlu0 %244  ;;  %v589_v23 = vmul.f32 0.020408163, %v248_v17 }
  0xd8   :  { %v1269_v20 = vsel %vm1268_vm2, %v1267_v10, %v1262_v13  ;;  %v1188_v21 = vunpack.c.l.b16 %v729_v12  ;;  %v1189_v22 = vunpack.c.h.b16 %v729_v12  ;;  %v588_v27 = vmul.f32 0.020408163, %v245_v18  ;;  %v110_v18 = vld [vmem:[%s7455_s0 + $0x1c0] sm:$0xff] }
  0xd9   :  { %v5878_v26 = vsel %vm1275_vm3, %v1274_v11, %v1269_v20  ;;  %349 = vadd.xlane.f32.xlu1 %v348_v8  ;;  %v492_v8 = vsel %vm182_vm0, %v157_v61, 0.0  ;;  %v489_v10 = vsel %vm182_vm0, %v156_v62, 0.0  ;;  %v351_v25 = vsel %vm182_vm0, %v110_v18, 0.0 }
  0xda   :  { %v1610_v30 = vrot.slane %v1188_v21, %v5796_v63  ;;  %v1615_v31 = vrot.slane %v1189_v22, %v5799_v0  ;;  %v706_v35 = vpack.c.bf16 %v589_v23, %v588_v27  ;;  %346 = vadd.xlane.f32.xlu0 %v345_v19  ;;  %v440_v36 = vpop.xlane.xlu1 %439  ;;  %v354_v23 = vsel %vm182_vm0, %v111_v14, 0.0  ;;  %v175_v27 = vld [vmem:[%s7455_s0 + $0x3c8] sm:$0xff]  ;;  %v6030_v14 = vld [vmem:[%s7456_s1 + $0x420] sm:$0xff] }
  0xdb   :  { %v437_v37 = vpop.xlane.xlu0 %436  ;;  %v653_v41 = vmul.f32 0.020408163, %v440_v36 }
  0xdc   :  { %v1611_v40 = vsel %vm1268_vm2, %v1610_v30, %v1606_v34  ;;  %v652_v42 = vmul.f32 0.020408163, %v437_v37  ;;  %v1142_v47 = vunpack.c.l.b16 %v706_v35  ;;  %v1143_v48 = vunpack.c.h.b16 %v706_v35  ;;  %v174_v35 = vld [vmem:[%s7455_s0 + $0x3c0] sm:$0xff] }
  0xdd   :  { %v5899_v45 = vsel %vm1275_vm3, %v1615_v31, %v1611_v40  ;;  %541 = vadd.xlane.f32.xlu1 %v540_v38  ;;  %v543_v40 = vsel %vm182_vm0, %v174_v35, 0.0 }
  0xde   :  { %v738_v50 = vpack.c.bf16 %v653_v41, %v652_v42  ;;  %v1383_v51 = vrot.slane %v1142_v47, %v5883_v32  ;;  %v1388_v52 = vrot.slane %v1143_v48, %v5886_v33  ;;  %538 = vadd.xlane.f32.xlu0 %v537_v39  ;;  %v200_v53 = vpop.xlane.xlu1 %199  ;;  %v546_v39 = vsel %vm182_vm0, %v175_v27, 0.0  ;;  %v95_v41 = vld [vmem:[%s7455_s0 + $0x148] sm:$0xff] }
  0xdf   :  { %v197_v54 = vpop.xlane.xlu0 %196  ;;  %v573_v59 = vmul.f32 0.020408163, %v200_v53 }
  0xe0   :  { %v1206_v57 = vunpack.c.l.b16 %v738_v50  ;;  %v1207_v58 = vunpack.c.h.b16 %v738_v50  ;;  %v572_v60 = vmul.f32 0.020408163, %v197_v54  ;;  %v1384_v1 = vsel %vm1282_vm4, %v1383_v51, %v5825_v28 }
  0xe1   :  { %v5914_v2 = vsel %vm1289_vm5, %v1388_v52, %v1384_v1  ;;  %301 = vadd.xlane.f32.xlu1 %v300_v55  ;;  %v306_v50 = vsel %vm182_vm0, %v95_v41, 0.0  ;;  %v303_v51 = vsel %vm182_vm0, %v94_v43, 0.0  ;;  %v158_v52 = vld [vmem:[%s7455_s0 + $0x340] sm:$0xff]  ;;  %v177_v1 = vld [vmem:[%s7455_s0 + $0x3d8] sm:$0xff]  ;;  %v1305_v41 = vadd.s32 4294967232, %v5741_v15 }
  0xe2   :  { %v1699_v3 = vrot.slane %v1206_v57, %v5883_v32  ;;  %v1704_v4 = vrot.slane %v1207_v58, %v5886_v33  ;;  %v698_v5 = vpack.c.bf16 %v573_v59, %v572_v60  ;;  %298 = vadd.xlane.f32.xlu0 %v297_v56  ;;  %v392_v6 = vpop.xlane.xlu1 %391  ;;  %v495_v56 = vsel %vm182_vm0, %v158_v52, 0.0  ;;  %v113_v57 = vld [vmem:[%s7455_s0 + $0x1d8] sm:$0xff]  ;;  %v112_v58 = vld [vmem:[%s7455_s0 + $0x1d0] sm:$0xff] }
  0xe3   :  { %v389_v7 = vpop.xlane.xlu0 %388  ;;  %v637_v13 = vmul.f32 0.020408163, %v392_v6  ;;  %v360_v61 = vsel %vm182_vm0, %v113_v57, 0.0  ;;  %v357_v62 = vsel %vm182_vm0, %v112_v58, 0.0  ;;  %v552_v6 = vsel %vm182_vm0, %v177_v1, 0.0 }
  0xe4   :  { %v1700_v11 = vsel %vm1282_vm4, %v1699_v3, %v5862_v9  ;;  %v1126_v28 = vunpack.c.l.b16 %v698_v5  ;;  %v1127_v12 = vunpack.c.h.b16 %v698_v5  ;;  %v636_v17 = vmul.f32 0.020408163, %v389_v7  ;;  %v176_v3 = vld [vmem:[%s7455_s0 + $0x3d0] sm:$0xff] }
  0xe5   :  { %v5926_v16 = vsel %vm1289_vm5, %v1704_v4, %v1700_v11  ;;  %493 = vadd.xlane.f32.xlu1 %v492_v8  ;;  %v549_v7 = vsel %vm182_vm0, %v176_v3, 0.0  ;;  %v97_v8 = vld [vmem:[%s7455_s0 + $0x158] sm:$0xff]  ;;  %v1312_v43 = vadd.s32 4294967224, %v5741_v15 }
  0xe6   :  { %v1281_v19 = vrot.slane %v1126_v28, %v5883_v32  ;;  %v1288_v20 = vrot.slane %v1127_v12, %v5886_v33  ;;  %v730_v9 = vpack.c.bf16 %v637_v13, %v636_v17  ;;  %490 = vadd.xlane.f32.xlu0 %v489_v10  ;;  %v5933_v21 = vpop.xlane.xlu1 %253  ;;  %v96_v10 = vld [vmem:[%s7455_s0 + $0x150] sm:$0xff]  ;;  %v312_v12 = vsel %vm182_vm0, %v97_v8, 0.0  ;;  %v6025_v13 = vld [vmem:[%s7456_s1 + $0x400] sm:$0xff]  ;;  %v6035_v17 = vld [vmem:[%s7456_s1 + $0x408] sm:$0xff] }
  0xe7   :  { %v5935_v22 = vpop.xlane.xlu0 %250  ;;  %v309_v18 = vsel %vm182_vm0, %v96_v10, 0.0 }
  0xe8   :  { %v1283_v24 = vsel %vm1282_vm4, %v1281_v19, %v5878_v26  ;;  %v1190_v31 = vunpack.c.l.b16 %v730_v9  ;;  %v1191_v34 = vunpack.c.h.b16 %v730_v9  ;;  %v161_v19 = vld [vmem:[%s7455_s0 + $0x358] sm:$0xff]  ;;  %v6046_v9 = vld [vmem:[%s7456_s1 + $0x428] sm:$0xff] }
  0xe9   :  { %v5945_v30 = vsel %vm1289_vm5, %v1288_v20, %v1283_v24  ;;  %355 = vadd.xlane.f32.xlu1 %v354_v23  ;;  %v4644_v20 = vcombine.high %v6025_v13, %v6030_v14  ;;  %v160_v23 = vld [vmem:[%s7455_s0 + $0x350] sm:$0xff]  ;;  %v4646_v27 = vcombine.high %v6035_v17, %v6046_v9 }
  0xea   :  { %v1620_v36 = vrot.slane %v1190_v31, %v5883_v32  ;;  %v1625_v26 = vrot.slane %v1191_v34, %v5886_v33  ;;  %352 = vadd.xlane.f32.xlu0 %v351_v25  ;;  %v5952_v37 = vpop.xlane.xlu1 %445  ;;  %v115_v25 = vld [vmem:[%s7455_s0 + $0x1e8] sm:$0xff]  ;;  %v1291_v31 = vadd.s32 4294967248, %v5741_v15  ;;  %v1298_v34 = vadd.s32 4294967240, %v5741_v15 }
  0xeb   :  { %v5954_v38 = vpop.xlane.xlu0 %442  ;;  %3248 = vmatprep.subr.bf16.mxu0 %v4644_v20  ;;  %3330 = vmatprep.subr.bf16.mxu1 %v4646_v27  ;;  %v655_v52 = vmul.f32 0.020408163, %v5952_v37 }
  0xec   :  { %v1621_v42 = vsel %vm1282_vm4, %v1620_v36, %v5899_v45  ;;  %v159_v45 = vld [vmem:[%s7455_s0 + $0x348] sm:$0xff]  ;;  %v6087_v57 = vsub.s32 %v1291_v31, %v5754_v29  ;;  %v654_v37 = vmul.f32 0.020408163, %v5954_v38  ;;  %v6097_v3 = vsub.s32 %v1298_v34, %v5754_v29  ;;  %v98_v38 = vld [vmem:[%s7455_s0 + $0x160] sm:$0xff]  ;;  %v117_v31 = vld [vmem:[%s7455_s0 + $0x1f8] sm:$0xff] }
  0xed   :  { %v5967_v44 = vsel %vm1289_vm5, %v1625_v26, %v1621_v42  ;;  %547 = vadd.xlane.f32.xlu1 %v546_v39  ;;  %v498_v55 = vsel %vm182_vm0, %v159_v45, 0.0  ;;  %v504_v26 = vsel %vm182_vm0, %v161_v19, 0.0  ;;  %v591_v39 = vmul.f32 0.020408163, %v5933_v21  ;;  %v114_v45 = vld [vmem:[%s7455_s0 + $0x1e0] sm:$0xff]  ;;  %v116_v34 = vld [vmem:[%s7455_s0 + $0x1f0] sm:$0xff] }
  0xee   :  { %544 = vadd.xlane.f32.xlu0 %v543_v40  ;;  %v5969_v47 = vpop.xlane.xlu1 %205  ;;  %v590_v40 = vmul.f32 0.020408163, %v5935_v22  ;;  %v501_v42 = vsel %vm182_vm0, %v160_v23, 0.0  ;;  %v1326_v21 = vadd.s32 4294967208, %v5741_v15  ;;  %v179_v22 = vld [vmem:[%s7455_s0 + $0x3e8] sm:$0xff]  ;;  %v363_v8 = vsel %vm182_vm0, %v114_v45, 0.0 }
  0xef   :  { %v5971_v48 = vpop.xlane.xlu0 %202  ;;  %v575_v58 = vmul.f32 0.020408163, %v5969_v47  ;;  %v163_v47 = vld [vmem:[%s7455_s0 + $0x368] sm:$0xff]  ;;  %v1340_v19 = vadd.s32 4294967192, %v5741_v15  ;;  %v558_v23 = vsel %vm182_vm0, %v179_v22, 0.0 }
  0xf0   :  { %v6123_v20 = vsub.s32 %v1326_v21, %v5754_v29 }
  0xf1   :  { %307 = vadd.xlane.f32.xlu1 %v306_v50  ;;  %v1319_v50 = vadd.s32 4294967216, %v5741_v15 }
  0xf2   :  { %304 = vadd.xlane.f32.xlu0 %v303_v51  ;;  %v5981_v53 = vpop.xlane.xlu1 %397  ;;  %v366_v51 = vsel %vm182_vm0, %v115_v25, 0.0 }
  0xf3   :  { %v5983_v54 = vpop.xlane.xlu0 %394  ;;  %v6115_v10 = vsub.s32 %v1319_v50, %v5754_v29  ;;  %v181_v50 = vld [vmem:[%s7455_s0 + $0x3f8] sm:$0xff] }
  0xf4   :  { %v638_v21 = vmul.f32 0.020408163, %v5983_v54 }
  0xf5   :  { %499 = vadd.xlane.f32.xlu1 %v498_v55  ;;  %v178_v55 = vld [vmem:[%s7455_s0 + $0x3e0] sm:$0xff] }
  0xf6   :  { %496 = vadd.xlane.f32.xlu0 %v495_v56  ;;  %v5993_v59 = vpop.xlane.xlu1 %259  ;;  %v99_v56 = vld [vmem:[%s7455_s0 + $0x168] sm:$0xff]  ;;  %v555_v25 = vsel %vm182_vm0, %v178_v55, 0.0  ;;  %v101_v55 = vld [vmem:[%s7455_s0 + $0x178] sm:$0xff] }
  0xf7   :  { %v5995_v60 = vpop.xlane.xlu0 %256  ;;  %v318_v27 = vsel %vm182_vm0, %v99_v56, 0.0 }
  0xf8   :  { %v592_v54 = vmul.f32 0.020408163, %v5995_v60  ;;  %v165_v60 = vld [vmem:[%s7455_s0 + $0x378] sm:$0xff] }
  0xf9   :  { %361 = vadd.xlane.f32.xlu1 %v360_v61  ;;  %v574_v61 = vmul.f32 0.020408163, %v5971_v48  ;;  %v6112_v48 = vsub.s32 %v1312_v43, %v5754_v29  ;;  %v510_v43 = vsel %vm182_vm0, %v163_v47, 0.0 }
  0xfa   :  { %358 = vadd.xlane.f32.xlu0 %v357_v62  ;;  %v6005_v4 = vpop.xlane.xlu1 %451 }
  0xfb   :  { %v6007_v5 = vpop.xlane.xlu0 %448 }
  0xfc   :  { %v656_v33 = vmul.f32 0.020408163, %v6007_v5 }
  0xfd   :  { %553 = vadd.xlane.f32.xlu1 %v552_v6  ;;  %v6099_v6 = vpack.c.bf16 %v591_v39, %v590_v40  ;;  %v6134_v39 = vpack.c.bf16 %v575_v58, %v574_v61  ;;  %v6162_v58 = vsel %vm182_vm0, %v117_v31, 0.0  ;;  %v6165_v61 = vsel %vm182_vm0, %v116_v34, 0.0 }
  0xfe   :  { %550 = vadd.xlane.f32.xlu0 %v549_v7  ;;  %v6017_v11 = vpop.xlane.xlu1 %211  ;;  %v6102_v7 = vsub.s32 %v1305_v41, %v5754_v29  ;;  %v6177_v31 = vsel %vm182_vm0, %v101_v55, 0.0  ;;  %v1347_v34 = vadd.s32 4294967184, %v5741_v15  ;;  %v657_v55 = vmul.f32 0.020408163, %v6005_v4 }
  0xff   :  { %v6019_v28 = vpop.xlane.xlu0 %208  ;;  %v1144_v45 = vunpack.c.l.b16 %v6099_v6  ;;  %v577_v32 = vmul.f32 0.020408163, %v6017_v11 }
 0x100   :  { %v576_v0 = vmul.f32 0.020408163, %v6019_v28 }
 0x101   :  { %313 = vadd.xlane.f32.xlu1 %v312_v12  ;;  %v162_v12 = vld [vmem:[%s7455_s0 + $0x360] sm:$0xff] }
 0x102   :  { %310 = vadd.xlane.f32.xlu0 %v309_v18  ;;  %v6060_v35 = vpop.xlane.xlu1 %403  ;;  %v1333_v18 = vadd.s32 4294967200, %v5741_v15  ;;  %v507_v22 = vsel %vm182_vm0, %v162_v12, 0.0  ;;  %v1128_v12 = vunpack.c.l.b16 %v6134_v39 }
 0x103   :  { %v6062_v36 = vpop.xlane.xlu0 %400 }
 0x104   :  { %v6156_v56 = vsub.s32 %v1333_v18, %v5754_v29  ;;  %v1295_v5 = vrot.slane %v1128_v12, %v6087_v57  ;;  %v641_v12 = vmul.f32 0.020408163, %v6060_v35 }
 0x105   :  { %505 = vadd.xlane.f32.xlu1 %v504_v26  ;;  %v739_v26 = vpack.c.bf16 %v655_v52, %v654_v37  ;;  %v639_v52 = vmul.f32 0.020408163, %v5981_v53  ;;  %v6159_v37 = vsub.s32 %v1340_v19, %v5754_v29  ;;  %v593_v53 = vmul.f32 0.020408163, %v5993_v59  ;;  %v100_v59 = vld [vmem:[%s7455_s0 + $0x170] sm:$0xff] }
 0x106   :  { %502 = vadd.xlane.f32.xlu0 %v501_v42  ;;  %v6092_v62 = vpop.xlane.xlu1 %265  ;;  %v315_v42 = vsel %vm182_vm0, %v98_v38, 0.0  ;;  %v6198_v49 = vsel %vm182_vm0, %v100_v59, 0.0 }
 0x107   :  { %v6094_v1 = vpop.xlane.xlu0 %262  ;;  %v1208_v47 = vunpack.c.l.b16 %v739_v26  ;;  %v1209_v24 = vunpack.c.h.b16 %v739_v26  ;;  %v708_v63 = vpack.c.bf16 %v593_v53, %v592_v54  ;;  %v1129_v26 = vunpack.c.h.b16 %v6134_v39 }
 0x108   :  { %v6219_v54 = vsub.s32 %v1347_v34, %v5754_v29  ;;  %v1297_v34 = vsel %vm1296_vm6, %v1295_v5, %v5945_v30 }
 0x109   :  { %367 = vadd.xlane.f32.xlu1 %v366_v51  ;;  %v180_v51 = vld [vmem:[%s7455_s0 + $0x3f0] sm:$0xff]  ;;  %v1709_v4 = vrot.slane %v1208_v47, %v6087_v57  ;;  %v1714_v39 = vrot.slane %v1209_v24, %v6097_v3  ;;  %v740_v47 = vpack.c.bf16 %v657_v55, %v656_v33  ;;  %v1146_v59 = vunpack.c.l.b16 %v708_v63 }
 0x10a   :  { %364 = vadd.xlane.f32.xlu0 %v363_v8  ;;  %v6136_v40 = vpop.xlane.xlu1 %457  ;;  %v6170_v8 = vsel %vm182_vm0, %v181_v50, 0.0  ;;  %v6173_v38 = vsel %vm182_vm0, %v180_v51, 0.0  ;;  %v1393_v50 = vrot.slane %v1144_v45, %v6087_v57  ;;  %v6191_v51 = vpack.c.bf16 %v639_v52, %v638_v21 }
 0x10b   :  { %v6138_v41 = vpop.xlane.xlu0 %454  ;;  %v1302_v24 = vrot.slane %v1129_v26, %v6097_v3  ;;  %v1403_v30 = vrot.slane %v1146_v59, %v6102_v7 }
 0x10c   :  { %v1394_v52 = vsel %vm1296_vm6, %v1393_v50, %v5914_v2  ;;  %v1192_v53 = vunpack.c.l.b16 %v6191_v51  ;;  %v594_v2 = vmul.f32 0.020408163, %v6094_v1  ;;  %v658_v1 = vmul.f32 0.020408163, %v6138_v41 }
 0x10d   :  { %559 = vadd.xlane.f32.xlu1 %v558_v23  ;;  %v164_v23 = vld [vmem:[%s7455_s0 + $0x370] sm:$0xff]  ;;  %v1304_v41 = vsel %vm1303_vm7, %v1302_v24, %v1297_v34 }
 0x10e   :  { %556 = vadd.xlane.f32.xlu0 %v555_v25  ;;  %v218_v18 = vpop.xlane.xlu1 %217  ;;  %v1145_v25 = vunpack.c.h.b16 %v6099_v6  ;;  %v6201_v6 = vsel %vm182_vm0, %v165_v60, 0.0  ;;  %v6204_v45 = vsel %vm182_vm0, %v164_v23, 0.0  ;;  %v640_v60 = vmul.f32 0.020408163, %v6062_v36 }
 0x10f   :  { %v215_v19 = vpop.xlane.xlu0 %214  ;;  %v1710_v23 = vsel %vm1296_vm6, %v1709_v4, %v5926_v16  ;;  %v1630_v35 = vrot.slane %v1192_v53, %v6087_v57  ;;  %v1147_v36 = vunpack.c.h.b16 %v708_v63  ;;  %v1211_v4 = vunpack.c.h.b16 %v740_v47 }
 0x110   :  { %v1398_v21 = vrot.slane %v1145_v25, %v6097_v3  ;;  %v579_v25 = vmul.f32 0.020408163, %v218_v18  ;;  %v578_v50 = vmul.f32 0.020408163, %v215_v19  ;;  %v6236_v55 = vpack.c.bf16 %v641_v12, %v640_v60 }
 0x111   :  { %319 = vadd.xlane.f32.xlu1 %v318_v27  ;;  %v1354_v27 = vadd.s32 4294967176, %v5741_v15  ;;  %v595_v15 = vmul.f32 0.020408163, %v6092_v62  ;;  %v659_v62 = vmul.f32 0.020408163, %v6136_v40  ;;  %v1715_v40 = vsel %vm1303_vm7, %v1714_v39, %v1710_v23 }
 0x112   :  { %316 = vadd.xlane.f32.xlu0 %v315_v42  ;;  %v6209_v11 = vpop.xlane.xlu1 %409  ;;  %v700_v42 = vpack.c.bf16 %v577_v32, %v576_v0  ;;  %v1193_v0 = vunpack.c.h.b16 %v6191_v51  ;;  %v1399_v63 = vsel %vm1303_vm7, %v1398_v21, %v1394_v52  ;;  %v1631_v26 = vsel %vm1296_vm6, %v1630_v35, %v5967_v44 }
 0x113   :  { %v6211_v28 = vpop.xlane.xlu0 %406  ;;  %v6238_v51 = vpack.c.bf16 %v595_v15, %v594_v2  ;;  %v1408_v53 = vrot.slane %v1147_v36, %v6112_v48  ;;  %v6254_v39 = vpack.c.bf16 %v579_v25, %v578_v50  ;;  %v1724_v44 = vrot.slane %v1211_v4, %v6112_v48 }
 0x114   :  { %v1130_v16 = vunpack.c.l.b16 %v700_v42  ;;  %v1131_v5 = vunpack.c.h.b16 %v700_v42  ;;  %v642_v35 = vmul.f32 0.020408163, %v6211_v28  ;;  %vm1914_vm0 = vcmask 1041409  }
 0x115   :  { %511 = vadd.xlane.f32.xlu1 %v510_v43  ;;  %v1210_v43 = vunpack.c.l.b16 %v740_v47  ;;  %v1404_v47 = vsel %vm1310_vm8, %v1403_v30, %v1399_v63  ;;  %v1148_v12 = vunpack.c.l.b16 %v6238_v51  ;;  %v1132_v36 = vunpack.c.l.b16 %v6254_v39 }
 0x116   :  { %508 = vadd.xlane.f32.xlu0 %v507_v22  ;;  %v272_v32 = vpop.xlane.xlu1 %271  ;;  %v6242_v22 = vsub.s32 %v1354_v27, %v5754_v29  ;;  %v741_v27 = vpack.c.bf16 %v659_v62, %v658_v1  ;;  %v1309_v21 = vrot.slane %v1130_v16, %v6102_v7  ;;  %v1316_v34 = vrot.slane %v1131_v5, %v6112_v48 }
 0x117   :  { %v269_v33 = vpop.xlane.xlu0 %268  ;;  %v1719_v52 = vrot.slane %v1210_v43, %v6102_v7  ;;  %v597_v59 = vmul.f32 0.020408163, %v272_v32  ;;  %v1149_v1 = vunpack.c.h.b16 %v6238_v51  ;;  %v1413_v43 = vrot.slane %v1148_v12, %v6115_v10 }
 0x118   :  { %v596_v42 = vmul.f32 0.020408163, %v269_v33  ;;  %v1212_v24 = vunpack.c.l.b16 %v741_v27  ;;  %v1311_v33 = vsel %vm1310_vm8, %v1309_v21, %v1304_v41  ;;  %v1213_v28 = vunpack.c.h.b16 %v741_v27 }
 0x119   :  { %373 = vadd.xlane.f32.xlu1 %v6162_v58  ;;  %v1635_v58 = vrot.slane %v1193_v0, %v6097_v3  ;;  %v643_v0 = vmul.f32 0.020408163, %v6209_v11  ;;  %v1409_v11 = vsel %vm1317_vm9, %v1408_v53, %v1404_v47  ;;  %v1133_v41 = vunpack.c.h.b16 %v6254_v39 }
 0x11a   :  { %370 = vadd.xlane.f32.xlu0 %v6165_v61  ;;  %v464_v18 = vpop.xlane.xlu1 %463  ;;  %v1194_v61 = vunpack.c.l.b16 %v6236_v55  ;;  %v710_v16 = vpack.c.bf16 %v597_v59, %v596_v42  ;;  %v1734_v5 = vrot.slane %v1213_v28, %v6123_v20 }
 0x11b   :  { %v461_v19 = vpop.xlane.xlu0 %460  ;;  %v661_v60 = vmul.f32 0.020408163, %v464_v18  ;;  %v1636_v32 = vsel %vm1303_vm7, %v1635_v58, %v1631_v26  ;;  %v733_v51 = vpack.c.bf16 %v643_v0, %v642_v35  ;;  %v1414_v26 = vsel %vm1324_vm10, %v1413_v43, %v1409_v11 }
 0x11c   :  { %v660_v15 = vmul.f32 0.020408163, %v461_v19  ;;  %v1640_v62 = vrot.slane %v1194_v61, %v6102_v7  ;;  %v1418_v58 = vrot.slane %v1149_v1, %v6123_v20  ;;  %v1150_v27 = vunpack.c.l.b16 %v710_v16 }
 0x11d   :  { %565 = vadd.xlane.f32.xlu1 %v6170_v8  ;;  %v1720_v8 = vsel %vm1310_vm8, %v1719_v52, %v1715_v40  ;;  %v1729_v40 = vrot.slane %v1212_v24, %v6115_v10  ;;  %v1196_v47 = vunpack.c.l.b16 %v733_v51 }
 0x11e   :  { %562 = vadd.xlane.f32.xlu0 %v6173_v38  ;;  %v224_v2 = vpop.xlane.xlu1 %223  ;;  %v1195_v38 = vunpack.c.h.b16 %v6236_v55  ;;  %v742_v25 = vpack.c.bf16 %v661_v60, %v660_v15  ;;  %v1725_v63 = vsel %vm1317_vm9, %v1724_v44, %v1720_v8  ;;  %v1318_v55 = vsel %vm1317_vm9, %v1316_v34, %v1311_v33 }
 0x11f   :  { %v221_v23 = vpop.xlane.xlu0 %220  ;;  %v581_v4 = vmul.f32 0.020408163, %v224_v2  ;;  %v1641_v19 = vsel %vm1310_vm8, %v1640_v62, %v1636_v32  ;;  %v1730_v44 = vsel %vm1324_vm10, %v1729_v40, %v1725_v63  ;;  %v1197_v15 = vunpack.c.h.b16 %v733_v51 }
 0x120   :  { %v580_v18 = vmul.f32 0.020408163, %v221_v23  ;;  %v1214_v53 = vunpack.c.l.b16 %v742_v25  ;;  %v1151_v2 = vunpack.c.h.b16 %v710_v16  ;;  %v1215_v23 = vunpack.c.h.b16 %v742_v25 }
 0x121   :  { %325 = vadd.xlane.f32.xlu1 %v6177_v31  ;;  %v1323_v31 = vrot.slane %v1132_v36, %v6115_v10  ;;  %v1419_v24 = vsel %vm1331_vm11, %v1418_v58, %v1414_v26  ;;  %v1423_v0 = vrot.slane %v1150_v27, %v6156_v56  ;;  %v1650_v33 = vrot.slane %v1196_v47, %v6115_v10 }
 0x122   :  { %322 = vadd.xlane.f32.xlu0 %v6198_v49  ;;  %v416_v50 = vpop.xlane.xlu1 %415  ;;  %v1645_v49 = vrot.slane %v1195_v38, %v6112_v48  ;;  %v702_v60 = vpack.c.bf16 %v581_v4, %v580_v18  ;;  %v1739_v35 = vrot.slane %v1214_v53, %v6156_v56  ;;  %v1735_v1 = vsel %vm1331_vm11, %v1734_v5, %v1730_v44 }
 0x123   :  { %v413_v30 = vpop.xlane.xlu0 %412  ;;  %v645_v52 = vmul.f32 0.020408163, %v416_v50  ;;  %v1325_v42 = vsel %vm1324_vm10, %v1323_v31, %v1318_v55  ;;  %v1655_v16 = vrot.slane %v1197_v15, %v6123_v20  ;;  %v1428_v25 = vrot.slane %v1151_v2, %v6159_v37 }
 0x124   :  { %v644_v61 = vmul.f32 0.020408163, %v413_v30  ;;  %v1134_v11 = vunpack.c.l.b16 %v702_v60  ;;  %v1744_v50 = vrot.slane %v1215_v23, %v6159_v37  ;;  %v1424_v63 = vsel %vm1338_vm12, %v1423_v0, %v1419_v24 }
 0x125   :  { %517 = vadd.xlane.f32.xlu1 %v6201_v6  ;;  %v1330_v6 = vrot.slane %v1133_v41, %v6123_v20  ;;  %v1740_v55 = vsel %vm1338_vm12, %v1739_v35, %v1735_v1  ;;  %v1135_v26 = vunpack.c.h.b16 %v702_v60  ;;  %v1429_v53 = vsel %vm1345_vm13, %v1428_v25, %v1424_v63 }
 0x126   :  { %514 = vadd.xlane.f32.xlu0 %v6204_v45  ;;  %v278_v21 = vpop.xlane.xlu1 %277  ;;  %v1646_v45 = vsel %vm1317_vm9, %v1645_v49, %v1641_v19  ;;  %v734_v36 = vpack.c.bf16 %v645_v52, %v644_v61  ;;  %v1337_v58 = vrot.slane %v1134_v11, %v6156_v56  ;;  %v1745_v52 = vsel %vm1345_vm13, %v1744_v50, %v1740_v55 }
 0x127   :  { %v275_v39 = vpop.xlane.xlu0 %274  ;;  %v599_v12 = vmul.f32 0.020408163, %v278_v21  ;;  %v1332_v43 = vsel %vm1331_vm11, %v1330_v6, %v1325_v42  ;;  %v1651_v4 = vsel %vm1324_vm10, %v1650_v33, %v1646_v45 }
 0x128   :  { %v598_v59 = vmul.f32 0.020408163, %v275_v39  ;;  %v1198_v18 = vunpack.c.l.b16 %v734_v36  ;;  %v1199_v47 = vunpack.c.h.b16 %v734_v36  ;;  %v1339_v23 = vsel %vm1338_vm12, %v1337_v58, %v1332_v43 }
 0x129   :  { %v1656_v33 = vsel %vm1331_vm11, %v1655_v16, %v1651_v4 }
 0x12a   :  { %v711_v34 = vpack.c.bf16 %v599_v12, %v598_v59  ;;  %v470_v32 = vpop.xlane.xlu1 %469  ;;  %v1660_v6 = vrot.slane %v1198_v18, %v6156_v56  ;;  %v1665_v36 = vrot.slane %v1199_v47, %v6159_v37  ;;  %v6358_v47 = vld [vmem:[%s7456_s1 + $0x30] sm:$0xff] }
 0x12b   :  { %v467_v8 = vpop.xlane.xlu0 %466  ;;  %v663_v62 = vmul.f32 0.020408163, %v470_v32 }
 0x12c   :  { %v1152_v38 = vunpack.c.l.b16 %v711_v34  ;;  %v662_v28 = vmul.f32 0.020408163, %v467_v8  ;;  %v1153_v30 = vunpack.c.h.b16 %v711_v34  ;;  %v1344_v34 = vrot.slane %v1135_v26, %v6159_v37 }
 0x12d   :  { %v1661_v43 = vsel %vm1338_vm12, %v1660_v6, %v1656_v33  ;;  %v7478_v33 = vcombine.low %v6025_v13, %v6030_v14  ;;  %v916_v13 = vld [vmem:[%s7456_s1 + $0x4e0] sm:$0xff]  ;;  %v913_v14 = vld [vmem:[%s7456_s1 + $0x4c8] sm:$0xff] }
 0x12e   :  { %v1433_v40 = vrot.slane %v1152_v38, %v6219_v54  ;;  %v743_v51 = vpack.c.bf16 %v663_v62, %v662_v28  ;;  %v230_v41 = vpop.xlane.xlu1 %229  ;;  %v1438_v21 = vrot.slane %v1153_v30, %v6242_v22  ;;  %v1346_v50 = vsel %vm1345_vm13, %v1344_v34, %v1339_v23 }
 0x12f   :  { %v227_v31 = vpop.xlane.xlu0 %226  ;;  %v583_v19 = vmul.f32 0.020408163, %v230_v41  ;;  %v1666_v41 = vsel %vm1345_vm13, %v1665_v36, %v1661_v43 }
 0x130   :  { %v582_v49 = vmul.f32 0.020408163, %v227_v31  ;;  %v1216_v5 = vunpack.c.l.b16 %v743_v51  ;;  %v1217_v27 = vunpack.c.h.b16 %v743_v51  ;;  %v1434_v61 = vsel %vm1352_vm14, %v1433_v40, %v1429_v53  ;;  %v901_v53 = vld [vmem:[%s7456_s1 + $0x468] sm:$0xff] }
 0x131   :  { %v1439_v32 = vsel %vm1359_vm15, %v1438_v21, %v1434_v61 }
 0x132   :  { %v703_v39 = vpack.c.bf16 %v583_v19, %v582_v49  ;;  %v1749_v12 = vrot.slane %v1216_v5, %v6219_v54  ;;  %v1754_v59 = vrot.slane %v1217_v27, %v6242_v22  ;;  %v422_v44 = vpop.xlane.xlu1 %421  ;;  %v896_v19 = vld [vmem:[%s7456_s1 + $0x440] sm:$0xff]  ;;  %v897_v27 = vld [vmem:[%s7456_s1 + $0x448] sm:$0xff] }
 0x133   :  { %v419_v42 = vpop.xlane.xlu0 %418  ;;  %v647_v15 = vmul.f32 0.020408163, %v422_v44  ;;  %v900_v49 = vld [vmem:[%s7456_s1 + $0x460] sm:$0xff]  ;;  %v6368_v44 = vld [vmem:[%s7456_s1 + $0x18] sm:$0xff]  ;;  %v4654_v23 = vcombine.high %v897_v27, %v901_v53 }
 0x134   :  { %v1136_v60 = vunpack.c.l.b16 %v703_v39  ;;  %v646_v2 = vmul.f32 0.020408163, %v419_v42  ;;  %v1750_v45 = vsel %vm1352_vm14, %v1749_v12, %v1745_v52  ;;  %v1137_v24 = vunpack.c.h.b16 %v703_v39  ;;  %v6353_v39 = vld [vmem:[%s7456_s1 + $0x10] sm:$0xff]  ;;  %v6373_v42 = vld [vmem:[%s7456_s1 + $0x38] sm:$0xff] }
 0x135   :  { %v1755_v8 = vsel %vm1359_vm15, %v1754_v59, %v1750_v45  ;;  %v4645_v59 = vcombine.low %v6035_v17, %v6046_v9  ;;  %v904_v17 = vld [vmem:[%s7456_s1 + $0x480] sm:$0xff]  ;;  %v4519_v34 = vcombine.low %v6353_v39, %v6358_v47  ;;  %v4651_v36 = vcombine.low %v896_v19, %v900_v49 }
 0x136   :  { %v1351_v0 = vrot.slane %v1136_v60, %v6219_v54  ;;  %v735_v35 = vpack.c.bf16 %v647_v15, %v646_v2  ;;  %v332_v38 = vpop.xlane.xlu1 %331  ;;  %v1916_v1 = vsel %vm1914_vm0, %v1755_v8, %v1439_v32  ;;  %v1358_v30 = vrot.slane %v1137_v24, %v6242_v22  ;;  %v908_v9 = vld [vmem:[%s7456_s1 + $0x4a0] sm:$0xff] }
 0x137   :  { %v329_v62 = vpop.xlane.xlu0 %328  ;;  %v617_v25 = vmul.f32 0.020408163, %v332_v38  ;;  %v6325_v55 = vpack.c.b16 %v1916_v1, %v1916_v1  ;;  %v4652_v2 = vcombine.high %v896_v19, %v900_v49  ;;  %v4521_v32 = vcombine.low %v6368_v44, %v6373_v42 }
 0x138   :  { %v1200_v11 = vunpack.c.l.b16 %v735_v35  ;;  %v1201_v28 = vunpack.c.h.b16 %v735_v35  ;;  %v616_v63 = vmul.f32 0.020408163, %v329_v62  ;;  %v1353_v16 = vsel %vm1352_vm14, %v1351_v0, %v1346_v50  ;;  %v905_v0 = vld [vmem:[%s7456_s1 + $0x488] sm:$0xff] }
 0x139   :  { %3239 = vmatprep.mubr.bf16.mxu0 %v6325_v55  ;;  %3321 = vmatprep.mubr.bf16.mxu1 %v6325_v55  ;;  %v1360_v52 = vsel %vm1359_vm15, %v1358_v30, %v1353_v16  ;;  %v909_v35 = vld [vmem:[%s7456_s1 + $0x4a8] sm:$0xff]  ;;  %v4653_v38 = vcombine.low %v897_v27, %v901_v53  ;;  %v4660_v43 = vcombine.high %v904_v17, %v908_v9  ;;  %v920_v53 = vld [vmem:[%s7456_s1 + $0x500] sm:$0xff] }
 0x13a   :  { %v1670_v40 = vrot.slane %v1200_v11, %v6219_v54  ;;  %v1675_v51 = vrot.slane %v1201_v28, %v6242_v22  ;;  %v6331_v31 = vpack.c.bf16 %v617_v25, %v616_v63  ;;  %v524_v4 = vpop.xlane.xlu1 %523  ;;  %v4662_v11 = vcombine.high %v905_v0, %v909_v35  ;;  %v912_v28 = vld [vmem:[%s7456_s1 + $0x4c0] sm:$0xff]  ;;  %v917_v63 = vld [vmem:[%s7456_s1 + $0x4e8] sm:$0xff] }
 0x13b   :  { %v521_v18 = vpop.xlane.xlu0 %520  ;;  %v681_v58 = vmul.f32 0.020408163, %v524_v4  ;;  %v4670_v19 = vcombine.high %v913_v14, %v917_v63 }
 0x13c   :  { %v1671_v26 = vsel %vm1352_vm14, %v1670_v40, %v1666_v41  ;;  %v680_v5 = vmul.f32 0.020408163, %v521_v18  ;;  %v1170_v25 = vunpack.c.l.b16 %v6331_v31  ;;  %v1171_v50 = vunpack.c.h.b16 %v6331_v31 }
 0x13d   :  { %v1676_v21 = vsel %vm1359_vm15, %v1675_v51, %v1671_v26  ;;  %v4659_v40 = vcombine.low %v904_v17, %v908_v9  ;;  %v4661_v51 = vcombine.low %v905_v0, %v909_v35  ;;  %v4668_v18 = vcombine.high %v912_v28, %v916_v13  ;;  %v7479_v26 = vld [vmem:[#allocation14_spill] sm:$0xff]  ;;  %v7481_v0 = vld [vmem:[#allocation16_spill] sm:$0xff] }
 0x13e   :  { %v6360_v61 = vpack.c.bf16 %v681_v58, %v680_v5  ;;  %v1915_v12 = vsel %vm1914_vm0, %v1676_v21, %v1360_v52  ;;  %v284_v6 = vpop.xlane.xlu1 %283  ;;  %v1522_v49 = vrot.slane %v1170_v25, %v5778_v46  ;;  %v1526_v58 = vrot.slane %v1171_v50, %v7479_v26  ;;  %v924_v52 = vld [vmem:[%s7456_s1 + $0x520] sm:$0xff] }
 0x13f   :  { %v281_v60 = vpop.xlane.xlu0 %280  ;;  %v6375_v15 = vpack.c.b16 %v1915_v12, %v1915_v12  ;;  %v601_v45 = vmul.f32 0.020408163, %v284_v6  ;;  %v921_v6 = vld [vmem:[%s7456_s1 + $0x508] sm:$0xff]  ;;  %v4669_v9 = vcombine.low %v913_v14, %v917_v63  ;;  %v4675_v50 = vcombine.low %v920_v53, %v924_v52 }
 0x140   :  { %v600_v24 = vmul.f32 0.020408163, %v281_v60  ;;  %v925_v60 = vld [vmem:[%s7456_s1 + $0x528] sm:$0xff] }
 0x141   :  { %3240 = vmatmul.mubr.bf16.vlgmr.msra.gmra.mrb[0].mxu0 %v6375_v15  ;;  %3322 = vmatmul.mubr.bf16.vlgmr.msra.gmra.mrb[0].mxu1 %v6375_v15 }
 0x142   :  { %v6395_v8 = vpack.c.bf16 %v601_v45, %v600_v24  ;;  %3249 = vmatpush1.bf16.msra.mxu0 %v7478_v33  ;;  %3331 = vmatpush1.bf16.msra.mxu1 %v4645_v59  ;;  %v338_v62 = vpop.xlane.xlu1 %337  ;;  %v4667_v59 = vcombine.low %v912_v28, %v916_v13  ;;  %v7480_v45 = vld [vmem:[#allocation15_spill] sm:$0xff]  ;;  %v932_v28 = vld [vmem:[%s7456_s1 + $0x560] sm:$0xff] }
 0x143   :  { %v335_v1 = vpop.xlane.xlu0 %334  ;;  %3250 = vmatprep.subr.bf16.mxu0 %v4652_v2  ;;  %3332 = vmatprep.subr.bf16.mxu1 %v4654_v23  ;;  %v619_v30 = vmul.f32 0.020408163, %v338_v62  ;;  %v1234_v2 = vunpack.c.l.b16 %v6360_v61  ;;  %v1235_v23 = vunpack.c.h.b16 %v6360_v61  ;;  %v1527_v62 = vsel %vm1261_vm1, %v1526_v58, %v1522_v49  ;;  %v928_v61 = vld [vmem:[%s7456_s1 + $0x540] sm:$0xff]  ;;  %v933_v13 = vld [vmem:[%s7456_s1 + $0x568] sm:$0xff] }
 0x144   :  { %v618_v16 = vmul.f32 0.020408163, %v335_v1  ;;  %v4684_v49 = vcombine.high %v928_v61, %v932_v28  ;;  %v6468_v58 = vld [vmem:[%s7456_s1 + $0x588] sm:$0xff] }
 0x145   :  { %v1838_v14 = vrot.slane %v1234_v2, %v5778_v46  ;;  %v1842_v63 = vrot.slane %v1235_v23, %v7479_v26 }
 0x146   :  { %3251 = vmatpush1.bf16.msra.mxu0 %v4651_v36  ;;  %3333 = vmatpush1.bf16.msra.mxu1 %v4653_v38  ;;  %v721_v41 = vpack.c.bf16 %v619_v30, %v618_v16  ;;  %v476_v31 = vpop.xlane.xlu1 %475  ;;  %v4676_v38 = vcombine.high %v920_v53, %v924_v52  ;;  %v929_v30 = vld [vmem:[%s7456_s1 + $0x548] sm:$0xff] }
 0x147   :  { %v473_v4 = vpop.xlane.xlu0 %472  ;;  %3252 = vmatprep.subr.bf16.mxu0 %v4660_v43  ;;  %3334 = vmatprep.subr.bf16.mxu1 %v4662_v11  ;;  %v665_v5 = vmul.f32 0.020408163, %v476_v31  ;;  %v4678_v11 = vcombine.high %v921_v6, %v925_v60  ;;  %v1154_v31 = vunpack.c.l.b16 %v6395_v8  ;;  %v1843_v2 = vsel %vm1261_vm1, %v1842_v63, %v1838_v14 }
 0x148   :  { %v664_v27 = vmul.f32 0.020408163, %v473_v4  ;;  %v1172_v21 = vunpack.c.l.b16 %v721_v41  ;;  %v1173_v12 = vunpack.c.h.b16 %v721_v41  ;;  %v6461_v41 = vld [vmem:[%s7456_s1 + $0x5a0] sm:$0xff]  ;;  %v1155_v4 = vunpack.c.h.b16 %v6395_v8 }
 0x149   :  { %v4686_v8 = vcombine.high %v929_v30, %v933_v13 }
 0x14a   :  { %v6430_v17 = vpack.c.bf16 %v665_v5, %v664_v27  ;;  %3253 = vmatpush1.bf16.msra.mxu0 %v4659_v40  ;;  %3335 = vmatpush1.bf16.msra.mxu1 %v4661_v51  ;;  %v1531_v24 = vrot.slane %v1172_v21, %v7480_v45  ;;  %v1536_v35 = vrot.slane %v1173_v12, %v7481_v0  ;;  %v530_v33 = vpop.xlane.xlu1 %529  ;;  %v6456_v51 = vld [vmem:[%s7456_s1 + $0x580] sm:$0xff]  ;;  %v6473_v5 = vld [vmem:[%s7456_s1 + $0x5a8] sm:$0xff] }
 0x14b   :  { %v527_v36 = vpop.xlane.xlu0 %526  ;;  %3254 = vmatprep.subr.bf16.mxu0 %v4668_v18  ;;  %3336 = vmatprep.subr.bf16.mxu1 %v4670_v19  ;;  %v683_v1 = vmul.f32 0.020408163, %v530_v33  ;;  %v4677_v19 = vcombine.low %v921_v6, %v925_v60  ;;  %v4685_v6 = vcombine.low %v929_v30, %v933_v13  ;;  %v4692_v60 = vcombine.high %v6456_v51, %v6461_v41 }
 0x14c   :  { %v682_v43 = vmul.f32 0.020408163, %v527_v36  ;;  %v1532_v25 = vsel %vm1268_vm2, %v1531_v24, %v1527_v62  ;;  %v4694_v24 = vcombine.high %v6468_v58, %v6473_v5  ;;  %v1443_v33 = vrot.slane %v1154_v31, %v5778_v46 }
 0x14d   :  { %v6451_v16 = vsel %vm1275_vm3, %v1536_v35, %v1532_v25  ;;  %v6485_v35 = vld [vmem:[%s7456_s1 + $0x5c0] sm:$0xff]  ;;  %v1447_v36 = vrot.slane %v1155_v4, %v7479_v26  ;;  %v4691_v31 = vcombine.low %v6456_v51, %v6461_v41  ;;  %v4693_v4 = vcombine.low %v6468_v58, %v6473_v5 }
 0x14e   :  { %v753_v40 = vpack.c.bf16 %v683_v1, %v682_v43  ;;  %3255 = vmatpush1.bf16.msra.mxu0 %v4667_v59  ;;  %v290_v18 = vpop.xlane.xlu1 %289  ;;  %3337 = vmatpush1.bf16.msra.mxu1 %v4669_v9  ;;  %v4683_v59 = vcombine.low %v928_v61, %v932_v28  ;;  %v6492_v1 = vld [vmem:[%s7456_s1 + $0x5e0] sm:$0xff]  ;;  %v6497_v43 = vld [vmem:[%s7456_s1 + $0x5c8] sm:$0xff]  ;;  %v1218_v61 = vunpack.c.l.b16 %v6430_v17  ;;  %v1219_v28 = vunpack.c.h.b16 %v6430_v17 }
 0x14f   :  { %3256 = vmatprep.subr.bf16.mxu0 %v4676_v38  ;;  %v603_v52 = vmul.f32 0.020408163, %v290_v18  ;;  %v287_v21 = vpop.xlane.xlu0 %286  ;;  %3338 = vmatprep.subr.bf16.mxu1 %v4678_v11  ;;  %v6502_v11 = vld [vmem:[%s7456_s1 + $0x5e8] sm:$0xff]  ;;  %v4700_v17 = vcombine.high %v6485_v35, %v6492_v1  ;;  %v6523_v51 = vld [vmem:[%s7456_s1 + $0x600] sm:$0xff]  ;;  %v1448_v58 = vsel %vm1261_vm1, %v1447_v36, %v1443_v33 }
 0x150   :  { %v1236_v27 = vunpack.c.l.b16 %v753_v40  ;;  %v1237_v53 = vunpack.c.h.b16 %v753_v40  ;;  %v602_v12 = vmul.f32 0.020408163, %v287_v21  ;;  %v4702_v18 = vcombine.high %v6497_v43, %v6502_v11  ;;  %v956_v41 = vld [vmem:[%s7456_s1 + $0x620] sm:$0xff] }
 0x151   :  { %v1759_v5 = vrot.slane %v1218_v61, %v5778_v46  ;;  %v960_v61 = vld [vmem:[%s7456_s1 + $0x640] sm:$0xff] }
 0x152   :  { %v1847_v23 = vrot.slane %v1236_v27, %v7480_v45  ;;  %v1852_v9 = vrot.slane %v1237_v53, %v7481_v0  ;;  %3257 = vmatpush1.bf16.msra.mxu0 %v4675_v50  ;;  %v713_v38 = vpack.c.bf16 %v603_v52, %v602_v12  ;;  %v482_v62 = vpop.xlane.xlu1 %481  ;;  %3339 = vmatpush1.bf16.msra.mxu1 %v4677_v19 }
 0x153   :  { %3258 = vmatprep.subr.bf16.mxu0 %v4684_v49  ;;  %v667_v50 = vmul.f32 0.020408163, %v482_v62  ;;  %v479_v30 = vpop.xlane.xlu0 %478  ;;  %3340 = vmatprep.subr.bf16.mxu1 %v4686_v8  ;;  %v1763_v52 = vrot.slane %v1219_v28, %v7479_v26  ;;  %v4699_v26 = vcombine.low %v6485_v35, %v6492_v1  ;;  %v964_v35 = vld [vmem:[%s7456_s1 + $0x660] sm:$0xff] }
 0x154   :  { %v1848_v25 = vsel %vm1268_vm2, %v1847_v23, %v1843_v2  ;;  %v1156_v14 = vunpack.c.l.b16 %v713_v38  ;;  %v1157_v63 = vunpack.c.h.b16 %v713_v38  ;;  %v666_v40 = vmul.f32 0.020408163, %v479_v30  ;;  %v953_v2 = vld [vmem:[%s7456_s1 + $0x608] sm:$0xff] }
 0x155   :  { %v6508_v13 = vsel %vm1275_vm3, %v1852_v9, %v1848_v25  ;;  %v957_v23 = vld [vmem:[%s7456_s1 + $0x628] sm:$0xff]  ;;  %v4701_v9 = vcombine.low %v6497_v43, %v6502_v11  ;;  %v1764_v1 = vsel %vm1261_vm1, %v1763_v52, %v1759_v5  ;;  %v972_v5 = vld [vmem:[%s7456_s1 + $0x6a0] sm:$0xff]  ;;  %vm4483_vm1 = vcmask 254976  }
 0x156   :  { %3259 = vmatpush1.bf16.msra.mxu0 %v4683_v59  ;;  %v1452_v19 = vrot.slane %v1156_v14, %v7480_v45  ;;  %v1457_v49 = vrot.slane %v1157_v63, %v7481_v0  ;;  %v745_v27 = vpack.c.bf16 %v667_v50, %v666_v40  ;;  %v344_v53 = vpop.xlane.xlu1 %343  ;;  %3341 = vmatpush1.bf16.msra.mxu1 %v4685_v6  ;;  %v961_v30 = vld [vmem:[%s7456_s1 + $0x648] sm:$0xff] }
 0x157   :  { %3260 = vmatprep.subr.bf16.mxu0 %v4692_v60  ;;  %v621_v21 = vmul.f32 0.020408163, %v344_v53  ;;  %v341_v8 = vpop.xlane.xlu0 %340  ;;  %3342 = vmatprep.subr.bf16.mxu1 %v4694_v24  ;;  %v4708_v24 = vcombine.high %v6523_v51, %v956_v41  ;;  %v965_v14 = vld [vmem:[%s7456_s1 + $0x668] sm:$0xff]  ;;  %v4707_v40 = vcombine.low %v6523_v51, %v956_v41 }
 0x158   :  { %v1453_v12 = vsel %vm1268_vm2, %v1452_v19, %v1448_v58  ;;  %v1220_v59 = vunpack.c.l.b16 %v745_v27  ;;  %v1221_v6 = vunpack.c.h.b16 %v745_v27  ;;  %v620_v60 = vmul.f32 0.020408163, %v341_v8  ;;  %v7483_v19 = vld [vmem:[#allocation18_spill] sm:$0xff] }
 0x159   :  { %v6539_v46 = vsel %vm1275_vm3, %v1457_v49, %v1453_v12  ;;  %v968_v58 = vld [vmem:[%s7456_s1 + $0x680] sm:$0xff]  ;;  %v4718_v41 = vcombine.high %v961_v30, %v965_v14 }
 0x15a   :  { %3261 = vmatpush1.bf16.msra.mxu0 %v4691_v31  ;;  %v1768_v33 = vrot.slane %v1220_v59, %v7480_v45  ;;  %v1773_v36 = vrot.slane %v1221_v6, %v7481_v0  ;;  %v722_v38 = vpack.c.bf16 %v621_v21, %v620_v60  ;;  %v536_v62 = vpop.xlane.xlu1 %535  ;;  %3343 = vmatpush1.bf16.msra.mxu1 %v4693_v4  ;;  %v969_v6 = vld [vmem:[%s7456_s1 + $0x688] sm:$0xff] }
 0x15b   :  { %3262 = vmatprep.subr.bf16.mxu0 %v4700_v17  ;;  %v685_v43 = vmul.f32 0.020408163, %v536_v62  ;;  %v533_v11 = vpop.xlane.xlu0 %532  ;;  %3344 = vmatprep.subr.bf16.mxu1 %v4702_v18  ;;  %v4710_v45 = vcombine.high %v953_v2, %v957_v23  ;;  %v4709_v31 = vcombine.low %v953_v2, %v957_v23  ;;  %v4716_v4 = vcombine.high %v960_v61, %v964_v35  ;;  %v7482_v17 = vld [vmem:[#allocation17_spill] sm:$0xff]  ;;  %v973_v60 = vld [vmem:[%s7456_s1 + $0x6a8] sm:$0xff] }
 0x15c   :  { %v1769_v0 = vsel %vm1268_vm2, %v1768_v33, %v1764_v1  ;;  %v1174_v28 = vunpack.c.l.b16 %v722_v38  ;;  %v1175_v25 = vunpack.c.h.b16 %v722_v38  ;;  %v684_v50 = vmul.f32 0.020408163, %v533_v11  ;;  %v976_v38 = vld [vmem:[%s7456_s1 + $0x6c0] sm:$0xff] }
 0x15d   :  { %v6563_v63 = vsel %vm1275_vm3, %v1773_v36, %v1769_v0  ;;  %v4715_v23 = vcombine.low %v960_v61, %v964_v35  ;;  %v980_v62 = vld [vmem:[%s7456_s1 + $0x6e0] sm:$0xff]  ;;  %v4726_v35 = vcombine.high %v969_v6, %v973_v60  ;;  %vm4259_vm2 = vcmask 261120  }
 0x15e   :  { %3263 = vmatpush1.bf16.msra.mxu0 %v4699_v26  ;;  %v1541_v18 = vrot.slane %v1174_v28, %v7482_v17  ;;  %v1546_v49 = vrot.slane %v1175_v25, %v7483_v19  ;;  %v754_v27 = vpack.c.bf16 %v685_v43, %v684_v50  ;;  %v296_v53 = vpop.xlane.xlu1 %295  ;;  %3345 = vmatpush1.bf16.msra.mxu1 %v4701_v9  ;;  %v977_v28 = vld [vmem:[%s7456_s1 + $0x6c8] sm:$0xff] }
 0x15f   :  { %3264 = vmatprep.subr.bf16.mxu0 %v4708_v24  ;;  %v605_v52 = vmul.f32 0.020408163, %v296_v53  ;;  %v293_v51 = vpop.xlane.xlu0 %292  ;;  %3346 = vmatprep.subr.bf16.mxu1 %v4710_v45  ;;  %v4717_v26 = vcombine.low %v961_v30, %v965_v14  ;;  %v4724_v9 = vcombine.high %v968_v58, %v972_v5  ;;  %v981_v25 = vld [vmem:[%s7456_s1 + $0x6e8] sm:$0xff]  ;;  %v4723_v30 = vcombine.low %v968_v58, %v972_v5  ;;  %v984_v53 = vld [vmem:[%s7456_s1 + $0x700] sm:$0xff] }
 0x160   :  { %v1542_v21 = vsel %vm1282_vm4, %v1541_v18, %v6451_v16  ;;  %v1238_v8 = vunpack.c.l.b16 %v754_v27  ;;  %v1239_v12 = vunpack.c.h.b16 %v754_v27  ;;  %v604_v59 = vmul.f32 0.020408163, %v293_v51  ;;  %v988_v58 = vld [vmem:[%s7456_s1 + $0x720] sm:$0xff] }
 0x161   :  { %v6583_v2 = vsel %vm1289_vm5, %v1546_v49, %v1542_v21  ;;  %v4725_v14 = vcombine.low %v969_v6, %v973_v60  ;;  %v4734_v27 = vcombine.high %v977_v28, %v981_v25  ;;  %v989_v21 = vld [vmem:[%s7456_s1 + $0x728] sm:$0xff] }
 0x162   :  { %3265 = vmatpush1.bf16.msra.mxu0 %v4707_v40  ;;  %v1857_v16 = vrot.slane %v1238_v8, %v7482_v17  ;;  %v1862_v24 = vrot.slane %v1239_v12, %v7483_v19  ;;  %v714_v33 = vpack.c.bf16 %v605_v52, %v604_v59  ;;  %v488_v36 = vpop.xlane.xlu1 %487  ;;  %3347 = vmatpush1.bf16.msra.mxu1 %v4709_v31 }
 0x163   :  { %3266 = vmatprep.subr.bf16.mxu0 %v4716_v4  ;;  %v669_v1 = vmul.f32 0.020408163, %v488_v36  ;;  %v485_v61 = vpop.xlane.xlu0 %484  ;;  %3348 = vmatprep.subr.bf16.mxu1 %v4718_v41  ;;  %v4732_v40 = vcombine.high %v976_v38, %v980_v62  ;;  %v985_v41 = vld [vmem:[%s7456_s1 + $0x708] sm:$0xff]  ;;  %v4731_v12 = vcombine.low %v976_v38, %v980_v62  ;;  %v4733_v59 = vcombine.low %v977_v28, %v981_v25 }
 0x164   :  { %v1858_v43 = vsel %vm1282_vm4, %v1857_v16, %v6508_v13  ;;  %v1158_v11 = vunpack.c.l.b16 %v714_v33  ;;  %v1159_v45 = vunpack.c.h.b16 %v714_v33  ;;  %v668_v0 = vmul.f32 0.020408163, %v485_v61  ;;  %v992_v16 = vld [vmem:[%s7456_s1 + $0x740] sm:$0xff]  ;;  %v997_v33 = vld [vmem:[%s7456_s1 + $0x768] sm:$0xff] }
 0x165   :  { %v6602_v50 = vsel %vm1289_vm5, %v1862_v24, %v1858_v43  ;;  %v996_v24 = vld [vmem:[%s7456_s1 + $0x760] sm:$0xff]  ;;  %v4739_v38 = vcombine.low %v984_v53, %v988_v58 }
 0x166   :  { %3267 = vmatpush1.bf16.msra.mxu0 %v4715_v23  ;;  %v1462_v13 = vrot.slane %v1158_v11, %v7482_v17  ;;  %v1467_v31 = vrot.slane %v1159_v45, %v7483_v19  ;;  %v746_v4 = vpack.c.bf16 %v669_v1, %v668_v0  ;;  %v6606_v18 = vpop.xlane.xlu1 %349  ;;  %3349 = vmatpush1.bf16.msra.mxu1 %v4717_v26  ;;  %v1000_v43 = vld [vmem:[%s7456_s1 + $0x780] sm:$0xff]  ;;  %v1001_v45 = vld [vmem:[%s7456_s1 + $0x788] sm:$0xff] }
 0x167   :  { %3268 = vmatprep.subr.bf16.mxu0 %v4724_v9  ;;  %v6608_v49 = vpop.xlane.xlu0 %346  ;;  %3350 = vmatprep.subr.bf16.mxu1 %v4726_v35  ;;  %v4740_v23 = vcombine.high %v984_v53, %v988_v58  ;;  %v4742_v9 = vcombine.high %v985_v41, %v989_v21  ;;  %v4741_v1 = vcombine.low %v985_v41, %v989_v21  ;;  %v1004_v11 = vld [vmem:[%s7456_s1 + $0x7a0] sm:$0xff]  ;;  %v1005_v0 = vld [vmem:[%s7456_s1 + $0x7a8] sm:$0xff] }
 0x168   :  { %v1463_v5 = vsel %vm1282_vm4, %v1462_v13, %v6539_v46  ;;  %v1222_v52 = vunpack.c.l.b16 %v746_v4  ;;  %v1223_v51 = vunpack.c.h.b16 %v746_v4  ;;  %v4748_v61 = vcombine.high %v992_v16, %v996_v24  ;;  %v1012_v4 = vld [vmem:[%s7456_s1 + $0x7e0] sm:$0xff]  ;;  %v1013_v53 = vld [vmem:[%s7456_s1 + $0x7e8] sm:$0xff] }
 0x169   :  { %v6625_v8 = vsel %vm1289_vm5, %v1467_v31, %v1463_v5  ;;  %v4747_v28 = vcombine.low %v992_v16, %v996_v24  ;;  %v4758_v13 = vcombine.high %v1001_v45, %v1005_v0  ;;  %v1008_v31 = vld [vmem:[%s7456_s1 + $0x7c0] sm:$0xff]  ;;  %v4755_v58 = vcombine.low %v1000_v43, %v1004_v11 }
 0x16a   :  { %3269 = vmatpush1.bf16.msra.mxu0 %v4723_v30  ;;  %v1778_v6 = vrot.slane %v1222_v52, %v7482_v17  ;;  %v1783_v46 = vrot.slane %v1223_v51, %v7483_v19  ;;  %v6629_v60 = vpop.xlane.xlu1 %541  ;;  %3351 = vmatpush1.bf16.msra.mxu1 %v4725_v14  ;;  %v993_v19 = vld [vmem:[%s7456_s1 + $0x748] sm:$0xff]  ;;  %v4756_v14 = vcombine.high %v1000_v43, %v1004_v11 }
 0x16b   :  { %3270 = vmatprep.subr.bf16.mxu0 %v4732_v40  ;;  %v6631_v26 = vpop.xlane.xlu0 %538  ;;  %3352 = vmatprep.subr.bf16.mxu1 %v4734_v27  ;;  %v4749_v30 = vcombine.low %v993_v19, %v997_v33  ;;  %v1009_v27 = vld [vmem:[%s7456_s1 + $0x7c8] sm:$0xff]  ;;  %v4757_v52 = vcombine.low %v1001_v45, %v1005_v0  ;;  %v4764_v51 = vcombine.high %v1008_v31, %v1012_v4 }
 0x16c   :  { %v1779_v17 = vsel %vm1282_vm4, %v1778_v6, %v6563_v63  ;;  %v4750_v63 = vcombine.high %v993_v19, %v997_v33  ;;  %v4766_v21 = vcombine.high %v1009_v27, %v1013_v53  ;;  %v4765_v6 = vcombine.low %v1009_v27, %v1013_v53 }
 0x16d   :  { %v6648_v36 = vsel %vm1289_vm5, %v1783_v46, %v1779_v17  ;;  %v4520_v46 = vcombine.high %v6353_v39, %v6358_v47  ;;  %v623_v33 = vmul.f32 0.020408163, %v6606_v18  ;;  %v790_v39 = vld [vmem:[%s7456_s1 + $0xf0] sm:$0xff]  ;;  %v787_v47 = vld [vmem:[%s7456_s1 + $0xd8] sm:$0xff] }
 0x16e   :  { %3271 = vmatpush1.bf16.msra.mxu0 %v4731_v12  ;;  %v302_v62 = vpop.xlane.xlu1 %301  ;;  %3353 = vmatpush1.bf16.msra.mxu1 %v4733_v59  ;;  %v4763_v12 = vcombine.low %v1008_v31, %v1012_v4 }
 0x16f   :  { %3272 = vmatprep.subr.bf16.mxu0 %v4740_v23  ;;  %v299_v35 = vpop.xlane.xlu0 %298  ;;  %3354 = vmatprep.subr.bf16.mxu1 %v4742_v9  ;;  %v4522_v9 = vcombine.high %v6368_v44, %v6373_v42  ;;  %v607_v11 = vmul.f32 0.020408163, %v302_v62 }
 0x170   :  { %v606_v45 = vmul.f32 0.020408163, %v299_v35 }
 0x172   :  { %3273 = vmatpush1.bf16.msra.mxu0 %v4739_v38  ;;  %v494_v25 = vpop.xlane.xlu1 %493  ;;  %3355 = vmatpush1.bf16.msra.mxu1 %v4741_v1  ;;  %v622_v38 = vmul.f32 0.020408163, %v6608_v49  ;;  %v715_v4 = vpack.c.bf16 %v607_v11, %v606_v45 }
 0x173   :  { %3274 = vmatprep.subr.bf16.mxu0 %v4748_v61  ;;  %v491_v40 = vpop.xlane.xlu0 %490  ;;  %3356 = vmatprep.subr.bf16.mxu1 %v4750_v63  ;;  %v687_v61 = vmul.f32 0.020408163, %v6629_v60  ;;  %v686_v63 = vmul.f32 0.020408163, %v6631_v26 }
 0x174   :  { %v723_v0 = vpack.c.bf16 %v623_v33, %v622_v38  ;;  %v1160_v60 = vunpack.c.l.b16 %v715_v4 }
 0x176   :  { %3275 = vmatpush1.bf16.msra.mxu0 %v4747_v28  ;;  %v356_v5 = vpop.xlane.xlu1 %355  ;;  %3357 = vmatpush1.bf16.msra.mxu1 %v4749_v30  ;;  %v755_v30 = vpack.c.bf16 %v687_v61, %v686_v63  ;;  %v1176_v18 = vunpack.c.l.b16 %v723_v0  ;;  %v1472_v61 = vrot.slane %v1160_v60, %v6087_v57 }
 0x177   :  { %3276 = vmatprep.subr.bf16.mxu0 %v4756_v14  ;;  %v353_v41 = vpop.xlane.xlu0 %352  ;;  %3358 = vmatprep.subr.bf16.mxu1 %v4758_v13  ;;  %v671_v14 = vmul.f32 0.020408163, %v494_v25  ;;  %v670_v13 = vmul.f32 0.020408163, %v491_v40  ;;  %v625_v27 = vmul.f32 0.020408163, %v356_v5 }
 0x178   :  { %v624_v53 = vmul.f32 0.020408163, %v353_v41  ;;  %v1240_v49 = vunpack.c.l.b16 %v755_v30  ;;  %v1551_v35 = vrot.slane %v1176_v18, %v6087_v57  ;;  %v1161_v41 = vunpack.c.h.b16 %v715_v4 }
 0x17a   :  { %3277 = vmatpush1.bf16.msra.mxu0 %v4755_v58  ;;  %v548_v59 = vpop.xlane.xlu1 %547  ;;  %3359 = vmatpush1.bf16.msra.mxu1 %v4757_v52  ;;  %v747_v52 = vpack.c.bf16 %v671_v14, %v670_v13  ;;  %v724_v26 = vpack.c.bf16 %v625_v27, %v624_v53  ;;  %v1867_v5 = vrot.slane %v1240_v49, %v6087_v57 }
 0x17b   :  { %3278 = vmatprep.subr.bf16.mxu0 %v4764_v51  ;;  %v545_v23 = vpop.xlane.xlu0 %544  ;;  %3360 = vmatprep.subr.bf16.mxu1 %v4766_v21  ;;  %v1177_v21 = vunpack.c.h.b16 %v723_v0  ;;  %v1552_v0 = vsel %vm1296_vm6, %v1551_v35, %v6583_v2  ;;  %v1477_v13 = vrot.slane %v1161_v41, %v6097_v3 }
 0x17c   :  { %v688_v62 = vmul.f32 0.020408163, %v545_v23  ;;  %v1225_v4 = vunpack.c.h.b16 %v747_v52  ;;  %v1179_v27 = vunpack.c.h.b16 %v724_v26 }
 0x17e   :  { %3279 = vmatpush1.bf16.msra.mxu0 %v4763_v12  ;;  %v308_v16 = vpop.xlane.xlu1 %307  ;;  %3361 = vmatpush1.bf16.msra.mxu1 %v4765_v6  ;;  %v689_v12 = vmul.f32 0.020408163, %v548_v59  ;;  %v1241_v6 = vunpack.c.h.b16 %v755_v30  ;;  %v1178_v59 = vunpack.c.l.b16 %v724_v26  ;;  %v1793_v26 = vrot.slane %v1225_v4, %v6097_v3 }
 0x17f   :  { %3371 = vmatprep.subr.bf16.mxu0 %v4520_v46  ;;  %v305_v24 = vpop.xlane.xlu0 %304  ;;  %3453 = vmatprep.subr.bf16.mxu1 %v4522_v9  ;;  %v609_v46 = vmul.f32 0.020408163, %v308_v16  ;;  %v1224_v9 = vunpack.c.l.b16 %v747_v52  ;;  %v1556_v16 = vrot.slane %v1177_v21, %v6097_v3 }
 0x180   :  { %v608_v25 = vmul.f32 0.020408163, %v305_v24  ;;  %v756_v23 = vpack.c.bf16 %v689_v12, %v688_v62  ;;  %v1872_v24 = vrot.slane %v1241_v6, %v6097_v3  ;;  %v1561_v18 = vrot.slane %v1178_v59, %v6102_v7 }
 0x181   :  { %v1557_v12 = vsel %vm1303_vm7, %v1556_v16, %v1552_v0 }
 0x182   :  { %v500_v17 = vpop.xlane.xlu1 %499  ;;  %v716_v30 = vpack.c.bf16 %v609_v46, %v608_v25  ;;  %v1242_v49 = vunpack.c.l.b16 %v756_v23  ;;  %v1566_v25 = vrot.slane %v1179_v27, %v6112_v48  ;;  %v1562_v41 = vsel %vm1310_vm8, %v1561_v18, %v1557_v12 }
 0x183   :  { %v497_v19 = vpop.xlane.xlu0 %496  ;;  %v673_v33 = vmul.f32 0.020408163, %v500_v17  ;;  %v1868_v17 = vsel %vm1296_vm6, %v1867_v5, %v6602_v50 }
 0x184   :  { %v672_v63 = vmul.f32 0.020408163, %v497_v19  ;;  %v1788_v19 = vrot.slane %v1224_v9, %v6087_v57  ;;  %v1162_v50 = vunpack.c.l.b16 %v716_v30  ;;  %v1873_v57 = vsel %vm1303_vm7, %v1872_v24, %v1868_v17 }
 0x186   :  { %v362_v1 = vpop.xlane.xlu1 %361  ;;  %v748_v2 = vpack.c.bf16 %v673_v33, %v672_v63  ;;  %v1482_v33 = vrot.slane %v1162_v50, %v6102_v7 }
 0x187   :  { %v359_v43 = vpop.xlane.xlu0 %358  ;;  %v627_v11 = vmul.f32 0.020408163, %v362_v1 }
 0x188   :  { %v626_v45 = vmul.f32 0.020408163, %v359_v43  ;;  %v1473_v43 = vsel %vm1296_vm6, %v1472_v61, %v6625_v8  ;;  %v1789_v8 = vsel %vm1296_vm6, %v1788_v19, %v6648_v36 }
 0x189   :  { %v1478_v6 = vsel %vm1303_vm7, %v1477_v13, %v1473_v43  ;;  %v1567_v13 = vsel %vm1317_vm9, %v1566_v25, %v1562_v41 }
 0x18a   :  { %v554_v28 = vpop.xlane.xlu1 %553  ;;  %v725_v53 = vpack.c.bf16 %v627_v11, %v626_v45  ;;  %v1227_v45 = vunpack.c.h.b16 %v748_v2  ;;  %v1483_v18 = vsel %vm1310_vm8, %v1482_v33, %v1478_v6 }
 0x18b   :  { %v551_v31 = vpop.xlane.xlu0 %550  ;;  %v691_v60 = vmul.f32 0.020408163, %v554_v28  ;;  %v1243_v28 = vunpack.c.h.b16 %v756_v23  ;;  %v1794_v23 = vsel %vm1303_vm7, %v1793_v26, %v1789_v8 }
 0x18c   :  { %v690_v21 = vmul.f32 0.020408163, %v551_v31  ;;  %v1226_v31 = vunpack.c.l.b16 %v748_v2  ;;  %v1180_v5 = vunpack.c.l.b16 %v725_v53  ;;  %v1181_v3 = vunpack.c.h.b16 %v725_v53 }
 0x18d   :  { %v1882_v24 = vrot.slane %v1243_v28, %v6112_v48 }
 0x18e   :  { %v314_v58 = vpop.xlane.xlu1 %313  ;;  %v757_v9 = vpack.c.bf16 %v691_v60, %v690_v21  ;;  %v1798_v17 = vrot.slane %v1226_v31, %v6102_v7 }
 0x18f   :  { %v311_v51 = vpop.xlane.xlu0 %310  ;;  %v611_v62 = vmul.f32 0.020408163, %v314_v58  ;;  %v1877_v58 = vrot.slane %v1242_v49, %v6102_v7  ;;  %v1803_v49 = vrot.slane %v1227_v45, %v6112_v48  ;;  %v1576_v7 = vrot.slane %v1181_v3, %v6123_v20 }
 0x190   :  { %v610_v35 = vmul.f32 0.020408163, %v311_v51  ;;  %v1163_v51 = vunpack.c.h.b16 %v716_v30  ;;  %v1571_v30 = vrot.slane %v1180_v5, %v6115_v10  ;;  %v1244_v19 = vunpack.c.l.b16 %v757_v9 }
 0x191   :  { %v1878_v4 = vsel %vm1310_vm8, %v1877_v58, %v1873_v57  ;;  %v1799_v50 = vsel %vm1310_vm8, %v1798_v17, %v1794_v23 }
 0x192   :  { %v6683_v40 = vpop.xlane.xlu1 %505  ;;  %v717_v61 = vpack.c.bf16 %v611_v62, %v610_v35  ;;  %v1883_v12 = vsel %vm1317_vm9, %v1882_v24, %v1878_v4  ;;  %v1572_v62 = vsel %vm1324_vm10, %v1571_v30, %v1567_v13  ;;  %v1245_v35 = vunpack.c.h.b16 %v757_v9 }
 0x193   :  { %v503_v38 = vpop.xlane.xlu0 %502  ;;  %v675_v43 = vmul.f32 0.020408163, %v6683_v40  ;;  %v1887_v40 = vrot.slane %v1244_v19, %v6115_v10  ;;  %v1804_v25 = vsel %vm1317_vm9, %v1803_v49, %v1799_v50  ;;  %v1577_v28 = vsel %vm1331_vm11, %v1576_v7, %v1572_v62 }
 0x194   :  { %v674_v27 = vmul.f32 0.020408163, %v503_v38  ;;  %v1165_v38 = vunpack.c.h.b16 %v717_v61  ;;  %v1892_v58 = vrot.slane %v1245_v35, %v6123_v20 }
 0x196   :  { %v368_v14 = vpop.xlane.xlu1 %367  ;;  %v749_v8 = vpack.c.bf16 %v675_v43, %v674_v27 }
 0x197   :  { %v365_v1 = vpop.xlane.xlu0 %364  ;;  %v629_v63 = vmul.f32 0.020408163, %v368_v14  ;;  %v1487_v14 = vrot.slane %v1163_v51, %v6112_v48 }
 0x198   :  { %v628_v11 = vmul.f32 0.020408163, %v365_v1  ;;  %v1164_v1 = vunpack.c.l.b16 %v717_v61  ;;  %v1888_v61 = vsel %vm1324_vm10, %v1887_v40, %v1883_v12  ;;  %v1228_v3 = vunpack.c.l.b16 %v749_v8 }
 0x199   :  { %v1488_v6 = vsel %vm1317_vm9, %v1487_v14, %v1483_v18  ;;  %v1229_v23 = vunpack.c.h.b16 %v749_v8  ;;  %v1893_v4 = vsel %vm1331_vm11, %v1892_v58, %v1888_v61 }
 0x19a   :  { %v560_v52 = vpop.xlane.xlu1 %559  ;;  %v726_v2 = vpack.c.bf16 %v629_v63, %v628_v11  ;;  %v1492_v48 = vrot.slane %v1164_v1, %v6115_v10  ;;  %v1497_v63 = vrot.slane %v1165_v38, %v6123_v20  ;;  %v1808_v18 = vrot.slane %v1228_v3, %v6115_v10 }
 0x19b   :  { %v557_v46 = vpop.xlane.xlu0 %556  ;;  %v693_v59 = vmul.f32 0.020408163, %v560_v52  ;;  %v1813_v12 = vrot.slane %v1229_v23, %v6123_v20 }
 0x19c   :  { %v692_v0 = vmul.f32 0.020408163, %v557_v46  ;;  %v1182_v26 = vunpack.c.l.b16 %v726_v2  ;;  %v1183_v11 = vunpack.c.h.b16 %v726_v2  ;;  %v1493_v45 = vsel %vm1324_vm10, %v1492_v48, %v1488_v6 }
 0x19d   :  { %v1498_v43 = vsel %vm1331_vm11, %v1497_v63, %v1493_v45 }
 0x19e   :  { %v320_v36 = vpop.xlane.xlu1 %319  ;;  %v758_v60 = vpack.c.bf16 %v693_v59, %v692_v0  ;;  %v1581_v59 = vrot.slane %v1182_v26, %v6156_v56  ;;  %v1586_v27 = vrot.slane %v1183_v11, %v6159_v37 }
 0x19f   :  { %v317_v16 = vpop.xlane.xlu0 %316  ;;  %v613_v52 = vmul.f32 0.020408163, %v320_v36 }
 0x1a0   :  { %v612_v57 = vmul.f32 0.020408163, %v317_v16  ;;  %v1246_v31 = vunpack.c.l.b16 %v758_v60  ;;  %v1247_v24 = vunpack.c.h.b16 %v758_v60  ;;  %v1582_v49 = vsel %vm1338_vm12, %v1581_v59, %v1577_v28 }
 0x1a1   :  { %v1587_v10 = vsel %vm1345_vm13, %v1586_v27, %v1582_v49 }
 0x1a2   :  { %v512_v53 = vpop.xlane.xlu1 %511  ;;  %v718_v36 = vpack.c.bf16 %v613_v52, %v612_v57  ;;  %v1897_v17 = vrot.slane %v1246_v31, %v6156_v56  ;;  %v1902_v62 = vrot.slane %v1247_v24, %v6159_v37 }
 0x1a3   :  { %v509_v21 = vpop.xlane.xlu0 %508  ;;  %v677_v51 = vmul.f32 0.020408163, %v512_v53 }
 0x1a4   :  { %v676_v9 = vmul.f32 0.020408163, %v509_v21  ;;  %v1166_v2 = vunpack.c.l.b16 %v718_v36  ;;  %v1898_v50 = vsel %vm1338_vm12, %v1897_v17, %v1893_v4  ;;  %v1167_v48 = vunpack.c.h.b16 %v718_v36 }
 0x1a5   :  { %v1903_v58 = vsel %vm1345_vm13, %v1902_v62, %v1898_v50  ;;  %v778_v50 = vld [vmem:[%s7456_s1 + $0x90] sm:$0xff] }
 0x1a6   :  { %v374_v46 = vpop.xlane.xlu1 %373  ;;  %v750_v14 = vpack.c.bf16 %v677_v51, %v676_v9  ;;  %v1502_v8 = vrot.slane %v1166_v2, %v6156_v56  ;;  %v1507_v45 = vrot.slane %v1167_v48, %v6159_v37 }
 0x1a7   :  { %v631_v5 = vmul.f32 0.020408163, %v374_v46  ;;  %v371_v41 = vpop.xlane.xlu0 %370 }
 0x1a8   :  { %v630_v33 = vmul.f32 0.020408163, %v371_v41  ;;  %v1230_v38 = vunpack.c.l.b16 %v750_v14  ;;  %v1809_v41 = vsel %vm1324_vm10, %v1808_v18, %v1804_v25  ;;  %v1231_v51 = vunpack.c.h.b16 %v750_v14  ;;  %v770_v18 = vld [vmem:[%s7456_s1 + $0x50] sm:$0xff] }
 0x1a9   :  { %v1503_v25 = vsel %vm1338_vm12, %v1502_v8, %v1498_v43  ;;  %v786_v8 = vld [vmem:[%s7456_s1 + $0xd0] sm:$0xff] }
 0x1aa   :  { %v727_v0 = vpack.c.bf16 %v631_v5, %v630_v33  ;;  %v566_v16 = vpop.xlane.xlu1 %565  ;;  %v1818_v61 = vrot.slane %v1230_v38, %v6156_v56  ;;  %v1814_v56 = vsel %vm1331_vm11, %v1813_v12, %v1809_v41  ;;  %v1823_v17 = vrot.slane %v1231_v51, %v6159_v37  ;;  %v779_v38 = vld [vmem:[%s7456_s1 + $0x98] sm:$0xff]  ;;  %v802_v51 = vld [vmem:[%s7456_s1 + $0x150] sm:$0xff] }
 0x1ab   :  { %v695_v30 = vmul.f32 0.020408163, %v566_v16  ;;  %v563_v13 = vpop.xlane.xlu0 %562 }
 0x1ac   :  { %v1184_v19 = vunpack.c.l.b16 %v727_v0  ;;  %v694_v1 = vmul.f32 0.020408163, %v563_v13  ;;  %v1185_v53 = vunpack.c.h.b16 %v727_v0  ;;  %v1819_v13 = vsel %vm1338_vm12, %v1818_v61, %v1814_v56  ;;  %v807_v61 = vld [vmem:[%s7456_s1 + $0x178] sm:$0xff] }
 0x1ad   :  { %v1824_v2 = vsel %vm1345_vm13, %v1823_v17, %v1819_v13  ;;  %v818_v17 = vld [vmem:[%s7456_s1 + $0x1d0] sm:$0xff] }
 0x1ae   :  { %v1591_v7 = vrot.slane %v1184_v19, %v6219_v54  ;;  %v759_v60 = vpack.c.bf16 %v695_v30, %v694_v1  ;;  %v326_v21 = vpop.xlane.xlu1 %325  ;;  %v1596_v26 = vrot.slane %v1185_v53, %v6242_v22  ;;  %v1508_v19 = vsel %vm1345_vm13, %v1507_v45, %v1503_v25  ;;  %v815_v25 = vld [vmem:[%s7456_s1 + $0x1b8] sm:$0xff]  ;;  %v822_v13 = vld [vmem:[%s7456_s1 + $0x1f0] sm:$0xff] }
 0x1af   :  { %v615_v35 = vmul.f32 0.020408163, %v326_v21  ;;  %v323_v40 = vpop.xlane.xlu0 %322 }
 0x1b0   :  { %v1248_v52 = vunpack.c.l.b16 %v759_v60  ;;  %v1249_v57 = vunpack.c.h.b16 %v759_v60  ;;  %v614_v6 = vmul.f32 0.020408163, %v323_v40  ;;  %v1592_v46 = vsel %vm1352_vm14, %v1591_v7, %v1587_v10  ;;  %v774_v60 = vld [vmem:[%s7456_s1 + $0x70] sm:$0xff] }
 0x1b1   :  { %v1597_v59 = vsel %vm1359_vm15, %v1596_v26, %v1592_v46  ;;  %v4528_v62 = vcombine.high %v770_v18, %v774_v60  ;;  %v782_v40 = vld [vmem:[%s7456_s1 + $0xb0] sm:$0xff] }
 0x1b2   :  { %v1907_v20 = vrot.slane %v1248_v52, %v6219_v54  ;;  %v1912_v28 = vrot.slane %v1249_v57, %v6242_v22  ;;  %v719_v31 = vpack.c.bf16 %v615_v35, %v614_v6  ;;  %v518_v5 = vpop.xlane.xlu1 %517  ;;  %v783_v52 = vld [vmem:[%s7456_s1 + $0xb8] sm:$0xff]  ;;  %v4527_v57 = vcombine.low %v770_v18, %v774_v60  ;;  %v794_v26 = vld [vmem:[%s7456_s1 + $0x110] sm:$0xff] }
 0x1b3   :  { %v679_v9 = vmul.f32 0.020408163, %v518_v5  ;;  %v515_v33 = vpop.xlane.xlu0 %514  ;;  %v4536_v10 = vcombine.high %v778_v50, %v782_v40  ;;  %v4538_v48 = vcombine.high %v779_v38, %v783_v52  ;;  %v4535_v44 = vcombine.low %v778_v50, %v782_v40  ;;  %v798_v46 = vld [vmem:[%s7456_s1 + $0x130] sm:$0xff]  ;;  %v831_v18 = vld [vmem:[%s7456_s1 + $0x238] sm:$0xff] }
 0x1b4   :  { %v1908_v63 = vsel %vm1352_vm14, %v1907_v20, %v1903_v58  ;;  %v1168_v11 = vunpack.c.l.b16 %v719_v31  ;;  %v678_v36 = vmul.f32 0.020408163, %v515_v33  ;;  %v1169_v3 = vunpack.c.h.b16 %v719_v31  ;;  %v795_v20 = vld [vmem:[%s7456_s1 + $0x118] sm:$0xff] }
 0x1b5   :  { %v1913_v0 = vsel %vm1359_vm15, %v1912_v28, %v1908_v63  ;;  %v4537_v42 = vcombine.low %v779_v38, %v783_v52  ;;  %v799_v28 = vld [vmem:[%s7456_s1 + $0x138] sm:$0xff]  ;;  %v4543_v31 = vcombine.low %v786_v8, %v790_v39  ;;  %v4552_v41 = vcombine.high %v794_v26, %v798_v46 }
 0x1b6   :  { %v1512_v16 = vrot.slane %v1168_v11, %v6219_v54  ;;  %v751_v23 = vpack.c.bf16 %v679_v9, %v678_v36  ;;  %v1918_v24 = vsel %vm1914_vm0, %v1913_v0, %v1597_v59  ;;  %v1517_v1 = vrot.slane %v1169_v3, %v6242_v22  ;;  %v806_v9 = vld [vmem:[%s7456_s1 + $0x170] sm:$0xff]  ;;  %v803_v33 = vld [vmem:[%s7456_s1 + $0x158] sm:$0xff] }
 0x1b7   :  { %v6760_v30 = vpack.c.b16 %v1918_v24, %v1918_v24  ;;  %v4554_v58 = vcombine.high %v795_v20, %v799_v28  ;;  %v4551_v63 = vcombine.low %v794_v26, %v798_v46  ;;  %v4553_v11 = vcombine.low %v795_v20, %v799_v28  ;;  %v810_v3 = vld [vmem:[%s7456_s1 + $0x190] sm:$0xff]  ;;  %v811_v0 = vld [vmem:[%s7456_s1 + $0x198] sm:$0xff] }
 0x1b8   :  { %v1232_v4 = vunpack.c.l.b16 %v751_v23  ;;  %v1233_v14 = vunpack.c.h.b16 %v751_v23  ;;  %v1513_v43 = vsel %vm1352_vm14, %v1512_v16, %v1508_v19  ;;  %v4560_v36 = vcombine.high %v802_v51, %v806_v9  ;;  %v814_v59 = vld [vmem:[%s7456_s1 + $0x1b0] sm:$0xff]  ;;  %v835_v50 = vld [vmem:[%s7456_s1 + $0x258] sm:$0xff] }
 0x1b9   :  { %3280 = vmatprep.mubr.bf16.mxu0 %v6760_v30  ;;  %3362 = vmatprep.mubr.bf16.mxu1 %v6760_v30  ;;  %v1518_v49 = vsel %vm1359_vm15, %v1517_v1, %v1513_v43  ;;  %v4562_v45 = vcombine.high %v803_v33, %v807_v61  ;;  %v4559_v16 = vcombine.low %v802_v51, %v806_v9 }
 0x1ba   :  { %v1828_v27 = vrot.slane %v1232_v4, %v6219_v54  ;;  %v1833_v37 = vrot.slane %v1233_v14, %v6242_v22  ;;  %v771_v54 = vld [vmem:[%s7456_s1 + $0x58] sm:$0xff]  ;;  %v4561_v23 = vcombine.low %v803_v33, %v807_v61  ;;  %v4568_v24 = vcombine.high %v810_v3, %v814_v59 }
 0x1bb   :  { %v775_v22 = vld [vmem:[%s7456_s1 + $0x78] sm:$0xff]  ;;  %v4570_v56 = vcombine.high %v811_v0, %v815_v25  ;;  %v4567_v19 = vcombine.low %v810_v3, %v814_v59  ;;  %v4569_v1 = vcombine.low %v811_v0, %v815_v25  ;;  %v4576_v43 = vcombine.high %v818_v17, %v822_v13 }
 0x1bc   :  { %v1829_v53 = vsel %vm1352_vm14, %v1828_v27, %v1824_v2  ;;  %v4530_v35 = vcombine.high %v771_v54, %v775_v22  ;;  %v4529_v6 = vcombine.low %v771_v54, %v775_v22  ;;  %v819_v4 = vld [vmem:[%s7456_s1 + $0x1d8] sm:$0xff]  ;;  %v830_v2 = vld [vmem:[%s7456_s1 + $0x230] sm:$0xff] }
 0x1bd   :  { %v1834_v7 = vsel %vm1359_vm15, %v1833_v37, %v1829_v53  ;;  %v823_v14 = vld [vmem:[%s7456_s1 + $0x1f8] sm:$0xff]  ;;  %v826_v37 = vld [vmem:[%s7456_s1 + $0x210] sm:$0xff] }
 0x1be   :  { %v1917_v21 = vsel %vm1914_vm0, %v1834_v7, %v1518_v49  ;;  %v4578_v27 = vcombine.high %v819_v4, %v823_v14  ;;  %v827_v53 = vld [vmem:[%s7456_s1 + $0x218] sm:$0xff]  ;;  %v4575_v49 = vcombine.low %v818_v17, %v822_v13  ;;  %v4577_v7 = vcombine.low %v819_v4, %v823_v14  ;;  %v834_v22 = vld [vmem:[%s7456_s1 + $0x250] sm:$0xff] }
 0x1bf   :  { %v6787_v12 = vpack.c.b16 %v1917_v21, %v1917_v21  ;;  %v4584_v60 = vcombine.high %v826_v37, %v830_v2  ;;  %v4586_v54 = vcombine.high %v827_v53, %v831_v18  ;;  %v838_v21 = vld [vmem:[%s7456_s1 + $0x270] sm:$0xff]  ;;  %v4585_v40 = vcombine.low %v827_v53, %v831_v18 }
 0x1c0   :  { %v4592_v38 = vcombine.high %v834_v22, %v838_v21 }
 0x1c1   :  { %3281 = vmatmul.mubr.bf16.vlgmr.msra.gmra.mrb[0].mxu0 %v6787_v12  ;;  %3363 = vmatmul.mubr.bf16.vlgmr.msra.gmra.mrb[0].mxu1 %v6787_v12 }
 0x1c2   :  { %3372 = vmatpush1.bf16.msra.mxu0 %v4519_v34  ;;  %3454 = vmatpush1.bf16.msra.mxu1 %v4521_v32  ;;  %v4544_v34 = vcombine.high %v786_v8, %v790_v39  ;;  %v4591_v8 = vcombine.low %v834_v22, %v838_v21 }
 0x1c3   :  { %3403 = vmatprep.mubr.bf16.mxu0 %v6325_v55  ;;  %3485 = vmatprep.mubr.bf16.mxu1 %v6325_v55  ;;  %v791_v55 = vld [vmem:[%s7456_s1 + $0xf8] sm:$0xff] }
 0x1c4   :  { %3373 = vmatprep.subr.bf16.mxu0 %v4528_v62  ;;  %3455 = vmatprep.subr.bf16.mxu1 %v4530_v35  ;;  %v4546_v32 = vcombine.high %v787_v47, %v791_v55  ;;  %v4545_v5 = vcombine.low %v787_v47, %v791_v55  ;;  %v839_v62 = vld [vmem:[%s7456_s1 + $0x278] sm:$0xff]  ;;  %v4583_v35 = vcombine.low %v826_v37, %v830_v2 }
 0x1c5   :  { %v4594_v52 = vcombine.high %v835_v50, %v839_v62  ;;  %v4593_v39 = vcombine.low %v835_v50, %v839_v62 }
 0x1c6   :  { %3374 = vmatpush1.bf16.msra.mxu0 %v4527_v57  ;;  %3456 = vmatpush1.bf16.msra.mxu1 %v4529_v6  ;;  %v842_v57 = vld [vmem:[%s7456_s1 + $0x290] sm:$0xff] }
 0x1c7   :  { %3375 = vmatprep.subr.bf16.mxu0 %v4536_v10  ;;  %3457 = vmatprep.subr.bf16.mxu1 %v4538_v48  ;;  %v846_v6 = vld [vmem:[%s7456_s1 + $0x2b0] sm:$0xff]  ;;  %v843_v10 = vld [vmem:[%s7456_s1 + $0x298] sm:$0xff] }
 0x1c8   :  { %v847_v48 = vld [vmem:[%s7456_s1 + $0x2b8] sm:$0xff]  ;;  %v4600_v47 = vcombine.high %v842_v57, %v846_v6  ;;  %v4599_v26 = vcombine.low %v842_v57, %v846_v6 }
 0x1c9   :  { %v4602_v55 = vcombine.high %v843_v10, %v847_v48  ;;  %v4601_v46 = vcombine.low %v843_v10, %v847_v48 }
 0x1ca   :  { %3376 = vmatpush1.bf16.msra.mxu0 %v4535_v44  ;;  %3458 = vmatpush1.bf16.msra.mxu1 %v4537_v42  ;;  %v850_v44 = vld [vmem:[%s7456_s1 + $0x2d0] sm:$0xff] }
 0x1cb   :  { %3377 = vmatprep.subr.bf16.mxu0 %v4544_v34  ;;  %3459 = vmatprep.subr.bf16.mxu1 %v4546_v32  ;;  %v854_v42 = vld [vmem:[%s7456_s1 + $0x2f0] sm:$0xff]  ;;  %v851_v34 = vld [vmem:[%s7456_s1 + $0x2d8] sm:$0xff] }
 0x1cc   :  { %v855_v32 = vld [vmem:[%s7456_s1 + $0x2f8] sm:$0xff]  ;;  %v4608_v20 = vcombine.high %v850_v44, %v854_v42  ;;  %v4607_v51 = vcombine.low %v850_v44, %v854_v42 }
 0x1cd   :  { %v4610_v28 = vcombine.high %v851_v34, %v855_v32  ;;  %v4609_v9 = vcombine.low %v851_v34, %v855_v32  ;;  %v914_v32 = vld [vmem:[%s7456_s1 + $0x4d0] sm:$0xff] }
 0x1ce   :  { %3378 = vmatpush1.bf16.msra.mxu0 %v4543_v31  ;;  %3460 = vmatpush1.bf16.msra.mxu1 %v4545_v5  ;;  %v858_v31 = vld [vmem:[%s7456_s1 + $0x310] sm:$0xff] }
 0x1cf   :  { %3379 = vmatprep.subr.bf16.mxu0 %v4552_v41  ;;  %3461 = vmatprep.subr.bf16.mxu1 %v4554_v58  ;;  %v862_v5 = vld [vmem:[%s7456_s1 + $0x330] sm:$0xff]  ;;  %v859_v41 = vld [vmem:[%s7456_s1 + $0x318] sm:$0xff] }
 0x1d0   :  { %v863_v58 = vld [vmem:[%s7456_s1 + $0x338] sm:$0xff]  ;;  %v4616_v33 = vcombine.high %v858_v31, %v862_v5  ;;  %v4615_v3 = vcombine.low %v858_v31, %v862_v5 }
 0x1d1   :  { %v4618_v61 = vcombine.high %v859_v41, %v863_v58  ;;  %v4617_v59 = vcombine.low %v859_v41, %v863_v58  ;;  %v922_v41 = vld [vmem:[%s7456_s1 + $0x510] sm:$0xff] }
 0x1d2   :  { %3380 = vmatpush1.bf16.msra.mxu0 %v4551_v63  ;;  %3462 = vmatpush1.bf16.msra.mxu1 %v4553_v11  ;;  %v866_v63 = vld [vmem:[%s7456_s1 + $0x350] sm:$0xff] }
 0x1d3   :  { %3381 = vmatprep.subr.bf16.mxu0 %v4560_v36  ;;  %3463 = vmatprep.subr.bf16.mxu1 %v4562_v45  ;;  %v870_v11 = vld [vmem:[%s7456_s1 + $0x370] sm:$0xff]  ;;  %v867_v36 = vld [vmem:[%s7456_s1 + $0x358] sm:$0xff] }
 0x1d4   :  { %v871_v45 = vld [vmem:[%s7456_s1 + $0x378] sm:$0xff]  ;;  %v4624_v0 = vcombine.high %v866_v63, %v870_v11  ;;  %v4623_v17 = vcombine.low %v866_v63, %v870_v11  ;;  %v926_v58 = vld [vmem:[%s7456_s1 + $0x530] sm:$0xff] }
 0x1d5   :  { %v4626_v25 = vcombine.high %v867_v36, %v871_v45  ;;  %v4625_v13 = vcombine.low %v867_v36, %v871_v45  ;;  %v4680_v63 = vcombine.high %v922_v41, %v926_v58  ;;  %v930_v36 = vld [vmem:[%s7456_s1 + $0x550] sm:$0xff] }
 0x1d6   :  { %3382 = vmatpush1.bf16.msra.mxu0 %v4559_v16  ;;  %3464 = vmatpush1.bf16.msra.mxu1 %v4561_v23  ;;  %v874_v16 = vld [vmem:[%s7456_s1 + $0x390] sm:$0xff] }
 0x1d7   :  { %3383 = vmatprep.subr.bf16.mxu0 %v4568_v24  ;;  %3465 = vmatprep.subr.bf16.mxu1 %v4570_v56  ;;  %v878_v23 = vld [vmem:[%s7456_s1 + $0x3b0] sm:$0xff]  ;;  %v875_v24 = vld [vmem:[%s7456_s1 + $0x398] sm:$0xff] }
 0x1d8   :  { %v879_v56 = vld [vmem:[%s7456_s1 + $0x3b8] sm:$0xff]  ;;  %v4632_v4 = vcombine.high %v874_v16, %v878_v23  ;;  %v4631_v37 = vcombine.low %v874_v16, %v878_v23  ;;  %v934_v45 = vld [vmem:[%s7456_s1 + $0x570] sm:$0xff] }
 0x1d9   :  { %v4634_v14 = vcombine.high %v875_v24, %v879_v56  ;;  %v4633_v2 = vcombine.low %v875_v24, %v879_v56  ;;  %v4688_v16 = vcombine.high %v930_v36, %v934_v45  ;;  %v938_v24 = vld [vmem:[%s7456_s1 + $0x590] sm:$0xff] }
 0x1da   :  { %3384 = vmatpush1.bf16.msra.mxu0 %v4567_v19  ;;  %3466 = vmatpush1.bf16.msra.mxu1 %v4569_v1  ;;  %v882_v19 = vld [vmem:[%s7456_s1 + $0x3d0] sm:$0xff] }
 0x1db   :  { %3385 = vmatprep.subr.bf16.mxu0 %v4576_v43  ;;  %3467 = vmatprep.subr.bf16.mxu1 %v4578_v27  ;;  %v886_v1 = vld [vmem:[%s7456_s1 + $0x3f0] sm:$0xff]  ;;  %v883_v43 = vld [vmem:[%s7456_s1 + $0x3d8] sm:$0xff] }
 0x1dc   :  { %v887_v27 = vld [vmem:[%s7456_s1 + $0x3f8] sm:$0xff]  ;;  %v4640_v53 = vcombine.high %v882_v19, %v886_v1  ;;  %v4639_v22 = vcombine.low %v882_v19, %v886_v1  ;;  %v942_v56 = vld [vmem:[%s7456_s1 + $0x5b0] sm:$0xff] }
 0x1dd   :  { %v4642_v18 = vcombine.high %v883_v43, %v887_v27  ;;  %v4641_v21 = vcombine.low %v883_v43, %v887_v27  ;;  %v4696_v19 = vcombine.high %v938_v24, %v942_v56  ;;  %v946_v43 = vld [vmem:[%s7456_s1 + $0x5d0] sm:$0xff] }
 0x1de   :  { %3386 = vmatpush1.bf16.msra.mxu0 %v4575_v49  ;;  %3468 = vmatpush1.bf16.msra.mxu1 %v4577_v7  ;;  %v890_v49 = vld [vmem:[%s7456_s1 + $0x410] sm:$0xff] }
 0x1df   :  { %3387 = vmatprep.subr.bf16.mxu0 %v4584_v60  ;;  %3469 = vmatprep.subr.bf16.mxu1 %v4586_v54  ;;  %v894_v7 = vld [vmem:[%s7456_s1 + $0x430] sm:$0xff]  ;;  %v891_v60 = vld [vmem:[%s7456_s1 + $0x418] sm:$0xff] }
 0x1e0   :  { %v895_v54 = vld [vmem:[%s7456_s1 + $0x438] sm:$0xff]  ;;  %v4648_v50 = vcombine.high %v890_v49, %v894_v7  ;;  %v4647_v57 = vcombine.low %v890_v49, %v894_v7  ;;  %v950_v27 = vld [vmem:[%s7456_s1 + $0x5f0] sm:$0xff] }
 0x1e1   :  { %v4650_v62 = vcombine.high %v891_v60, %v895_v54  ;;  %v4649_v6 = vcombine.low %v891_v60, %v895_v54  ;;  %v4704_v49 = vcombine.high %v946_v43, %v950_v27  ;;  %v954_v60 = vld [vmem:[%s7456_s1 + $0x610] sm:$0xff] }
 0x1e2   :  { %3388 = vmatpush1.bf16.msra.mxu0 %v4583_v35  ;;  %3470 = vmatpush1.bf16.msra.mxu1 %v4585_v40  ;;  %v898_v35 = vld [vmem:[%s7456_s1 + $0x450] sm:$0xff] }
 0x1e3   :  { %3389 = vmatprep.subr.bf16.mxu0 %v4592_v38  ;;  %3471 = vmatprep.subr.bf16.mxu1 %v4594_v52  ;;  %v902_v40 = vld [vmem:[%s7456_s1 + $0x470] sm:$0xff]  ;;  %v899_v38 = vld [vmem:[%s7456_s1 + $0x458] sm:$0xff] }
 0x1e4   :  { %v903_v52 = vld [vmem:[%s7456_s1 + $0x478] sm:$0xff]  ;;  %v4656_v10 = vcombine.high %v898_v35, %v902_v40  ;;  %v4655_v44 = vcombine.low %v898_v35, %v902_v40  ;;  %v958_v54 = vld [vmem:[%s7456_s1 + $0x630] sm:$0xff] }
 0x1e5   :  { %v4658_v48 = vcombine.high %v899_v38, %v903_v52  ;;  %v4657_v42 = vcombine.low %v899_v38, %v903_v52  ;;  %v4712_v35 = vcombine.high %v954_v60, %v958_v54  ;;  %v962_v38 = vld [vmem:[%s7456_s1 + $0x650] sm:$0xff] }
 0x1e6   :  { %3390 = vmatpush1.bf16.msra.mxu0 %v4591_v8  ;;  %3472 = vmatpush1.bf16.msra.mxu1 %v4593_v39  ;;  %v906_v8 = vld [vmem:[%s7456_s1 + $0x490] sm:$0xff] }
 0x1e7   :  { %3391 = vmatprep.subr.bf16.mxu0 %v4600_v47  ;;  %3473 = vmatprep.subr.bf16.mxu1 %v4602_v55  ;;  %v910_v39 = vld [vmem:[%s7456_s1 + $0x4b0] sm:$0xff]  ;;  %v907_v47 = vld [vmem:[%s7456_s1 + $0x498] sm:$0xff] }
 0x1e8   :  { %v911_v55 = vld [vmem:[%s7456_s1 + $0x4b8] sm:$0xff]  ;;  %v4664_v34 = vcombine.high %v906_v8, %v910_v39  ;;  %v966_v52 = vld [vmem:[%s7456_s1 + $0x670] sm:$0xff] }
 0x1ea   :  { %3392 = vmatpush1.bf16.msra.mxu0 %v4599_v26  ;;  %3474 = vmatpush1.bf16.msra.mxu1 %v4601_v46  ;;  %v918_v26 = vld [vmem:[%s7456_s1 + $0x4f0] sm:$0xff]  ;;  %v915_v46 = vld [vmem:[%s7456_s1 + $0x4d8] sm:$0xff] }
 0x1eb   :  { %3393 = vmatprep.subr.bf16.mxu0 %v4608_v20  ;;  %3475 = vmatprep.subr.bf16.mxu1 %v4610_v28  ;;  %v4663_v20 = vcombine.low %v906_v8, %v910_v39  ;;  %v4665_v28 = vcombine.low %v907_v47, %v911_v55  ;;  %v4672_v31 = vcombine.high %v914_v32, %v918_v26 }
 0x1ec   :  { %v4720_v8 = vcombine.high %v962_v38, %v966_v52 }
 0x1ee   :  { %3394 = vmatpush1.bf16.msra.mxu0 %v4607_v51  ;;  %3476 = vmatpush1.bf16.msra.mxu1 %v4609_v9  ;;  %v923_v51 = vld [vmem:[%s7456_s1 + $0x518] sm:$0xff] }
 0x1ef   :  { %3395 = vmatprep.subr.bf16.mxu0 %v4616_v33  ;;  %3477 = vmatprep.subr.bf16.mxu1 %v4618_v61  ;;  %v927_v9 = vld [vmem:[%s7456_s1 + $0x538] sm:$0xff]  ;;  %v4671_v33 = vcombine.low %v914_v32, %v918_v26 }
 0x1f0   :  { %v4682_v11 = vcombine.high %v923_v51, %v927_v9 }
 0x1f2   :  { %3396 = vmatpush1.bf16.msra.mxu0 %v4615_v3  ;;  %3478 = vmatpush1.bf16.msra.mxu1 %v4617_v59  ;;  %v931_v3 = vld [vmem:[%s7456_s1 + $0x558] sm:$0xff] }
 0x1f3   :  { %3397 = vmatprep.subr.bf16.mxu0 %v4624_v0  ;;  %3479 = vmatprep.subr.bf16.mxu1 %v4626_v25  ;;  %v935_v59 = vld [vmem:[%s7456_s1 + $0x578] sm:$0xff]  ;;  %v4679_v0 = vcombine.low %v922_v41, %v926_v58  ;;  %v4681_v25 = vcombine.low %v923_v51, %v927_v9  ;;  %v986_v51 = vld [vmem:[%s7456_s1 + $0x710] sm:$0xff] }
 0x1f4   :  { %v4690_v23 = vcombine.high %v931_v3, %v935_v59  ;;  %v990_v9 = vld [vmem:[%s7456_s1 + $0x730] sm:$0xff] }
 0x1f6   :  { %3398 = vmatpush1.bf16.msra.mxu0 %v4623_v17  ;;  %3480 = vmatpush1.bf16.msra.mxu1 %v4625_v13  ;;  %v939_v17 = vld [vmem:[%s7456_s1 + $0x598] sm:$0xff] }
 0x1f7   :  { %3399 = vmatprep.subr.bf16.mxu0 %v4632_v4  ;;  %3481 = vmatprep.subr.bf16.mxu1 %v4634_v14  ;;  %v943_v13 = vld [vmem:[%s7456_s1 + $0x5b8] sm:$0xff]  ;;  %v4687_v4 = vcombine.low %v930_v36, %v934_v45  ;;  %v4689_v14 = vcombine.low %v931_v3, %v935_v59  ;;  %v4744_v36 = vcombine.high %v986_v51, %v990_v9  ;;  %v994_v3 = vld [vmem:[%s7456_s1 + $0x750] sm:$0xff] }
 0x1f8   :  { %v4698_v1 = vcombine.high %v939_v17, %v943_v13  ;;  %v998_v59 = vld [vmem:[%s7456_s1 + $0x770] sm:$0xff] }
 0x1fa   :  { %3400 = vmatpush1.bf16.msra.mxu0 %v4631_v37  ;;  %3482 = vmatpush1.bf16.msra.mxu1 %v4633_v2  ;;  %v947_v37 = vld [vmem:[%s7456_s1 + $0x5d8] sm:$0xff] }
 0x1fb   :  { %3401 = vmatprep.subr.bf16.mxu0 %v4640_v53  ;;  %3483 = vmatprep.subr.bf16.mxu1 %v4642_v18  ;;  %v951_v2 = vld [vmem:[%s7456_s1 + $0x5f8] sm:$0xff]  ;;  %v4695_v53 = vcombine.low %v938_v24, %v942_v56  ;;  %v4697_v18 = vcombine.low %v939_v17, %v943_v13  ;;  %v4752_v24 = vcombine.high %v994_v3, %v998_v59  ;;  %v1002_v17 = vld [vmem:[%s7456_s1 + $0x790] sm:$0xff] }
 0x1fc   :  { %v4706_v7 = vcombine.high %v947_v37, %v951_v2  ;;  %v1006_v13 = vld [vmem:[%s7456_s1 + $0x7b0] sm:$0xff] }
 0x1fe   :  { %3402 = vmatpush1.bf16.msra.mxu0 %v4639_v22  ;;  %3484 = vmatpush1.bf16.msra.mxu1 %v4641_v21  ;;  %v955_v22 = vld [vmem:[%s7456_s1 + $0x618] sm:$0xff] }
 0x1ff   :  { %3412 = vmatprep.subr.bf16.mxu0 %v4648_v50  ;;  %3494 = vmatprep.subr.bf16.mxu1 %v4650_v62  ;;  %v959_v21 = vld [vmem:[%s7456_s1 + $0x638] sm:$0xff]  ;;  %v4703_v50 = vcombine.low %v946_v43, %v950_v27  ;;  %v4705_v62 = vcombine.low %v947_v37, %v951_v2  ;;  %v4760_v43 = vcombine.high %v1002_v17, %v1006_v13  ;;  %v1010_v37 = vld [vmem:[%s7456_s1 + $0x7d0] sm:$0xff] }
 0x200   :  { %v4714_v40 = vcombine.high %v955_v22, %v959_v21  ;;  %v1014_v2 = vld [vmem:[%s7456_s1 + $0x7f0] sm:$0xff] }
 0x201   :  { %3404 = vmatmul.mubr.bf16.vlgmr.msra.gmra.mrb[4].mxu0 %v6375_v15  ;;  %3486 = vmatmul.mubr.bf16.vlgmr.msra.gmra.mrb[4].mxu1 %v6375_v15  ;;  %v4666_v15 = vcombine.high %v907_v47, %v911_v55  ;;  %v970_v47 = vld [vmem:[%s7456_s1 + $0x690] sm:$0xff] }
 0x202   :  { %3413 = vmatpush1.bf16.msra.mxu0 %v4647_v57  ;;  %3444 = vmatprep.mubr.bf16.mxu0 %v6760_v30  ;;  %v963_v57 = vld [vmem:[%s7456_s1 + $0x658] sm:$0xff]  ;;  %v974_v55 = vld [vmem:[%s7456_s1 + $0x6b0] sm:$0xff] }
 0x203   :  { %3495 = vmatpush1.bf16.msra.mxu1 %v4649_v6  ;;  %3526 = vmatprep.mubr.bf16.mxu1 %v6760_v30  ;;  %v919_v30 = vld [vmem:[%s7456_s1 + $0x4f8] sm:$0xff]  ;;  %v4728_v32 = vcombine.high %v970_v47, %v974_v55 }
 0x204   :  { %3414 = vmatprep.subr.bf16.mxu0 %v4656_v10  ;;  %3496 = vmatprep.subr.bf16.mxu1 %v4658_v48  ;;  %v4674_v5 = vcombine.high %v915_v46, %v919_v30  ;;  %v4673_v61 = vcombine.low %v915_v46, %v919_v30  ;;  %v967_v6 = vld [vmem:[%s7456_s1 + $0x678] sm:$0xff]  ;;  %v4711_v10 = vcombine.low %v954_v60, %v958_v54  ;;  %v978_v46 = vld [vmem:[%s7456_s1 + $0x6d0] sm:$0xff] }
 0x205   :  { %v4713_v48 = vcombine.low %v955_v22, %v959_v21  ;;  %v4722_v39 = vcombine.high %v963_v57, %v967_v6  ;;  %v982_v30 = vld [vmem:[%s7456_s1 + $0x6f0] sm:$0xff]  ;;  %v4768_v60 = vcombine.high %v1010_v37, %v1014_v2  ;;  %v4767_v22 = vcombine.low %v1010_v37, %v1014_v2 }
 0x206   :  { %3415 = vmatpush1.bf16.msra.mxu0 %v4655_v44  ;;  %v971_v44 = vld [vmem:[%s7456_s1 + $0x698] sm:$0xff]  ;;  %v4736_v41 = vcombine.high %v978_v46, %v982_v30 }
 0x207   :  { %3497 = vmatpush1.bf16.msra.mxu1 %v4657_v42  ;;  %3416 = vmatprep.subr.bf16.mxu0 %v4664_v34  ;;  %v975_v42 = vld [vmem:[%s7456_s1 + $0x6b8] sm:$0xff]  ;;  %v4719_v34 = vcombine.low %v962_v38, %v966_v52  ;;  %v5003_v38 = vld [vmem:[%s7458_s3 + $0x48] sm:$0xff]  }
 0x208   :  { %3498 = vmatprep.subr.bf16.mxu1 %v4666_v15  ;;  %v4721_v15 = vcombine.low %v963_v57, %v967_v6  ;;  %v4730_v26 = vcombine.high %v971_v44, %v975_v42  ;;  %v5004_v52 = vld [vmem:[%s7458_s3 + $0xc8] sm:$0xff]  }
 0x209   :  { %v5005_v57 = vld [vmem:[%s7458_s3 + $0x8] sm:$0xff]  }
 0x20a   :  { %3417 = vmatpush1.bf16.msra.mxu0 %v4663_v20  ;;  %v979_v20 = vld [vmem:[%s7456_s1 + $0x6d8] sm:$0xff]  ;;  %v5006_v6 = vld [vmem:[%s7458_s3 + $0x88] sm:$0xff]  }
 0x20b   :  { %3499 = vmatpush1.bf16.msra.mxu1 %v4665_v28  ;;  %3418 = vmatprep.subr.bf16.mxu0 %v4672_v31  ;;  %v983_v28 = vld [vmem:[%s7456_s1 + $0x6f8] sm:$0xff]  ;;  %v4727_v31 = vcombine.low %v970_v47, %v974_v55 }
 0x20c   :  { %3500 = vmatprep.subr.bf16.mxu1 %v4674_v5  ;;  %v4729_v5 = vcombine.low %v971_v44, %v975_v42  ;;  %v4738_v58 = vcombine.high %v979_v20, %v983_v28  ;;  %v5012_v47 = vld [vmem:[%s7458_s3 + $0xd8] sm:$0xff]   ;;  %v5015_v42 = vld [vmem:[%s7458_s3 + $0x60] sm:$0xff]  }
 0x20d   :  { %v5013_v55 = vld [vmem:[%s7458_s3 + $0x18] sm:$0xff]  }
 0x20e   :  { %3419 = vmatpush1.bf16.msra.mxu0 %v4671_v33  ;;  %v987_v33 = vld [vmem:[%s7456_s1 + $0x718] sm:$0xff] }
 0x20f   :  { %3501 = vmatpush1.bf16.msra.mxu1 %v4673_v61  ;;  %3420 = vmatprep.subr.bf16.mxu0 %v4680_v63  ;;  %v991_v61 = vld [vmem:[%s7456_s1 + $0x738] sm:$0xff]  ;;  %v4735_v63 = vcombine.low %v978_v46, %v982_v30  ;;  %v5020_v46 = vld [vmem:[%s7458_s3 + $0xe8] sm:$0xff]  }
 0x210   :  { %3502 = vmatprep.subr.bf16.mxu1 %v4682_v11  ;;  %v4737_v11 = vcombine.low %v979_v20, %v983_v28  ;;  %v4746_v45 = vcombine.high %v987_v33, %v991_v61  ;;  %v5014_v44 = vld [vmem:[%s7458_s3 + $0x98] sm:$0xff]   ;;  %v5021_v30 = vld [vmem:[%s7458_s3 + $0x28] sm:$0xff]   ;;  %v5023_v28 = vld [vmem:[%s7458_s3 + $0x70] sm:$0xff]  }
 0x211   :  { %v5022_v20 = vld [vmem:[%s7458_s3 + $0xa8] sm:$0xff]  }
 0x212   :  { %3421 = vmatpush1.bf16.msra.mxu0 %v4679_v0  ;;  %v995_v0 = vld [vmem:[%s7456_s1 + $0x758] sm:$0xff] }
 0x213   :  { %3503 = vmatpush1.bf16.msra.mxu1 %v4681_v25  ;;  %3422 = vmatprep.subr.bf16.mxu0 %v4688_v16  ;;  %v999_v25 = vld [vmem:[%s7456_s1 + $0x778] sm:$0xff]  ;;  %v4743_v16 = vcombine.low %v986_v51, %v990_v9 }
 0x214   :  { %3504 = vmatprep.subr.bf16.mxu1 %v4690_v23  ;;  %v4745_v23 = vcombine.low %v987_v33, %v991_v61  ;;  %v4754_v56 = vcombine.high %v995_v0, %v999_v25  ;;  %v5028_v51 = vld [vmem:[%s7458_s3 + $0xf8] sm:$0xff]   ;;  %v5031_v61 = vld [vmem:[%s7458_s3 + $0x140] sm:$0xff]  }
 0x215   :  { %v5029_v9 = vld [vmem:[%s7458_s3 + $0x38] sm:$0xff]  }
 0x216   :  { %3423 = vmatpush1.bf16.msra.mxu0 %v4687_v4  ;;  %v1003_v4 = vld [vmem:[%s7456_s1 + $0x798] sm:$0xff] }
 0x217   :  { %3505 = vmatpush1.bf16.msra.mxu1 %v4689_v14  ;;  %3424 = vmatprep.subr.bf16.mxu0 %v4696_v19  ;;  %v1007_v14 = vld [vmem:[%s7456_s1 + $0x7b8] sm:$0xff]  ;;  %v4751_v19 = vcombine.low %v994_v3, %v998_v59  ;;  %v1024_v3 = vsub.s32 1, %v5754_v29  ;;  %v1032_v59 = vsub.s32 3, %v5754_v29 }
 0x218   :  { %3506 = vmatprep.subr.bf16.mxu1 %v4698_v1  ;;  %v4753_v1 = vcombine.low %v995_v0, %v999_v25  ;;  %v4762_v27 = vcombine.high %v1003_v4, %v1007_v14  ;;  %v5030_v33 = vld [vmem:[%s7458_s3 + $0xb8] sm:$0xff]  }
 0x21a   :  { %3425 = vmatpush1.bf16.msra.mxu0 %v4695_v53  ;;  %v1011_v53 = vld [vmem:[%s7456_s1 + $0x7d8] sm:$0xff] }
 0x21b   :  { %3507 = vmatpush1.bf16.msra.mxu1 %v4697_v18  ;;  %3426 = vmatprep.subr.bf16.mxu0 %v4704_v49  ;;  %v1015_v18 = vld [vmem:[%s7456_s1 + $0x7f8] sm:$0xff]  ;;  %v4759_v49 = vcombine.low %v1002_v17, %v1006_v13 }
 0x21c   :  { %3508 = vmatprep.subr.bf16.mxu1 %v4706_v7  ;;  %v4761_v7 = vcombine.low %v1003_v4, %v1007_v14  ;;  %v4770_v54 = vcombine.high %v1011_v53, %v1015_v18  ;;  %v4769_v21 = vcombine.low %v1011_v53, %v1015_v18 }
 0x21e   :  { %3427 = vmatpush1.bf16.msra.mxu0 %v4703_v50  ;;  %v4999_v50 = vld [vmem:[%s7458_s3 + $0x40] sm:$0xff]  }
 0x21f   :  { %3509 = vmatpush1.bf16.msra.mxu1 %v4705_v62  ;;  %3428 = vmatprep.subr.bf16.mxu0 %v4712_v35  ;;  %v5000_v62 = vld [vmem:[%s7458_s3 + $0xc0] sm:$0xff]  }
 0x220   :  { %3510 = vmatprep.subr.bf16.mxu1 %v4714_v40  ;;  %v5001_v35 = vld [vmem:[%s7458_s3] sm:$0xff]  }
 0x221   :  { %v5002_v40 = vld [vmem:[%s7458_s3 + $0x80] sm:$0xff]  }
 0x222   :  { %3429 = vmatpush1.bf16.msra.mxu0 %v4711_v10  ;;  %v5007_v10 = vld [vmem:[%s7458_s3 + $0x50] sm:$0xff]  }
 0x223   :  { %3511 = vmatpush1.bf16.msra.mxu1 %v4713_v48  ;;  %3430 = vmatprep.subr.bf16.mxu0 %v4720_v8  ;;  %v5009_v48 = vld [vmem:[%s7458_s3 + $0x10] sm:$0xff]  }
 0x224   :  { %3512 = vmatprep.subr.bf16.mxu1 %v4722_v39  ;;  %v5010_v8 = vld [vmem:[%s7458_s3 + $0x90] sm:$0xff]   ;;  %v5011_v39 = vld [vmem:[%s7458_s3 + $0x58] sm:$0xff]  }
 0x226   :  { %3431 = vmatpush1.bf16.msra.mxu0 %v4719_v34  ;;  %v5016_v34 = vld [vmem:[%s7458_s3 + $0xe0] sm:$0xff]  }
 0x227   :  { %3513 = vmatpush1.bf16.msra.mxu1 %v4721_v15  ;;  %3432 = vmatprep.subr.bf16.mxu0 %v4728_v32  ;;  %v5017_v15 = vld [vmem:[%s7458_s3 + $0x20] sm:$0xff]  }
 0x228   :  { %3514 = vmatprep.subr.bf16.mxu1 %v4730_v26  ;;  %v5018_v32 = vld [vmem:[%s7458_s3 + $0xa0] sm:$0xff]   ;;  %v5019_v26 = vld [vmem:[%s7458_s3 + $0x68] sm:$0xff]  }
 0x22a   :  { %3433 = vmatpush1.bf16.msra.mxu0 %v4727_v31  ;;  %v5024_v31 = vld [vmem:[%s7458_s3 + $0xf0] sm:$0xff]  }
 0x22b   :  { %3515 = vmatpush1.bf16.msra.mxu1 %v4729_v5  ;;  %3434 = vmatprep.subr.bf16.mxu0 %v4736_v41  ;;  %v5025_v5 = vld [vmem:[%s7458_s3 + $0x30] sm:$0xff]  }
 0x22c   :  { %3516 = vmatprep.subr.bf16.mxu1 %v4738_v58  ;;  %v5026_v41 = vld [vmem:[%s7458_s3 + $0xb0] sm:$0xff]   ;;  %v5027_v58 = vld [vmem:[%s7458_s3 + $0x78] sm:$0xff]  }
 0x22e   :  { %3435 = vmatpush1.bf16.msra.mxu0 %v4735_v63  ;;  %v5032_v63 = vld [vmem:[%s7458_s3 + $0x1c0] sm:$0xff]  }
 0x22f   :  { %3517 = vmatpush1.bf16.msra.mxu1 %v4737_v11  ;;  %3436 = vmatprep.subr.bf16.mxu0 %v4744_v36  ;;  %v1020_v11 = vsub.s32 0, %v5754_v29  ;;  %v1028_v36 = vsub.s32 2, %v5754_v29 }
 0x230   :  { %3518 = vmatprep.subr.bf16.mxu1 %v4746_v45  ;;  %v7269_v45 = vld [vmem:[#allocation2] ss:$4 sm:$0xff] }
 0x231   :  { %v1021_v0 = vrot.slane %v7269_v45, %v1020_v11  ;;  %v1029_v25 = vrot.slane %v7269_v45, %v1028_v36 }
 0x232   :  { %3437 = vmatpush1.bf16.msra.mxu0 %v4743_v16  ;;  %v1025_v16 = vrot.slane %v7269_v45, %v1024_v3 }
 0x233   :  { %3519 = vmatpush1.bf16.msra.mxu1 %v4745_v23  ;;  %3438 = vmatprep.subr.bf16.mxu0 %v4752_v24  ;;  %v1033_v23 = vrot.slane %v7269_v45, %v1032_v59 }
 0x234   :  { %3520 = vmatprep.subr.bf16.mxu1 %v4754_v56 }
 0x236   :  { %3439 = vmatpush1.bf16.msra.mxu0 %v4751_v19 }
 0x237   :  { %3521 = vmatpush1.bf16.msra.mxu1 %v4753_v1  ;;  %3440 = vmatprep.subr.bf16.mxu0 %v4760_v43 }
 0x238   :  { %3522 = vmatprep.subr.bf16.mxu1 %v4762_v27 }
 0x23a   :  { %3441 = vmatpush1.bf16.msra.mxu0 %v4759_v49  ;;  %v5033_v49 = vld [vmem:[%s7458_s3 + $0x100] sm:$0xff]  }
 0x23b   :  { %3523 = vmatpush1.bf16.msra.mxu1 %v4761_v7  ;;  %3442 = vmatprep.subr.bf16.mxu0 %v4768_v60  ;;  %v5034_v7 = vld [vmem:[%s7458_s3 + $0x180] sm:$0xff]  }
 0x23c   :  { %3524 = vmatprep.subr.bf16.mxu1 %v4770_v54 }
 0x23e   :  { %3443 = vmatpush1.bf16.msra.mxu0 %v4767_v22  ;;  %v5035_v22 = vld [vmem:[%s7458_s3 + $0x148] sm:$0xff]  }
 0x23f   :  { %3525 = vmatpush1.bf16.msra.mxu1 %v4769_v21  ;;  %4858 = vmatprep.subr.bf16.mxu0 %v4999_v50  ;;  %v5036_v21 = vld [vmem:[%s7458_s3 + $0x1c8] sm:$0xff]  }
 0x240   :  { %4880 = vmatprep.subr.bf16.mxu1 %v5000_v62  ;;  %v5037_v50 = vld [vmem:[%s7458_s3 + $0x108] sm:$0xff]  }
 0x241   :  { %3445 = vmatmul.mubr.bf16.vlgmr.msra.gmra.mrb[4].mxu0 %v6787_v12  ;;  %v5038_v62 = vld [vmem:[%s7458_s3 + $0x188] sm:$0xff]  }
 0x242   :  { %3527 = vmatmul.mubr.bf16.vlgmr.msra.gmra.mrb[4].mxu1 %v6787_v12  ;;  %4859 = vmatpush3.bf16.msra.mxu0 %v5001_v35  ;;  %v5008_v12 = vld [vmem:[%s7458_s3 + $0xd0] sm:$0xff]  }
 0x243   :  { %4881 = vmatpush3.bf16.msra.mxu1 %v5002_v40  ;;  %4860 = vmatprep.subr.bf16.mxu0 %v5003_v38  ;;  %v5039_v35 = vld [vmem:[%s7458_s3 + $0x150] sm:$0xff]  }
 0x244   :  { %4882 = vmatprep.subr.bf16.mxu1 %v5004_v52  ;;  %v5040_v40 = vld [vmem:[%s7458_s3 + $0x1d0] sm:$0xff]  }
 0x245   :  { %v5041_v38 = vld [vmem:[%s7458_s3 + $0x110] sm:$0xff]  }
 0x246   :  { %4861 = vmatpush3.bf16.msra.mxu0 %v5005_v57  ;;  %v5042_v52 = vld [vmem:[%s7458_s3 + $0x190] sm:$0xff]   ;;  %v5043_v57 = vld [vmem:[%s7458_s3 + $0x158] sm:$0xff]  }
 0x247   :  { %4883 = vmatpush3.bf16.msra.mxu1 %v5006_v6  ;;  %4862 = vmatprep.subr.bf16.mxu0 %v5007_v10  ;;  %v5044_v6 = vld [vmem:[%s7458_s3 + $0x1d8] sm:$0xff]  }
 0x248   :  { %4884 = vmatprep.subr.bf16.mxu1 %v5008_v12  ;;  %v5045_v10 = vld [vmem:[%s7458_s3 + $0x118] sm:$0xff]  }
 0x249   :  { %v5046_v12 = vld [vmem:[%s7458_s3 + $0x198] sm:$0xff]  }
 0x24a   :  { %4863 = vmatpush3.bf16.msra.mxu0 %v5009_v48  ;;  %v5047_v48 = vld [vmem:[%s7458_s3 + $0x160] sm:$0xff]  }
 0x24b   :  { %4885 = vmatpush3.bf16.msra.mxu1 %v5010_v8  ;;  %4864 = vmatprep.subr.bf16.mxu0 %v5011_v39  ;;  %v5048_v8 = vld [vmem:[%s7458_s3 + $0x1e0] sm:$0xff]  }
 0x24c   :  { %4886 = vmatprep.subr.bf16.mxu1 %v5012_v47  ;;  %v5049_v39 = vld [vmem:[%s7458_s3 + $0x120] sm:$0xff]  }
 0x24d   :  { %v5050_v47 = vld [vmem:[%s7458_s3 + $0x1a0] sm:$0xff]  }
 0x24e   :  { %4865 = vmatpush3.bf16.msra.mxu0 %v5013_v55  ;;  %v5051_v55 = vld [vmem:[%s7458_s3 + $0x168] sm:$0xff]  }
 0x24f   :  { %4887 = vmatpush3.bf16.msra.mxu1 %v5014_v44  ;;  %4866 = vmatprep.subr.bf16.mxu0 %v5015_v42  ;;  %v5052_v44 = vld [vmem:[%s7458_s3 + $0x1e8] sm:$0xff]  }
 0x250   :  { %4888 = vmatprep.subr.bf16.mxu1 %v5016_v34  ;;  %v5053_v42 = vld [vmem:[%s7458_s3 + $0x128] sm:$0xff]  }
 0x251   :  { %v5054_v34 = vld [vmem:[%s7458_s3 + $0x1a8] sm:$0xff]  }
 0x252   :  { %4867 = vmatpush3.bf16.msra.mxu0 %v5017_v15  ;;  %v5055_v15 = vld [vmem:[%s7458_s3 + $0x170] sm:$0xff]  }
 0x253   :  { %4889 = vmatpush3.bf16.msra.mxu1 %v5018_v32  ;;  %4868 = vmatprep.subr.bf16.mxu0 %v5019_v26  ;;  %v5056_v32 = vld [vmem:[%s7458_s3 + $0x1f0] sm:$0xff]  }
 0x254   :  { %4890 = vmatprep.subr.bf16.mxu1 %v5020_v46  ;;  %v5057_v26 = vld [vmem:[%s7458_s3 + $0x130] sm:$0xff]  }
 0x255   :  { %v5058_v46 = vld [vmem:[%s7458_s3 + $0x1b0] sm:$0xff]  }
 0x256   :  { %4869 = vmatpush3.bf16.msra.mxu0 %v5021_v30  ;;  %v5059_v30 = vld [vmem:[%s7458_s3 + $0x178] sm:$0xff]  }
 0x257   :  { %4891 = vmatpush3.bf16.msra.mxu1 %v5022_v20  ;;  %4870 = vmatprep.subr.bf16.mxu0 %v5023_v28  ;;  %v5060_v20 = vld [vmem:[%s7458_s3 + $0x1f8] sm:$0xff]  }
 0x258   :  { %4892 = vmatprep.subr.bf16.mxu1 %v5024_v31  ;;  %v5061_v28 = vld [vmem:[%s7458_s3 + $0x138] sm:$0xff]  }
 0x259   :  { %v5062_v31 = vld [vmem:[%s7458_s3 + $0x1b8] sm:$0xff]  }
 0x25a   :  { %4871 = vmatpush3.bf16.msra.mxu0 %v5025_v5  ;;  %v1036_v5 = vsub.s32 4, %v5754_v29 }
 0x25b   :  { %4893 = vmatpush3.bf16.msra.mxu1 %v5026_v41  ;;  %4872 = vmatprep.subr.bf16.mxu0 %v5027_v58  ;;  %v1044_v41 = vsub.s32 6, %v5754_v29  ;;  %v1040_v58 = vsub.s32 5, %v5754_v29 }
 0x25c   :  { %4894 = vmatprep.subr.bf16.mxu1 %v5028_v51  ;;  %v1048_v51 = vsub.s32 7, %v5754_v29 }
 0x25e   :  { %4873 = vmatpush3.bf16.msra.mxu0 %v5029_v9  ;;  %v1037_v9 = vrot.slane %v7269_v45, %v1036_v5 }
 0x25f   :  { %4895 = vmatpush3.bf16.msra.mxu1 %v5030_v33  ;;  %4902 = vmatprep.subr.bf16.mxu0 %v5031_v61  ;;  %v1045_v33 = vrot.slane %v7269_v45, %v1044_v41  ;;  %v1041_v61 = vrot.slane %v7269_v45, %v1040_v58 }
 0x260   :  { %4924 = vmatprep.subr.bf16.mxu1 %v5032_v63  ;;  %v1049_v63 = vrot.slane %v7269_v45, %v1048_v51 }
 0x294   :  { %v3282_v24 = vpop.f32.mrb[0].mxu0  ;;  %v3364_v56 = vpop.f32.mrb[0].mxu1 }
 0x295   :  { %v4968_v17 = vadd.f32 %v3282_v24, %v1021_v0  ;;  %v4970_v13 = vadd.f32 %v3364_v56, %v1029_v25  ;;  %v3284_v4 = vpop.f32.mrb[1].mxu0  ;;  %v3366_v14 = vpop.f32.mrb[1].mxu1 }
 0x296   :  { %v4969_v19 = vadd.f32 %v3284_v4, %v1025_v16  ;;  %v4971_v1 = vadd.f32 %v3366_v14, %v1033_v23  ;;  %v3286_v43 = vpop.f32.mrb[2].mxu0  ;;  %v3368_v27 = vpop.f32.mrb[2].mxu1 }
 0x297   :  { %v3287_v37 = vpop.f32.mrb[3].mxu0  ;;  %v3369_v2 = vpop.f32.mrb[3].mxu1  ;;  %v3535_v60 = vpack.c.bf16 %v4968_v17, %v4968_v17  ;;  %v3537_v54 = vpack.c.bf16 %v4970_v13, %v4970_v13 }
 0x298   :  { %v3536_v53 = vpack.c.bf16 %v4969_v19, %v4969_v19  ;;  %v3538_v18 = vpack.c.bf16 %v4971_v1, %v4971_v1  ;;  %v4771_v2 = vld [vmem:[#allocation2 + $0x1] ss:$0 sm:$0xff] }
 0x29a   :  { %4092 = vmatprep.mubr.bf16.mxu0 %v3536_v53  ;;  %4132 = vmatprep.mubr.bf16.mxu1 %v3538_v18 }
 0x29b   :  { %4093 = vmatmul.mubr.bf16.vlgmr.msra.gmra.mrb[8].mxu0 %v3535_v60  ;;  %4133 = vmatmul.mubr.bf16.vlgmr.msra.gmra.mrb[8].mxu1 %v3537_v54 }
 0x29c   :  { %4903 = vmatpush3.bf16.msra.mxu0 %v5033_v49  ;;  %4925 = vmatpush3.bf16.msra.mxu1 %v5034_v7 }
 0x29d   :  { %4904 = vmatprep.subr.bf16.mxu0 %v5035_v22  ;;  %4926 = vmatprep.subr.bf16.mxu1 %v5036_v21 }
 0x2a0   :  { %4905 = vmatpush3.bf16.msra.mxu0 %v5037_v50  ;;  %4927 = vmatpush3.bf16.msra.mxu1 %v5038_v62  ;;  %v5065_v50 = vld [vmem:[#allocation5 + $0x4] ss:$8 sps:$4 sm:$0xff]  }
 0x2a1   :  { %4906 = vmatprep.subr.bf16.mxu0 %v5039_v35  ;;  %4928 = vmatprep.subr.bf16.mxu1 %v5040_v40  ;;  %v5063_v35 = vld [vmem:[#allocation5] ss:$8 sps:$4 sm:$0xff]  }
 0x2a4   :  { %4907 = vmatpush3.bf16.msra.mxu0 %v5041_v38  ;;  %4929 = vmatpush3.bf16.msra.mxu1 %v5042_v52  ;;  %v5068_v38 = vld [vmem:[#allocation5 + $0x14] ss:$8 sps:$4 sm:$0xff]   ;;  %v5066_v52 = vld [vmem:[#allocation5 + $0x10] ss:$8 sps:$4 sm:$0xff]  }
 0x2a5   :  { %4908 = vmatprep.subr.bf16.mxu0 %v5043_v57  ;;  %4930 = vmatprep.subr.bf16.mxu1 %v5044_v6  ;;  %v5185_v57 = vmov 0   ;;  %v5069_v6 = vld [vmem:[%s7460_s5 + $0x40] sm:$0xff]  }
 0x2a8   :  { %4909 = vmatpush3.bf16.msra.mxu0 %v5045_v10  ;;  %4931 = vmatpush3.bf16.msra.mxu1 %v5046_v12  ;;  %v5070_v10 = vld [vmem:[%s7460_s5] sm:$0xff]   ;;  %v5071_v12 = vld [vmem:[%s7460_s5 + $0x48] sm:$0xff]  }
 0x2a9   :  { %4910 = vmatprep.subr.bf16.mxu0 %v5047_v48  ;;  %4932 = vmatprep.subr.bf16.mxu1 %v5048_v8  ;;  %v5072_v48 = vld [vmem:[%s7460_s5 + $0x8] sm:$0xff]   ;;  %v5073_v8 = vld [vmem:[%s7460_s5 + $0x50] sm:$0xff]  }
 0x2ac   :  { %4911 = vmatpush3.bf16.msra.mxu0 %v5049_v39  ;;  %4933 = vmatpush3.bf16.msra.mxu1 %v5050_v47  ;;  %v5074_v39 = vld [vmem:[%s7460_s5 + $0x10] sm:$0xff]   ;;  %v5075_v47 = vld [vmem:[%s7460_s5 + $0x58] sm:$0xff]  }
 0x2ad   :  { %4912 = vmatprep.subr.bf16.mxu0 %v5051_v55  ;;  %4934 = vmatprep.subr.bf16.mxu1 %v5052_v44  ;;  %v5076_v55 = vld [vmem:[%s7460_s5 + $0x18] sm:$0xff]   ;;  %v5077_v44 = vld [vmem:[%s7460_s5 + $0x60] sm:$0xff]  }
 0x2b0   :  { %4913 = vmatpush3.bf16.msra.mxu0 %v5053_v42  ;;  %4935 = vmatpush3.bf16.msra.mxu1 %v5054_v34  ;;  %v5078_v42 = vld [vmem:[%s7460_s5 + $0x20] sm:$0xff]   ;;  %v5079_v34 = vld [vmem:[%s7460_s5 + $0x68] sm:$0xff]  }
 0x2b1   :  { %4914 = vmatprep.subr.bf16.mxu0 %v5055_v15  ;;  %4936 = vmatprep.subr.bf16.mxu1 %v5056_v32  ;;  %v5080_v15 = vld [vmem:[%s7460_s5 + $0x28] sm:$0xff]  }
 0x2b4   :  { %4915 = vmatpush3.bf16.msra.mxu0 %v5057_v26  ;;  %4937 = vmatpush3.bf16.msra.mxu1 %v5058_v46 }
 0x2b5   :  { %4916 = vmatprep.subr.bf16.mxu0 %v5059_v30  ;;  %4938 = vmatprep.subr.bf16.mxu1 %v5060_v20 }
 0x2b8   :  { %4917 = vmatpush3.bf16.msra.mxu0 %v5061_v28  ;;  %4939 = vmatpush3.bf16.msra.mxu1 %v5062_v31 }
 0x2b9   :  { %4263 = vmatprep.subr.bf16.mxu0 %v5065_v50  ;;  %4946 = vmatprep.subr.bf16.mxu1 %v5069_v6 }
 0x314   :  { %v3446_v36 = vpop.f32.mrb[4].mxu0 }
 0x315   :  { %v4972_v59 = vadd.f32 %v3446_v36, %v1037_v9  ;;  %v3528_v0 = vpop.f32.mrb[4].mxu1  ;;  %v3448_v25 = vpop.f32.mrb[5].mxu0  ;;  %v5082_v36 = vld [vmem:[%s7460_s5 + $0x30] sm:$0xff]  }
 0x316   :  { %v4974_v16 = vadd.f32 %v3528_v0, %v1045_v33  ;;  %v4973_v23 = vadd.f32 %v3448_v25, %v1041_v61  ;;  %v3530_v24 = vpop.f32.mrb[5].mxu1  ;;  %v3450_v56 = vpop.f32.mrb[6].mxu0  ;;  %v5084_v0 = vld [vmem:[%s7460_s5 + $0x38] sm:$0xff]   ;;  %v4227_v25 = vld [vmem:[#allocation2 + $0x2] ss:$4 sm:$0x3] }
 0x317   :  { %v4975_v17 = vadd.f32 %v3530_v24, %v1049_v63  ;;  %v3532_v13 = vpop.f32.mrb[6].mxu1  ;;  %v3451_v4 = vpop.f32.mrb[7].mxu0  ;;  %v3539_v1 = vpack.c.bf16 %v4972_v59, %v4972_v59  ;;  %v5081_v63 = vld [vmem:[%s7460_s5 + $0x70] sm:$0xff]   ;;  %v5083_v59 = vld [vmem:[%s7460_s5 + $0x78] sm:$0xff]   ;;  %s5186_s5 = smov [#allocation8]  }
 0x318   :  { %v3540_v14 = vpack.c.bf16 %v4973_v23, %v4973_v23  ;;  %v3533_v19 = vpop.f32.mrb[7].mxu1  ;;  %v3541_v27 = vpack.c.bf16 %v4974_v16, %v4974_v16  ;;  %v4232_v16 = vrot.slane %v4227_v25, %v1020_v11  ;;  %v4236_v23 = vrot.slane %v4227_v25, %v1024_v3  ;;  %s4501_s25 = sshll.u32 %s5186_s5, 4  ;;  %s4502_s25 = int_to_ptr.vmem [resolvable:$true] %s4501_s25 }
 0x319   :  { %v3542_v43 = vpack.c.bf16 %v4975_v17, %v4975_v17  ;;  %s5129_s26 = scalar_lea.vmem %s4502_s25, 32  ;;  %p5134_p3 = scmp.lt.s32.totalorder %s4502_s25, %s4502_s25 }
 0x31a   :  { %4172 = vmatprep.mubr.bf16.mxu0 %v3540_v14  ;;  %p5130_p2 = scmp.ne.s32.totalorder %s4502_s25, %s5129_s26  ;;  %p5135_p4 = scmp.lt.s32.totalorder %s5129_s26, %s5129_s26 }
 0x31b   :  { %4212 = vmatprep.mubr.bf16.mxu1 %v3542_v43  ;;  %4173 = vmatmul.mubr.bf16.vlgmr.msra.gmra.mrb[12].mxu0 %v3539_v1 }
 0x31c   :  { %4213 = vmatmul.mubr.bf16.vlgmr.msra.gmra.mrb[12].mxu1 %v3541_v27  ;;  %4264 = vmatpush1.bf16.msra.mxu0 %v5063_v35  ;;  %p5136_p5 = por %p5135_p4, %p5134_p3 }
 0x31d   :  { %4265 = vmatprep.subr.bf16.mxu0 %v5068_v38  ;;  %4295 = vmatprep.mubr.bf16.mxu0 %v5185_v57 }
 0x31e   :  { %4947 = vmatpush3.bf16.msra.mxu1 %v5070_v10  ;;  %p5137_p6 = pnand %p5136_p5, %p5130_p2 }
 0x31f   :  { %4948 = vmatprep.subr.bf16.mxu1 %v5071_v12 }
 0x320   :  { %4266 = vmatpush1.bf16.msra.mxu0 %v5066_v52 }
 0x322   :  { %4949 = vmatpush3.bf16.msra.mxu1 %v5072_v48 }
 0x323   :  { %4950 = vmatprep.subr.bf16.mxu1 %v5073_v8 }
 0x326   :  { %4951 = vmatpush3.bf16.msra.mxu1 %v5074_v39 }
 0x327   :  { %4952 = vmatprep.subr.bf16.mxu1 %v5075_v47 }
 0x32a   :  { %4953 = vmatpush3.bf16.msra.mxu1 %v5076_v55 }
 0x32b   :  { %4954 = vmatprep.subr.bf16.mxu1 %v5077_v44 }
 0x32e   :  { %4955 = vmatpush3.bf16.msra.mxu1 %v5078_v42 }
 0x32f   :  { %4956 = vmatprep.subr.bf16.mxu1 %v5079_v34 }
 0x332   :  { %4957 = vmatpush3.bf16.msra.mxu1 %v5080_v15 }
 0x333   :  { %4958 = vmatprep.subr.bf16.mxu1 %v5081_v63 }
 0x336   :  { %4959 = vmatpush3.bf16.msra.mxu1 %v5082_v36 }
 0x337   :  { %4960 = vmatprep.subr.bf16.mxu1 %v5083_v59 }
 0x33a   :  { %4961 = vmatpush3.bf16.msra.mxu1 %v5084_v0 }
 0x36e   :  { %v4874_v45 = vpop.f32.mrb[8].mxu0  ;;  %v4896_v37 = vpop.f32.mrb[8].mxu1 }
 0x36f   :  { %v4875_v53 = vpop.f32.mrb[9].mxu0  ;;  %v4897_v18 = vpop.f32.mrb[9].mxu1 }
 0x370   :  { %v4876_v49 = vadd.f32 %v4875_v53, %v4874_v45  ;;  %v4898_v7 = vadd.f32 %v4897_v18, %v4896_v37  ;;  %v4877_v60 = vpop.f32.mrb[10].mxu0  ;;  %v4899_v54 = vpop.f32.mrb[10].mxu1 }
 0x371   :  { %v4878_v22 = vpop.f32.mrb[11].mxu0  ;;  %v4900_v21 = vpop.f32.mrb[11].mxu1 }
 0x372   :  { %v4095_v62 = vadd.f32 %v4876_v49, %v4771_v2 }
 0x374   :  { %v4135_v40 = vadd.f32 %v4898_v7, %v4095_v62 }
 0x3ee   :  { %v4918_v32 = vpop.f32.mrb[12].mxu0 }
 0x3ef   :  { %v4940_v26 = vpop.f32.mrb[12].mxu1  ;;  %v4919_v46 = vpop.f32.mrb[13].mxu0 }
 0x3f0   :  { %v4920_v30 = vadd.f32 %v4919_v46, %v4918_v32  ;;  %v4941_v20 = vpop.f32.mrb[13].mxu1  ;;  %v4921_v28 = vpop.f32.mrb[14].mxu0 }
 0x3f1   :  { %v4942_v31 = vadd.f32 %v4941_v20, %v4940_v26  ;;  %v4943_v5 = vpop.f32.mrb[14].mxu1  ;;  %v4922_v41 = vpop.f32.mrb[15].mxu0 }
 0x3f2   :  { %v4175_v58 = vadd.f32 %v4920_v30, %v4135_v40  ;;  %v4944_v51 = vpop.f32.mrb[15].mxu1 }
 0x3f4   :  { %v4215_v9 = vadd.f32 %v4942_v31, %v4175_v58 }
 0x3f6   :  { %v4220_v33 = vmax.f32 %v4215_v9, 0.0 }
 0x3f8   :  { %v4221_v61 = vpack.c.bf16 %v4220_v33, %v4220_v33  ;;  %4484 = vst.msk [vmem:[#allocation8] sm:$0x3] %vm4483_vm1, %v4220_v33 }
 0x3fa   :  { %4840 = vmatmul.mubr.msk.bf16.vlgmr.msra.gmra.mrb[16].mxu0 %vm4259_vm2, %v4221_v61 }
 0x4cd   :  { %v4297_v24 = vpop.f32.mrb[16].mxu0 }
 0x4ce   :  { %v4298_v56 = vadd.f32 %v4297_v24, %v4232_v16  ;;  %v4299_v17 = vpop.f32.mrb[17].mxu0 }
 0x4cf   :  { %v4300_v13 = vadd.f32 %v4299_v17, %v4236_v23  ;;  %v4301_v4 = vpop.f32.mrb[18].mxu0 }
 0x4d0   :  { %v4304_v14 = vmax.f32 %v4298_v56, 0.0  ;;  %v4302_v19 = vpop.f32.mrb[19].mxu0 }
 0x4d1   :  { %v4305_v1 = vmax.f32 %v4300_v13, 0.0 }
 0x4d2   :  { %v4306_v27 = vpack.c.bf16 %v4304_v14, %v4304_v14 }
 0x4d3   :  { %v4307_v43 = vpack.c.bf16 %v4305_v1, %v4305_v1 }
 0x4d5   :  { %4473 = vmatprep.mubr.bf16.mxu1 %v4307_v43 }
 0x4d6   :  { %4474 = vmatmul.mubr.bf16.vlgmr.msra.gmra.mrb[16].mxu1 %v4306_v27 }
 0x4d7   :  { %5140 = shalt.err (!%p5137_p6)
}
 0x4d8   :  { %s5141_s30 = scalar_lea.hbm %s7462_s7, 32 }
 0x4d9   :  { %p5142_p7 = scmp.ne.s32.totalorder %s7462_s7, %s5141_s30  ;;  %p5145_p8 = scmp.lt.u32.totalorder %s5141_s30, %s7462_s7 }
 0x4db   :  { %p5147_p9 = pnand %p5145_p8, %p5142_p7 }
 0x4dd   :  { %5150 = shalt.err (!%p5147_p9)
}
 0x4de   :  { %4504 = dma.vmem_to_hbm [thread:$0]  %s4502_s25, 32, %s7462_s7, [#allocation9]   ;;  %v4841_v11 = vld [vmem:[#allocation2 + $0x3] ss:$0 sm:$0xff]  ;;  %vm4481_vm3 = vcmask 50176  }
 0x4df   :  { %s5187_s11 = smov [#allocation7]  }
 0x4e0   :  { %s4491_s12 = sshll.u32 %s5187_s11, 4  ;;  %s4492_s12 = int_to_ptr.vmem [resolvable:$true] %s4491_s12 }
 0x4e1   :  { %s5151_s13 = scalar_lea.vmem %s4492_s12, 32  ;;  %p5156_p11 = scmp.lt.s32.totalorder %s4492_s12, %s4492_s12 }
 0x4e2   :  { %p5152_p10 = scmp.ne.s32.totalorder %s4492_s12, %s5151_s13  ;;  %p5157_p12 = scmp.lt.s32.totalorder %s5151_s13, %s5151_s13 }
 0x4e4   :  { %p5158_p13 = por %p5157_p12, %p5156_p11 }
 0x4e6   :  { %p5159_p0 = pnand %p5158_p13, %p5152_p10 }
 0x5a9   :  { %v4962_v29 = vpop.f32.mrb[16].mxu1 }
 0x5aa   :  { %v4963_v3 = vpop.f32.mrb[17].mxu1 }
 0x5ab   :  { %v4964_v45 = vadd.f32 %v4963_v3, %v4962_v29  ;;  %v4965_v37 = vpop.f32.mrb[18].mxu1 }
 0x5ac   :  { %v4966_v2 = vpop.f32.mrb[19].mxu1 }
 0x5ad   :  { %v4476_v53 = vadd.f32 %v4964_v45, %v4841_v11 }
 0x5af   :  { %4482 = vst.msk [vmem:[#allocation7] sm:$0x3] %vm4481_vm3, %v4476_v53 }
 0x5b0   :  { %5162 = shalt.err (!%p5159_p0)
}
 0x5b1   :  { %s5163_s15 = scalar_lea.hbm %s7461_s6, 32 }
 0x5b2   :  { %p5164_p1 = scmp.ne.s32.totalorder %s7461_s6, %s5163_s15  ;;  %p5167_p2 = scmp.lt.u32.totalorder %s5163_s15, %s7461_s6 }
 0x5b4   :  { %p5169_p3 = pnand %p5167_p2, %p5164_p1 }
 0x5b6   :  { %5172 = shalt.err (!%p5169_p3)
}
 0x5b7   :  { %4494 = dma.vmem_to_hbm [thread:$0]  %s4492_s12, 32, %s7461_s6, [#allocation4]  }
 0x5b8   :  { %5177 = dma.done.wait [#allocation4], 32  }
 0x5b9   :  { %5178 = vsyncadd [#allocation4], 4294967264 }
 0x5ba   :  { %5179 = dma.done.wait [#allocation9], 32  }
 0x5bb   :  { %5180 = vsyncadd [#allocation9], 4294967264 }
 0x5bc   :  { %4511 = vsyncpa [#allocation3], 1 }
 0x5bd   :  { %4512 = vsyncpa [#allocation6], 1 }
 0x5be   :  { %4513 = vsyncpa [#allocation4], 1 }
 0x5bf   :  { %4514 = vsyncpa [#allocation9], 1 }

</bundles_post_ra>
